<compile_context>
chip_gen: v5e
topology: v5e:2x2
jax: 0.10.0
libtpu: 0.0.40
codegen_flags: <defaults>
</compile_context>

<pallas_src>
import functools

import jax
import jax.numpy as jnp
from jax.experimental import pallas as pl
from jax.experimental.pallas import tpu as pltpu


# ----------------------------------------------------------------------------
# Fused kernel: embedding gather + 3 stacked LSTM layers (wavefront) + softmax.
# ----------------------------------------------------------------------------
def _fused_kernel(ids_ref, emb_ref,
                  wih1_ref, whh1_ref, b1_ref,
                  wcat2_ref, b2_ref,
                  wcat3_ref, b3_ref,
                  out_ref, *, T, B, Vpad):
    f32, bf16 = jnp.float32, jnp.bfloat16
    TB = T * B
    H1 = whh1_ref.shape[0]
    H2 = wcat3_ref.shape[1] // 4

    # ---- Embedding: one-hot @ table (single prologue MXU matmul, exact f32).
    ids = ids_ref[...]                                              # (TB, 1) i32
    onehot = (jax.lax.broadcasted_iota(jnp.int32, (TB, Vpad), 1)
              == ids).astype(f32)                                   # (TB, Vpad)
    x = jnp.dot(onehot, emb_ref[...], preferred_element_type=f32)   # (TB, E)

    # ---- Layer-1 input projection hoisted out of the recurrence.
    g1_all = (jnp.dot(x.astype(bf16), wih1_ref[...],
                      preferred_element_type=f32) + b1_ref[...])    # (TB, 4H1)
    g1 = [g1_all[t * B:(t + 1) * B, :] for t in range(T)]

    whh1 = whh1_ref[...]
    wcat2, b2 = wcat2_ref[...], b2_ref[...]
    wcat3, b3 = wcat3_ref[...], b3_ref[...]

    def cell(gates, c, H):
        # Gate columns pre-permuted to [i, f, o, g]; sigmoid == 0.5*tanh(0.5x)+0.5.
        sig = 0.5 * jnp.tanh(0.5 * gates[:, :3 * H]) + 0.5
        # TODO(synk): the 64-lane gate slices are not 128-aligned; a
        # pltpu.roll-based alignment could shave a few VALU cycles per step.
        i_g, f_g, o_g = sig[:, :H], sig[:, H:2 * H], sig[:, 2 * H:3 * H]
        g_g = jnp.tanh(gates[:, 3 * H:])
        c_new = f_g * c + i_g * g_g
        h_new = o_g * jnp.tanh(c_new)
        return h_new, c_new

    h1 = jnp.zeros((B, H1), f32); c1 = jnp.zeros((B, H1), f32)
    h2 = jnp.zeros((B, H1), f32); c2 = jnp.zeros((B, H1), f32)
    h3 = jnp.zeros((B, H2), f32); c3 = jnp.zeros((B, H2), f32)
    y1_prev = y2_prev = None

    # Wavefront over macro steps: {layer1[s], layer2[s-1], layer3[s-2]} are
    # mutually independent within one macro step (statically unrolled).
    for s in range(T + 2):
        new_y1 = new_y2 = None
        if s < T:                      # lstm_1 / layer 0, time s
            gates = g1[s] + jnp.dot(h1.astype(bf16), whh1,
                                    preferred_element_type=f32)
            h1, c1 = cell(gates, c1, H1)
            new_y1 = h1
        if 1 <= s <= T:                # lstm_1 / layer 1, time s-1
            xz = jnp.concatenate([y1_prev.astype(bf16), h2.astype(bf16)],
                                 axis=-1)                           # (B, 2H1)
            gates = jnp.dot(xz, wcat2, preferred_element_type=f32) + b2
            h2, c2 = cell(gates, c2, H1)
            new_y2 = h2
        if 2 <= s <= T + 1:            # lstm_2, time s-2, + fused exact softmax
            xz = jnp.concatenate([y2_prev.astype(bf16), h3.astype(bf16)],
                                 axis=-1)                           # (B, 2H)
            gates = jnp.dot(xz, wcat3, preferred_element_type=f32) + b3
            h3, c3 = cell(gates, c3, H2)
            z = h3 - jnp.max(h3, axis=-1, keepdims=True)
            e = jnp.exp(z)
            out_ref[s - 2] = e / jnp.sum(e, axis=-1, keepdims=True)
        y1_prev, y2_prev = new_y1, new_y2


# ----------------------------------------------------------------------------
# Load-time parameter prep (outside the per-call jit) + wrapper.
# ----------------------------------------------------------------------------
def _prep_gate_weights(w_ih, w_hh, b_ih, b_hh):
    """Transpose PyTorch (4H, Din)/(4H, H) weights to (Din, 4H)/(H, 4H), fold
    the two biases, and permute gate blocks [i,f,g,o] -> [i,f,o,g]."""
    H = w_hh.shape[1]
    perm = jnp.concatenate([jnp.arange(0, 2 * H),        # i, f
                            jnp.arange(3 * H, 4 * H),    # o
                            jnp.arange(2 * H, 3 * H)])   # g
    return (jnp.transpose(w_ih[perm]),                   # (Din, 4H)
            jnp.transpose(w_hh[perm]),                   # (H,   4H)
            (b_ih + b_hh)[perm].reshape(1, 4 * H))       # (1,   4H)


def prepare_params(emb_table, p_l10, p_l11, p_l20):
    """One-time prep: gate permute/transpose, bias fold, [w_ih; w_hh] stacking
    for layers 2/3, bf16 weight cast, embedding table padded to 128 rows."""
    bf16 = jnp.bfloat16
    V, E = emb_table.shape
    Vpad = ((V + 127) // 128) * 128
    emb_padded = jnp.zeros((Vpad, E), jnp.float32).at[:V].set(
        emb_table.astype(jnp.float32))

    wih1, whh1, b1 = _prep_gate_weights(*p_l10)
    wih2, whh2, b2 = _prep_gate_weights(*p_l11)
    wih3, whh3, b3 = _prep_gate_weights(*p_l20)
    return dict(
        emb=emb_padded,
        wih1=wih1.astype(bf16), whh1=whh1.astype(bf16), b1=b1,
        wcat2=jnp.concatenate([wih2, whh2], axis=0).astype(bf16), b2=b2,
        wcat3=jnp.concatenate([wih3, whh3], axis=0).astype(bf16), b3=b3,
    )


def mymodel_forward(ids, params):
    """ids: (T, B) int32 token ids. Returns (T, B, H2) softmax probabilities."""
    T, B = ids.shape
    Vpad = params["emb"].shape[0]
    H2 = params["wcat3"].shape[1] // 4
    ids_flat = ids.reshape(T * B, 1).astype(jnp.int32)

    vmem = pl.BlockSpec(memory_space=pltpu.MemorySpace.VMEM)
    return pl.pallas_call(
        functools.partial(_fused_kernel, T=T, B=B, Vpad=Vpad),
        out_shape=jax.ShapeDtypeStruct((T, B, H2), jnp.float32),
        in_specs=[vmem] * 9,
        out_specs=vmem,
    )(ids_flat, params["emb"], params["wih1"], params["whh1"], params["b1"],
      params["wcat2"], params["b2"], params["wcat3"], params["b3"])


# ----------------------------------------------------------------------------
# Pure-JAX reference (PyTorch semantics, gate order [i, f, g, o]) for checking.
# ----------------------------------------------------------------------------
def _lstm_layer_ref(x, w_ih, w_hh, b_ih, b_hh):
    T, B, _ = x.shape
    H = w_hh.shape[1]

    def step(carry, x_t):
        h, c = carry
        gates = x_t @ w_ih.T + h @ w_hh.T + b_ih + b_hh
        i = jax.nn.sigmoid(gates[:, 0 * H:1 * H])
        f = jax.nn.sigmoid(gates[:, 1 * H:2 * H])
        g = jnp.tanh(gates[:, 2 * H:3 * H])
        o = jax.nn.sigmoid(gates[:, 3 * H:4 * H])
        c = f * c + i * g
        h = o * jnp.tanh(c)
        return (h, c), h

    init = (jnp.zeros((B, H), jnp.float32), jnp.zeros((B, H), jnp.float32))
    _, hs = jax.lax.scan(step, init, x)
    return hs                                                   # (T, B, H)


def make_lstm_params(key, in_dim, hidden):
    k1, k2, k3, k4 = jax.random.split(key, 4)
    s = hidden ** -0.5
    return (jax.random.uniform(k1, (4 * hidden, in_dim), jnp.float32, -s, s),
            jax.random.uniform(k2, (4 * hidden, hidden), jnp.float32, -s, s),
            jax.random.uniform(k3, (4 * hidden,), jnp.float32, -s, s),
            jax.random.uniform(k4, (4 * hidden,), jnp.float32, -s, s))


if __name__ == "__main__":
    # Small, module-consistent shapes.
    num_embeddings = 50
    embedding_dim = 128
    hidden_dim_1 = 64
    hidden_dim_2 = 64
    T, B = 8, 2   # (seq_len, batch)

    key = jax.random.PRNGKey(0)
    k_emb, k_l10, k_l11, k_l20, k_x = jax.random.split(key, 5)

    emb_table = 0.1 * jax.random.normal(
        k_emb, (num_embeddings, embedding_dim), jnp.float32)
    p_l10 = make_lstm_params(k_l10, embedding_dim, hidden_dim_1)   # lstm_1 L0
    p_l11 = make_lstm_params(k_l11, hidden_dim_1, hidden_dim_1)    # lstm_1 L1
    p_l20 = make_lstm_params(k_l20, hidden_dim_1, hidden_dim_2)    # lstm_2 L0

    x_ids = jax.random.randint(k_x, (T, B), 0, num_embeddings, jnp.int32)

    # One-time (load-time) weight prep, outside the per-call jit.
    params = prepare_params(emb_table, p_l10, p_l11, p_l20)
    params = jax.tree_util.tree_map(jax.block_until_ready, params)

    fwd = jax.jit(mymodel_forward)
    out = fwd(x_ids, params)
    jax.block_until_ready(out)
    assert out.shape == (T, B, hidden_dim_2), out.shape

    # Verify against a pure-JAX f32 reference of the PyTorch module (tolerance
    # covers bf16 matmul operands and f32 re-association in the fused kernel).
    def forward_ref(ids):
        h = jnp.take(emb_table, ids, axis=0)
        h = _lstm_layer_ref(h, *p_l10)
        h = _lstm_layer_ref(h, *p_l11)
        h = _lstm_layer_ref(h, *p_l20)
        return jax.nn.softmax(h, axis=-1)

    ref = jax.jit(forward_ref)(x_ids)
    max_err = float(jnp.max(jnp.abs(out - ref)))
    assert bool(jnp.allclose(out, ref, atol=1e-2, rtol=1e-2)), max_err
    # Exact softmax normalization => rows sum to 1 to f32 precision.
    assert bool(jnp.allclose(jnp.sum(out, axis=-1), 1.0, atol=1e-4))
    print("KERNEL_OK")
</pallas_src>

<mosaic_0001>
module attributes {stable_mosaic.version = 11 : i64} {
  func.func @_fused_kernel(%arg0: memref<16x1xi32, #tpu.memory_space<vmem>>, %arg1: memref<128x128xf32, #tpu.memory_space<vmem>>, %arg2: memref<128x256xbf16, #tpu.memory_space<vmem>>, %arg3: memref<64x256xbf16, #tpu.memory_space<vmem>>, %arg4: memref<1x256xf32, #tpu.memory_space<vmem>>, %arg5: memref<128x256xbf16, #tpu.memory_space<vmem>>, %arg6: memref<1x256xf32, #tpu.memory_space<vmem>>, %arg7: memref<128x256xbf16, #tpu.memory_space<vmem>>, %arg8: memref<1x256xf32, #tpu.memory_space<vmem>>, %arg9: memref<8x2x64xf32, #tpu.memory_space<vmem>>) attributes {dimension_semantics = [], scalar_prefetch = 0 : i64, scratch_operands = 0 : i64, tpu.core_type = #tpu.core_type<tc>} {
    %c0 = arith.constant 0 : index
    %c0_0 = arith.constant 0 : index
    %0 = vector.load %arg0[%c0, %c0_0] : memref<16x1xi32, #tpu.memory_space<vmem>>, vector<16x1xi32>
    %1 = tpu.iota {dimensions = array<i32: 1>} : vector<16x128xi32>
    %2 = vector.broadcast %0 : vector<16x1xi32> to vector<16x128xi32>
    %3 = arith.cmpi eq, %1, %2 : vector<16x128xi32>
    %4 = arith.extui %3 : vector<16x128xi1> to vector<16x128xi32>
    %5 = arith.sitofp %4 : vector<16x128xi32> to vector<16x128xf32>
    %c0_1 = arith.constant 0 : index
    %c0_2 = arith.constant 0 : index
    %6 = vector.load %arg1[%c0_1, %c0_2] : memref<128x128xf32, #tpu.memory_space<vmem>>, vector<128x128xf32>
    %cst = arith.constant dense<0.000000e+00> : vector<16x128xf32>
    %7 = tpu.matmul %5, %6, %cst {dimension_numbers = #tpu.dot_dimension_numbers<[1], [0], [0], [1], [0, 0, 1, 1], [], []>} : vector<16x128xf32>, vector<128x128xf32>, vector<16x128xf32> -> vector<16x128xf32>
    %8 = arith.truncf %7 : vector<16x128xf32> to vector<16x128xbf16>
    %c0_3 = arith.constant 0 : index
    %c0_4 = arith.constant 0 : index
    %9 = vector.load %arg2[%c0_3, %c0_4] : memref<128x256xbf16, #tpu.memory_space<vmem>>, vector<128x256xbf16>
    %cst_5 = arith.constant dense<0.000000e+00> : vector<16x256xf32>
    %10 = tpu.matmul %8, %9, %cst_5 {dimension_numbers = #tpu.dot_dimension_numbers<[1], [0], [0], [1], [0, 0, 1, 1], [], []>} : vector<16x128xbf16>, vector<128x256xbf16>, vector<16x256xf32> -> vector<16x256xf32>
    %c0_6 = arith.constant 0 : index
    %c0_7 = arith.constant 0 : index
    %11 = vector.load %arg4[%c0_6, %c0_7] : memref<1x256xf32, #tpu.memory_space<vmem>>, vector<1x256xf32>
    %12 = vector.broadcast %11 : vector<1x256xf32> to vector<16x256xf32>
    %13 = arith.addf %10, %12 : vector<16x256xf32>
    %14 = vector.extract_strided_slice %13 {offsets = [0, 0], sizes = [2, 256], strides = [1, 1]} : vector<16x256xf32> to vector<2x256xf32>
    %15 = vector.extract_strided_slice %13 {offsets = [2, 0], sizes = [2, 256], strides = [1, 1]} : vector<16x256xf32> to vector<2x256xf32>
    %16 = vector.extract_strided_slice %13 {offsets = [4, 0], sizes = [2, 256], strides = [1, 1]} : vector<16x256xf32> to vector<2x256xf32>
    %17 = vector.extract_strided_slice %13 {offsets = [6, 0], sizes = [2, 256], strides = [1, 1]} : vector<16x256xf32> to vector<2x256xf32>
    %18 = vector.extract_strided_slice %13 {offsets = [8, 0], sizes = [2, 256], strides = [1, 1]} : vector<16x256xf32> to vector<2x256xf32>
    %19 = vector.extract_strided_slice %13 {offsets = [10, 0], sizes = [2, 256], strides = [1, 1]} : vector<16x256xf32> to vector<2x256xf32>
    %20 = vector.extract_strided_slice %13 {offsets = [12, 0], sizes = [2, 256], strides = [1, 1]} : vector<16x256xf32> to vector<2x256xf32>
    %21 = vector.extract_strided_slice %13 {offsets = [14, 0], sizes = [2, 256], strides = [1, 1]} : vector<16x256xf32> to vector<2x256xf32>
    %c0_8 = arith.constant 0 : index
    %c0_9 = arith.constant 0 : index
    %22 = vector.load %arg3[%c0_8, %c0_9] : memref<64x256xbf16, #tpu.memory_space<vmem>>, vector<64x256xbf16>
    %c0_10 = arith.constant 0 : index
    %c0_11 = arith.constant 0 : index
    %23 = vector.load %arg5[%c0_10, %c0_11] : memref<128x256xbf16, #tpu.memory_space<vmem>>, vector<128x256xbf16>
    %c0_12 = arith.constant 0 : index
    %c0_13 = arith.constant 0 : index
    %24 = vector.load %arg6[%c0_12, %c0_13] : memref<1x256xf32, #tpu.memory_space<vmem>>, vector<1x256xf32>
    %c0_14 = arith.constant 0 : index
    %c0_15 = arith.constant 0 : index
    %25 = vector.load %arg7[%c0_14, %c0_15] : memref<128x256xbf16, #tpu.memory_space<vmem>>, vector<128x256xbf16>
    %c0_16 = arith.constant 0 : index
    %c0_17 = arith.constant 0 : index
    %26 = vector.load %arg8[%c0_16, %c0_17] : memref<1x256xf32, #tpu.memory_space<vmem>>, vector<1x256xf32>
    %cst_18 = arith.constant 0.000000e+00 : f32
    %27 = vector.broadcast %cst_18 : f32 to vector<2x64xf32>
    %cst_19 = arith.constant 0.000000e+00 : f32
    %28 = vector.broadcast %cst_19 : f32 to vector<2x64xf32>
    %cst_20 = arith.constant 0.000000e+00 : f32
    %29 = vector.broadcast %cst_20 : f32 to vector<2x64xf32>
    %cst_21 = arith.constant 0.000000e+00 : f32
    %30 = vector.broadcast %cst_21 : f32 to vector<2x64xf32>
    %cst_22 = arith.constant 0.000000e+00 : f32
    %31 = vector.broadcast %cst_22 : f32 to vector<2x64xf32>
    %cst_23 = arith.constant 0.000000e+00 : f32
    %32 = vector.broadcast %cst_23 : f32 to vector<2x64xf32>
    %33 = arith.truncf %27 : vector<2x64xf32> to vector<2x64xbf16>
    %cst_24 = arith.constant dense<0.000000e+00> : vector<2x256xf32>
    %34 = tpu.matmul %33, %22, %cst_24 {dimension_numbers = #tpu.dot_dimension_numbers<[1], [0], [0], [1], [0, 0, 1, 1], [], []>} : vector<2x64xbf16>, vector<64x256xbf16>, vector<2x256xf32> -> vector<2x256xf32>
    %35 = arith.addf %14, %34 : vector<2x256xf32>
    %36 = vector.extract_strided_slice %35 {offsets = [0, 0], sizes = [2, 192], strides = [1, 1]} : vector<2x256xf32> to vector<2x192xf32>
    %cst_25 = arith.constant 5.000000e-01 : f32
    %37 = vector.broadcast %cst_25 : f32 to vector<2x192xf32>
    %38 = arith.mulf %37, %36 : vector<2x192xf32>
    %39 = math.tanh %38 : vector<2x192xf32>
    %cst_26 = arith.constant 5.000000e-01 : f32
    %40 = vector.broadcast %cst_26 : f32 to vector<2x192xf32>
    %41 = arith.mulf %40, %39 : vector<2x192xf32>
    %cst_27 = arith.constant 5.000000e-01 : f32
    %42 = vector.broadcast %cst_27 : f32 to vector<2x192xf32>
    %43 = arith.addf %41, %42 : vector<2x192xf32>
    %44 = vector.extract_strided_slice %43 {offsets = [0, 0], sizes = [2, 64], strides = [1, 1]} : vector<2x192xf32> to vector<2x64xf32>
    %45 = vector.extract_strided_slice %43 {offsets = [0, 64], sizes = [2, 64], strides = [1, 1]} : vector<2x192xf32> to vector<2x64xf32>
    %46 = vector.extract_strided_slice %43 {offsets = [0, 128], sizes = [2, 64], strides = [1, 1]} : vector<2x192xf32> to vector<2x64xf32>
    %47 = vector.extract_strided_slice %35 {offsets = [0, 192], sizes = [2, 64], strides = [1, 1]} : vector<2x256xf32> to vector<2x64xf32>
    %48 = math.tanh %47 : vector<2x64xf32>
    %49 = arith.mulf %45, %28 : vector<2x64xf32>
    %50 = arith.mulf %44, %48 : vector<2x64xf32>
    %51 = arith.addf %49, %50 : vector<2x64xf32>
    %52 = math.tanh %51 : vector<2x64xf32>
    %53 = arith.mulf %46, %52 : vector<2x64xf32>
    %54 = arith.truncf %53 : vector<2x64xf32> to vector<2x64xbf16>
    %cst_28 = arith.constant dense<0.000000e+00> : vector<2x256xf32>
    %55 = tpu.matmul %54, %22, %cst_28 {dimension_numbers = #tpu.dot_dimension_numbers<[1], [0], [0], [1], [0, 0, 1, 1], [], []>} : vector<2x64xbf16>, vector<64x256xbf16>, vector<2x256xf32> -> vector<2x256xf32>
    %56 = arith.addf %15, %55 : vector<2x256xf32>
    %57 = vector.extract_strided_slice %56 {offsets = [0, 0], sizes = [2, 192], strides = [1, 1]} : vector<2x256xf32> to vector<2x192xf32>
    %cst_29 = arith.constant 5.000000e-01 : f32
    %58 = vector.broadcast %cst_29 : f32 to vector<2x192xf32>
    %59 = arith.mulf %58, %57 : vector<2x192xf32>
    %60 = math.tanh %59 : vector<2x192xf32>
    %cst_30 = arith.constant 5.000000e-01 : f32
    %61 = vector.broadcast %cst_30 : f32 to vector<2x192xf32>
    %62 = arith.mulf %61, %60 : vector<2x192xf32>
    %cst_31 = arith.constant 5.000000e-01 : f32
    %63 = vector.broadcast %cst_31 : f32 to vector<2x192xf32>
    %64 = arith.addf %62, %63 : vector<2x192xf32>
    %65 = vector.extract_strided_slice %64 {offsets = [0, 0], sizes = [2, 64], strides = [1, 1]} : vector<2x192xf32> to vector<2x64xf32>
    %66 = vector.extract_strided_slice %64 {offsets = [0, 64], sizes = [2, 64], strides = [1, 1]} : vector<2x192xf32> to vector<2x64xf32>
    %67 = vector.extract_strided_slice %64 {offsets = [0, 128], sizes = [2, 64], strides = [1, 1]} : vector<2x192xf32> to vector<2x64xf32>
    %68 = vector.extract_strided_slice %56 {offsets = [0, 192], sizes = [2, 64], strides = [1, 1]} : vector<2x256xf32> to vector<2x64xf32>
    %69 = math.tanh %68 : vector<2x64xf32>
    %70 = arith.mulf %66, %51 : vector<2x64xf32>
    %71 = arith.mulf %65, %69 : vector<2x64xf32>
    %72 = arith.addf %70, %71 : vector<2x64xf32>
    %73 = math.tanh %72 : vector<2x64xf32>
    %74 = arith.mulf %67, %73 : vector<2x64xf32>
    %75 = arith.truncf %53 : vector<2x64xf32> to vector<2x64xbf16>
    %76 = arith.truncf %29 : vector<2x64xf32> to vector<2x64xbf16>
    %77 = tpu.concatenate %75, %76 in 1 : vector<2x64xbf16>, vector<2x64xbf16> -> vector<2x128xbf16>
    %cst_32 = arith.constant dense<0.000000e+00> : vector<2x256xf32>
    %78 = tpu.matmul %77, %23, %cst_32 {dimension_numbers = #tpu.dot_dimension_numbers<[1], [0], [0], [1], [0, 0, 1, 1], [], []>} : vector<2x128xbf16>, vector<128x256xbf16>, vector<2x256xf32> -> vector<2x256xf32>
    %79 = vector.broadcast %24 : vector<1x256xf32> to vector<2x256xf32>
    %80 = arith.addf %78, %79 : vector<2x256xf32>
    %81 = vector.extract_strided_slice %80 {offsets = [0, 0], sizes = [2, 192], strides = [1, 1]} : vector<2x256xf32> to vector<2x192xf32>
    %cst_33 = arith.constant 5.000000e-01 : f32
    %82 = vector.broadcast %cst_33 : f32 to vector<2x192xf32>
    %83 = arith.mulf %82, %81 : vector<2x192xf32>
    %84 = math.tanh %83 : vector<2x192xf32>
    %cst_34 = arith.constant 5.000000e-01 : f32
    %85 = vector.broadcast %cst_34 : f32 to vector<2x192xf32>
    %86 = arith.mulf %85, %84 : vector<2x192xf32>
    %cst_35 = arith.constant 5.000000e-01 : f32
    %87 = vector.broadcast %cst_35 : f32 to vector<2x192xf32>
    %88 = arith.addf %86, %87 : vector<2x192xf32>
    %89 = vector.extract_strided_slice %88 {offsets = [0, 0], sizes = [2, 64], strides = [1, 1]} : vector<2x192xf32> to vector<2x64xf32>
    %90 = vector.extract_strided_slice %88 {offsets = [0, 64], sizes = [2, 64], strides = [1, 1]} : vector<2x192xf32> to vector<2x64xf32>
    %91 = vector.extract_strided_slice %88 {offsets = [0, 128], sizes = [2, 64], strides = [1, 1]} : vector<2x192xf32> to vector<2x64xf32>
    %92 = vector.extract_strided_slice %80 {offsets = [0, 192], sizes = [2, 64], strides = [1, 1]} : vector<2x256xf32> to vector<2x64xf32>
    %93 = math.tanh %92 : vector<2x64xf32>
    %94 = arith.mulf %90, %30 : vector<2x64xf32>
    %95 = arith.mulf %89, %93 : vector<2x64xf32>
    %96 = arith.addf %94, %95 : vector<2x64xf32>
    %97 = math.tanh %96 : vector<2x64xf32>
    %98 = arith.mulf %91, %97 : vector<2x64xf32>
    %99 = arith.truncf %74 : vector<2x64xf32> to vector<2x64xbf16>
    %cst_36 = arith.constant dense<0.000000e+00> : vector<2x256xf32>
    %100 = tpu.matmul %99, %22, %cst_36 {dimension_numbers = #tpu.dot_dimension_numbers<[1], [0], [0], [1], [0, 0, 1, 1], [], []>} : vector<2x64xbf16>, vector<64x256xbf16>, vector<2x256xf32> -> vector<2x256xf32>
    %101 = arith.addf %16, %100 : vector<2x256xf32>
    %102 = vector.extract_strided_slice %101 {offsets = [0, 0], sizes = [2, 192], strides = [1, 1]} : vector<2x256xf32> to vector<2x192xf32>
    %cst_37 = arith.constant 5.000000e-01 : f32
    %103 = vector.broadcast %cst_37 : f32 to vector<2x192xf32>
    %104 = arith.mulf %103, %102 : vector<2x192xf32>
    %105 = math.tanh %104 : vector<2x192xf32>
    %cst_38 = arith.constant 5.000000e-01 : f32
    %106 = vector.broadcast %cst_38 : f32 to vector<2x192xf32>
    %107 = arith.mulf %106, %105 : vector<2x192xf32>
    %cst_39 = arith.constant 5.000000e-01 : f32
    %108 = vector.broadcast %cst_39 : f32 to vector<2x192xf32>
    %109 = arith.addf %107, %108 : vector<2x192xf32>
    %110 = vector.extract_strided_slice %109 {offsets = [0, 0], sizes = [2, 64], strides = [1, 1]} : vector<2x192xf32> to vector<2x64xf32>
    %111 = vector.extract_strided_slice %109 {offsets = [0, 64], sizes = [2, 64], strides = [1, 1]} : vector<2x192xf32> to vector<2x64xf32>
    %112 = vector.extract_strided_slice %109 {offsets = [0, 128], sizes = [2, 64], strides = [1, 1]} : vector<2x192xf32> to vector<2x64xf32>
    %113 = vector.extract_strided_slice %101 {offsets = [0, 192], sizes = [2, 64], strides = [1, 1]} : vector<2x256xf32> to vector<2x64xf32>
    %114 = math.tanh %113 : vector<2x64xf32>
    %115 = arith.mulf %111, %72 : vector<2x64xf32>
    %116 = arith.mulf %110, %114 : vector<2x64xf32>
    %117 = arith.addf %115, %116 : vector<2x64xf32>
    %118 = math.tanh %117 : vector<2x64xf32>
    %119 = arith.mulf %112, %118 : vector<2x64xf32>
    %120 = arith.truncf %74 : vector<2x64xf32> to vector<2x64xbf16>
    %121 = arith.truncf %98 : vector<2x64xf32> to vector<2x64xbf16>
    %122 = tpu.concatenate %120, %121 in 1 : vector<2x64xbf16>, vector<2x64xbf16> -> vector<2x128xbf16>
    %cst_40 = arith.constant dense<0.000000e+00> : vector<2x256xf32>
    %123 = tpu.matmul %122, %23, %cst_40 {dimension_numbers = #tpu.dot_dimension_numbers<[1], [0], [0], [1], [0, 0, 1, 1], [], []>} : vector<2x128xbf16>, vector<128x256xbf16>, vector<2x256xf32> -> vector<2x256xf32>
    %124 = vector.broadcast %24 : vector<1x256xf32> to vector<2x256xf32>
    %125 = arith.addf %123, %124 : vector<2x256xf32>
    %126 = vector.extract_strided_slice %125 {offsets = [0, 0], sizes = [2, 192], strides = [1, 1]} : vector<2x256xf32> to vector<2x192xf32>
    %cst_41 = arith.constant 5.000000e-01 : f32
    %127 = vector.broadcast %cst_41 : f32 to vector<2x192xf32>
    %128 = arith.mulf %127, %126 : vector<2x192xf32>
    %129 = math.tanh %128 : vector<2x192xf32>
    %cst_42 = arith.constant 5.000000e-01 : f32
    %130 = vector.broadcast %cst_42 : f32 to vector<2x192xf32>
    %131 = arith.mulf %130, %129 : vector<2x192xf32>
    %cst_43 = arith.constant 5.000000e-01 : f32
    %132 = vector.broadcast %cst_43 : f32 to vector<2x192xf32>
    %133 = arith.addf %131, %132 : vector<2x192xf32>
    %134 = vector.extract_strided_slice %133 {offsets = [0, 0], sizes = [2, 64], strides = [1, 1]} : vector<2x192xf32> to vector<2x64xf32>
    %135 = vector.extract_strided_slice %133 {offsets = [0, 64], sizes = [2, 64], strides = [1, 1]} : vector<2x192xf32> to vector<2x64xf32>
    %136 = vector.extract_strided_slice %133 {offsets = [0, 128], sizes = [2, 64], strides = [1, 1]} : vector<2x192xf32> to vector<2x64xf32>
    %137 = vector.extract_strided_slice %125 {offsets = [0, 192], sizes = [2, 64], strides = [1, 1]} : vector<2x256xf32> to vector<2x64xf32>
    %138 = math.tanh %137 : vector<2x64xf32>
    %139 = arith.mulf %135, %96 : vector<2x64xf32>
    %140 = arith.mulf %134, %138 : vector<2x64xf32>
    %141 = arith.addf %139, %140 : vector<2x64xf32>
    %142 = math.tanh %141 : vector<2x64xf32>
    %143 = arith.mulf %136, %142 : vector<2x64xf32>
    %144 = arith.truncf %98 : vector<2x64xf32> to vector<2x64xbf16>
    %145 = arith.truncf %31 : vector<2x64xf32> to vector<2x64xbf16>
    %146 = tpu.concatenate %144, %145 in 1 : vector<2x64xbf16>, vector<2x64xbf16> -> vector<2x128xbf16>
    %cst_44 = arith.constant dense<0.000000e+00> : vector<2x256xf32>
    %147 = tpu.matmul %146, %25, %cst_44 {dimension_numbers = #tpu.dot_dimension_numbers<[1], [0], [0], [1], [0, 0, 1, 1], [], []>} : vector<2x128xbf16>, vector<128x256xbf16>, vector<2x256xf32> -> vector<2x256xf32>
    %148 = vector.broadcast %26 : vector<1x256xf32> to vector<2x256xf32>
    %149 = arith.addf %147, %148 : vector<2x256xf32>
    %150 = vector.extract_strided_slice %149 {offsets = [0, 0], sizes = [2, 192], strides = [1, 1]} : vector<2x256xf32> to vector<2x192xf32>
    %cst_45 = arith.constant 5.000000e-01 : f32
    %151 = vector.broadcast %cst_45 : f32 to vector<2x192xf32>
    %152 = arith.mulf %151, %150 : vector<2x192xf32>
    %153 = math.tanh %152 : vector<2x192xf32>
    %cst_46 = arith.constant 5.000000e-01 : f32
    %154 = vector.broadcast %cst_46 : f32 to vector<2x192xf32>
    %155 = arith.mulf %154, %153 : vector<2x192xf32>
    %cst_47 = arith.constant 5.000000e-01 : f32
    %156 = vector.broadcast %cst_47 : f32 to vector<2x192xf32>
    %157 = arith.addf %155, %156 : vector<2x192xf32>
    %158 = vector.extract_strided_slice %157 {offsets = [0, 0], sizes = [2, 64], strides = [1, 1]} : vector<2x192xf32> to vector<2x64xf32>
    %159 = vector.extract_strided_slice %157 {offsets = [0, 64], sizes = [2, 64], strides = [1, 1]} : vector<2x192xf32> to vector<2x64xf32>
    %160 = vector.extract_strided_slice %157 {offsets = [0, 128], sizes = [2, 64], strides = [1, 1]} : vector<2x192xf32> to vector<2x64xf32>
    %161 = vector.extract_strided_slice %149 {offsets = [0, 192], sizes = [2, 64], strides = [1, 1]} : vector<2x256xf32> to vector<2x64xf32>
    %162 = math.tanh %161 : vector<2x64xf32>
    %163 = arith.mulf %159, %32 : vector<2x64xf32>
    %164 = arith.mulf %158, %162 : vector<2x64xf32>
    %165 = arith.addf %163, %164 : vector<2x64xf32>
    %166 = math.tanh %165 : vector<2x64xf32>
    %167 = arith.mulf %160, %166 : vector<2x64xf32>
    %cst_48 = arith.constant dense<0xFF800000> : vector<2xf32>
    %168 = vector.multi_reduction <maximumf>, %167, %cst_48 [1] : vector<2x64xf32> to vector<2xf32>
    %169 = vector.shape_cast %168 : vector<2xf32> to vector<2x1xf32>
    %170 = vector.broadcast %169 : vector<2x1xf32> to vector<2x64xf32>
    %171 = arith.subf %167, %170 : vector<2x64xf32>
    %172 = math.exp %171 : vector<2x64xf32>
    %cst_49 = arith.constant dense<0.000000e+00> : vector<2xf32>
    %173 = vector.multi_reduction <add>, %172, %cst_49 [1] : vector<2x64xf32> to vector<2xf32>
    %174 = vector.shape_cast %173 : vector<2xf32> to vector<2x1xf32>
    %175 = vector.broadcast %174 : vector<2x1xf32> to vector<2x64xf32>
    %176 = arith.divf %172, %175 : vector<2x64xf32>
    %c0_50 = arith.constant 0 : index
    %c0_51 = arith.constant 0 : index
    %c0_52 = arith.constant 0 : index
    %177 = vector.load %arg9[%c0_50, %c0_51, %c0_52] : memref<8x2x64xf32, #tpu.memory_space<vmem>>, vector<1x2x64xf32>
    %178 = vector.shape_cast %177 : vector<1x2x64xf32> to vector<2x64xf32>
    %179 = vector.shape_cast %176 : vector<2x64xf32> to vector<1x2x64xf32>
    tpu.vector_store %arg9[%c0_50, %c0_51, %c0_52], %179 {strides = array<i32>} : memref<8x2x64xf32, #tpu.memory_space<vmem>>, vector<1x2x64xf32>,
    %180 = arith.truncf %119 : vector<2x64xf32> to vector<2x64xbf16>
    %cst_53 = arith.constant dense<0.000000e+00> : vector<2x256xf32>
    %181 = tpu.matmul %180, %22, %cst_53 {dimension_numbers = #tpu.dot_dimension_numbers<[1], [0], [0], [1], [0, 0, 1, 1], [], []>} : vector<2x64xbf16>, vector<64x256xbf16>, vector<2x256xf32> -> vector<2x256xf32>
    %182 = arith.addf %17, %181 : vector<2x256xf32>
    %183 = vector.extract_strided_slice %182 {offsets = [0, 0], sizes = [2, 192], strides = [1, 1]} : vector<2x256xf32> to vector<2x192xf32>
    %cst_54 = arith.constant 5.000000e-01 : f32
    %184 = vector.broadcast %cst_54 : f32 to vector<2x192xf32>
    %185 = arith.mulf %184, %183 : vector<2x192xf32>
    %186 = math.tanh %185 : vector<2x192xf32>
    %cst_55 = arith.constant 5.000000e-01 : f32
    %187 = vector.broadcast %cst_55 : f32 to vector<2x192xf32>
    %188 = arith.mulf %187, %186 : vector<2x192xf32>
    %cst_56 = arith.constant 5.000000e-01 : f32
    %189 = vector.broadcast %cst_56 : f32 to vector<2x192xf32>
    %190 = arith.addf %188, %189 : vector<2x192xf32>
    %191 = vector.extract_strided_slice %190 {offsets = [0, 0], sizes = [2, 64], strides = [1, 1]} : vector<2x192xf32> to vector<2x64xf32>
    %192 = vector.extract_strided_slice %190 {offsets = [0, 64], sizes = [2, 64], strides = [1, 1]} : vector<2x192xf32> to vector<2x64xf32>
    %193 = vector.extract_strided_slice %190 {offsets = [0, 128], sizes = [2, 64], strides = [1, 1]} : vector<2x192xf32> to vector<2x64xf32>
    %194 = vector.extract_strided_slice %182 {offsets = [0, 192], sizes = [2, 64], strides = [1, 1]} : vector<2x256xf32> to vector<2x64xf32>
    %195 = math.tanh %194 : vector<2x64xf32>
    %196 = arith.mulf %192, %117 : vector<2x64xf32>
    %197 = arith.mulf %191, %195 : vector<2x64xf32>
    %198 = arith.addf %196, %197 : vector<2x64xf32>
    %199 = math.tanh %198 : vector<2x64xf32>
    %200 = arith.mulf %193, %199 : vector<2x64xf32>
    %201 = arith.truncf %119 : vector<2x64xf32> to vector<2x64xbf16>
    %202 = arith.truncf %143 : vector<2x64xf32> to vector<2x64xbf16>
    %203 = tpu.concatenate %201, %202 in 1 : vector<2x64xbf16>, vector<2x64xbf16> -> vector<2x128xbf16>
    %cst_57 = arith.constant dense<0.000000e+00> : vector<2x256xf32>
    %204 = tpu.matmul %203, %23, %cst_57 {dimension_numbers = #tpu.dot_dimension_numbers<[1], [0], [0], [1], [0, 0, 1, 1], [], []>} : vector<2x128xbf16>, vector<128x256xbf16>, vector<2x256xf32> -> vector<2x256xf32>
    %205 = vector.broadcast %24 : vector<1x256xf32> to vector<2x256xf32>
    %206 = arith.addf %204, %205 : vector<2x256xf32>
    %207 = vector.extract_strided_slice %206 {offsets = [0, 0], sizes = [2, 192], strides = [1, 1]} : vector<2x256xf32> to vector<2x192xf32>
    %cst_58 = arith.constant 5.000000e-01 : f32
    %208 = vector.broadcast %cst_58 : f32 to vector<2x192xf32>
    %209 = arith.mulf %208, %207 : vector<2x192xf32>
    %210 = math.tanh %209 : vector<2x192xf32>
    %cst_59 = arith.constant 5.000000e-01 : f32
    %211 = vector.broadcast %cst_59 : f32 to vector<2x192xf32>
    %212 = arith.mulf %211, %210 : vector<2x192xf32>
    %cst_60 = arith.constant 5.000000e-01 : f32
    %213 = vector.broadcast %cst_60 : f32 to vector<2x192xf32>
    %214 = arith.addf %212, %213 : vector<2x192xf32>
    %215 = vector.extract_strided_slice %214 {offsets = [0, 0], sizes = [2, 64], strides = [1, 1]} : vector<2x192xf32> to vector<2x64xf32>
    %216 = vector.extract_strided_slice %214 {offsets = [0, 64], sizes = [2, 64], strides = [1, 1]} : vector<2x192xf32> to vector<2x64xf32>
    %217 = vector.extract_strided_slice %214 {offsets = [0, 128], sizes = [2, 64], strides = [1, 1]} : vector<2x192xf32> to vector<2x64xf32>
    %218 = vector.extract_strided_slice %206 {offsets = [0, 192], sizes = [2, 64], strides = [1, 1]} : vector<2x256xf32> to vector<2x64xf32>
    %219 = math.tanh %218 : vector<2x64xf32>
    %220 = arith.mulf %216, %141 : vector<2x64xf32>
    %221 = arith.mulf %215, %219 : vector<2x64xf32>
    %222 = arith.addf %220, %221 : vector<2x64xf32>
    %223 = math.tanh %222 : vector<2x64xf32>
    %224 = arith.mulf %217, %223 : vector<2x64xf32>
    %225 = arith.truncf %143 : vector<2x64xf32> to vector<2x64xbf16>
    %226 = arith.truncf %167 : vector<2x64xf32> to vector<2x64xbf16>
    %227 = tpu.concatenate %225, %226 in 1 : vector<2x64xbf16>, vector<2x64xbf16> -> vector<2x128xbf16>
    %cst_61 = arith.constant dense<0.000000e+00> : vector<2x256xf32>
    %228 = tpu.matmul %227, %25, %cst_61 {dimension_numbers = #tpu.dot_dimension_numbers<[1], [0], [0], [1], [0, 0, 1, 1], [], []>} : vector<2x128xbf16>, vector<128x256xbf16>, vector<2x256xf32> -> vector<2x256xf32>
    %229 = vector.broadcast %26 : vector<1x256xf32> to vector<2x256xf32>
    %230 = arith.addf %228, %229 : vector<2x256xf32>
    %231 = vector.extract_strided_slice %230 {offsets = [0, 0], sizes = [2, 192], strides = [1, 1]} : vector<2x256xf32> to vector<2x192xf32>
    %cst_62 = arith.constant 5.000000e-01 : f32
    %232 = vector.broadcast %cst_62 : f32 to vector<2x192xf32>
    %233 = arith.mulf %232, %231 : vector<2x192xf32>
    %234 = math.tanh %233 : vector<2x192xf32>
    %cst_63 = arith.constant 5.000000e-01 : f32
    %235 = vector.broadcast %cst_63 : f32 to vector<2x192xf32>
    %236 = arith.mulf %235, %234 : vector<2x192xf32>
    %cst_64 = arith.constant 5.000000e-01 : f32
    %237 = vector.broadcast %cst_64 : f32 to vector<2x192xf32>
    %238 = arith.addf %236, %237 : vector<2x192xf32>
    %239 = vector.extract_strided_slice %238 {offsets = [0, 0], sizes = [2, 64], strides = [1, 1]} : vector<2x192xf32> to vector<2x64xf32>
    %240 = vector.extract_strided_slice %238 {offsets = [0, 64], sizes = [2, 64], strides = [1, 1]} : vector<2x192xf32> to vector<2x64xf32>
    %241 = vector.extract_strided_slice %238 {offsets = [0, 128], sizes = [2, 64], strides = [1, 1]} : vector<2x192xf32> to vector<2x64xf32>
    %242 = vector.extract_strided_slice %230 {offsets = [0, 192], sizes = [2, 64], strides = [1, 1]} : vector<2x256xf32> to vector<2x64xf32>
    %243 = math.tanh %242 : vector<2x64xf32>
    %244 = arith.mulf %240, %165 : vector<2x64xf32>
    %245 = arith.mulf %239, %243 : vector<2x64xf32>
    %246 = arith.addf %244, %245 : vector<2x64xf32>
    %247 = math.tanh %246 : vector<2x64xf32>
    %248 = arith.mulf %241, %247 : vector<2x64xf32>
    %cst_65 = arith.constant dense<0xFF800000> : vector<2xf32>
    %249 = vector.multi_reduction <maximumf>, %248, %cst_65 [1] : vector<2x64xf32> to vector<2xf32>
    %250 = vector.shape_cast %249 : vector<2xf32> to vector<2x1xf32>
    %251 = vector.broadcast %250 : vector<2x1xf32> to vector<2x64xf32>
    %252 = arith.subf %248, %251 : vector<2x64xf32>
    %253 = math.exp %252 : vector<2x64xf32>
    %cst_66 = arith.constant dense<0.000000e+00> : vector<2xf32>
    %254 = vector.multi_reduction <add>, %253, %cst_66 [1] : vector<2x64xf32> to vector<2xf32>
    %255 = vector.shape_cast %254 : vector<2xf32> to vector<2x1xf32>
    %256 = vector.broadcast %255 : vector<2x1xf32> to vector<2x64xf32>
    %257 = arith.divf %253, %256 : vector<2x64xf32>
    %c1 = arith.constant 1 : index
    %c0_67 = arith.constant 0 : index
    %c0_68 = arith.constant 0 : index
    %258 = vector.load %arg9[%c1, %c0_67, %c0_68] : memref<8x2x64xf32, #tpu.memory_space<vmem>>, vector<1x2x64xf32>
    %259 = vector.shape_cast %258 : vector<1x2x64xf32> to vector<2x64xf32>
    %260 = vector.shape_cast %257 : vector<2x64xf32> to vector<1x2x64xf32>
    tpu.vector_store %arg9[%c1, %c0_67, %c0_68], %260 {strides = array<i32>} : memref<8x2x64xf32, #tpu.memory_space<vmem>>, vector<1x2x64xf32>,
    %261 = arith.truncf %200 : vector<2x64xf32> to vector<2x64xbf16>
    %cst_69 = arith.constant dense<0.000000e+00> : vector<2x256xf32>
    %262 = tpu.matmul %261, %22, %cst_69 {dimension_numbers = #tpu.dot_dimension_numbers<[1], [0], [0], [1], [0, 0, 1, 1], [], []>} : vector<2x64xbf16>, vector<64x256xbf16>, vector<2x256xf32> -> vector<2x256xf32>
    %263 = arith.addf %18, %262 : vector<2x256xf32>
    %264 = vector.extract_strided_slice %263 {offsets = [0, 0], sizes = [2, 192], strides = [1, 1]} : vector<2x256xf32> to vector<2x192xf32>
    %cst_70 = arith.constant 5.000000e-01 : f32
    %265 = vector.broadcast %cst_70 : f32 to vector<2x192xf32>
    %266 = arith.mulf %265, %264 : vector<2x192xf32>
    %267 = math.tanh %266 : vector<2x192xf32>
    %cst_71 = arith.constant 5.000000e-01 : f32
    %268 = vector.broadcast %cst_71 : f32 to vector<2x192xf32>
    %269 = arith.mulf %268, %267 : vector<2x192xf32>
    %cst_72 = arith.constant 5.000000e-01 : f32
    %270 = vector.broadcast %cst_72 : f32 to vector<2x192xf32>
    %271 = arith.addf %269, %270 : vector<2x192xf32>
    %272 = vector.extract_strided_slice %271 {offsets = [0, 0], sizes = [2, 64], strides = [1, 1]} : vector<2x192xf32> to vector<2x64xf32>
    %273 = vector.extract_strided_slice %271 {offsets = [0, 64], sizes = [2, 64], strides = [1, 1]} : vector<2x192xf32> to vector<2x64xf32>
    %274 = vector.extract_strided_slice %271 {offsets = [0, 128], sizes = [2, 64], strides = [1, 1]} : vector<2x192xf32> to vector<2x64xf32>
    %275 = vector.extract_strided_slice %263 {offsets = [0, 192], sizes = [2, 64], strides = [1, 1]} : vector<2x256xf32> to vector<2x64xf32>
    %276 = math.tanh %275 : vector<2x64xf32>
    %277 = arith.mulf %273, %198 : vector<2x64xf32>
    %278 = arith.mulf %272, %276 : vector<2x64xf32>
    %279 = arith.addf %277, %278 : vector<2x64xf32>
    %280 = math.tanh %279 : vector<2x64xf32>
    %281 = arith.mulf %274, %280 : vector<2x64xf32>
    %282 = arith.truncf %200 : vector<2x64xf32> to vector<2x64xbf16>
    %283 = arith.truncf %224 : vector<2x64xf32> to vector<2x64xbf16>
    %284 = tpu.concatenate %282, %283 in 1 : vector<2x64xbf16>, vector<2x64xbf16> -> vector<2x128xbf16>
    %cst_73 = arith.constant dense<0.000000e+00> : vector<2x256xf32>
    %285 = tpu.matmul %284, %23, %cst_73 {dimension_numbers = #tpu.dot_dimension_numbers<[1], [0], [0], [1], [0, 0, 1, 1], [], []>} : vector<2x128xbf16>, vector<128x256xbf16>, vector<2x256xf32> -> vector<2x256xf32>
    %286 = vector.broadcast %24 : vector<1x256xf32> to vector<2x256xf32>
    %287 = arith.addf %285, %286 : vector<2x256xf32>
    %288 = vector.extract_strided_slice %287 {offsets = [0, 0], sizes = [2, 192], strides = [1, 1]} : vector<2x256xf32> to vector<2x192xf32>
    %cst_74 = arith.constant 5.000000e-01 : f32
    %289 = vector.broadcast %cst_74 : f32 to vector<2x192xf32>
    %290 = arith.mulf %289, %288 : vector<2x192xf32>
    %291 = math.tanh %290 : vector<2x192xf32>
    %cst_75 = arith.constant 5.000000e-01 : f32
    %292 = vector.broadcast %cst_75 : f32 to vector<2x192xf32>
    %293 = arith.mulf %292, %291 : vector<2x192xf32>
    %cst_76 = arith.constant 5.000000e-01 : f32
    %294 = vector.broadcast %cst_76 : f32 to vector<2x192xf32>
    %295 = arith.addf %293, %294 : vector<2x192xf32>
    %296 = vector.extract_strided_slice %295 {offsets = [0, 0], sizes = [2, 64], strides = [1, 1]} : vector<2x192xf32> to vector<2x64xf32>
    %297 = vector.extract_strided_slice %295 {offsets = [0, 64], sizes = [2, 64], strides = [1, 1]} : vector<2x192xf32> to vector<2x64xf32>
    %298 = vector.extract_strided_slice %295 {offsets = [0, 128], sizes = [2, 64], strides = [1, 1]} : vector<2x192xf32> to vector<2x64xf32>
    %299 = vector.extract_strided_slice %287 {offsets = [0, 192], sizes = [2, 64], strides = [1, 1]} : vector<2x256xf32> to vector<2x64xf32>
    %300 = math.tanh %299 : vector<2x64xf32>
    %301 = arith.mulf %297, %222 : vector<2x64xf32>
    %302 = arith.mulf %296, %300 : vector<2x64xf32>
    %303 = arith.addf %301, %302 : vector<2x64xf32>
    %304 = math.tanh %303 : vector<2x64xf32>
    %305 = arith.mulf %298, %304 : vector<2x64xf32>
    %306 = arith.truncf %224 : vector<2x64xf32> to vector<2x64xbf16>
    %307 = arith.truncf %248 : vector<2x64xf32> to vector<2x64xbf16>
    %308 = tpu.concatenate %306, %307 in 1 : vector<2x64xbf16>, vector<2x64xbf16> -> vector<2x128xbf16>
    %cst_77 = arith.constant dense<0.000000e+00> : vector<2x256xf32>
    %309 = tpu.matmul %308, %25, %cst_77 {dimension_numbers = #tpu.dot_dimension_numbers<[1], [0], [0], [1], [0, 0, 1, 1], [], []>} : vector<2x128xbf16>, vector<128x256xbf16>, vector<2x256xf32> -> vector<2x256xf32>
    %310 = vector.broadcast %26 : vector<1x256xf32> to vector<2x256xf32>
    %311 = arith.addf %309, %310 : vector<2x256xf32>
    %312 = vector.extract_strided_slice %311 {offsets = [0, 0], sizes = [2, 192], strides = [1, 1]} : vector<2x256xf32> to vector<2x192xf32>
    %cst_78 = arith.constant 5.000000e-01 : f32
    %313 = vector.broadcast %cst_78 : f32 to vector<2x192xf32>
    %314 = arith.mulf %313, %312 : vector<2x192xf32>
    %315 = math.tanh %314 : vector<2x192xf32>
    %cst_79 = arith.constant 5.000000e-01 : f32
    %316 = vector.broadcast %cst_79 : f32 to vector<2x192xf32>
    %317 = arith.mulf %316, %315 : vector<2x192xf32>
    %cst_80 = arith.constant 5.000000e-01 : f32
    %318 = vector.broadcast %cst_80 : f32 to vector<2x192xf32>
    %319 = arith.addf %317, %318 : vector<2x192xf32>
    %320 = vector.extract_strided_slice %319 {offsets = [0, 0], sizes = [2, 64], strides = [1, 1]} : vector<2x192xf32> to vector<2x64xf32>
    %321 = vector.extract_strided_slice %319 {offsets = [0, 64], sizes = [2, 64], strides = [1, 1]} : vector<2x192xf32> to vector<2x64xf32>
    %322 = vector.extract_strided_slice %319 {offsets = [0, 128], sizes = [2, 64], strides = [1, 1]} : vector<2x192xf32> to vector<2x64xf32>
    %323 = vector.extract_strided_slice %311 {offsets = [0, 192], sizes = [2, 64], strides = [1, 1]} : vector<2x256xf32> to vector<2x64xf32>
    %324 = math.tanh %323 : vector<2x64xf32>
    %325 = arith.mulf %321, %246 : vector<2x64xf32>
    %326 = arith.mulf %320, %324 : vector<2x64xf32>
    %327 = arith.addf %325, %326 : vector<2x64xf32>
    %328 = math.tanh %327 : vector<2x64xf32>
    %329 = arith.mulf %322, %328 : vector<2x64xf32>
    %cst_81 = arith.constant dense<0xFF800000> : vector<2xf32>
    %330 = vector.multi_reduction <maximumf>, %329, %cst_81 [1] : vector<2x64xf32> to vector<2xf32>
    %331 = vector.shape_cast %330 : vector<2xf32> to vector<2x1xf32>
    %332 = vector.broadcast %331 : vector<2x1xf32> to vector<2x64xf32>
    %333 = arith.subf %329, %332 : vector<2x64xf32>
    %334 = math.exp %333 : vector<2x64xf32>
    %cst_82 = arith.constant dense<0.000000e+00> : vector<2xf32>
    %335 = vector.multi_reduction <add>, %334, %cst_82 [1] : vector<2x64xf32> to vector<2xf32>
    %336 = vector.shape_cast %335 : vector<2xf32> to vector<2x1xf32>
    %337 = vector.broadcast %336 : vector<2x1xf32> to vector<2x64xf32>
    %338 = arith.divf %334, %337 : vector<2x64xf32>
    %c2 = arith.constant 2 : index
    %c0_83 = arith.constant 0 : index
    %c0_84 = arith.constant 0 : index
    %339 = vector.load %arg9[%c2, %c0_83, %c0_84] : memref<8x2x64xf32, #tpu.memory_space<vmem>>, vector<1x2x64xf32>
    %340 = vector.shape_cast %339 : vector<1x2x64xf32> to vector<2x64xf32>
    %341 = vector.shape_cast %338 : vector<2x64xf32> to vector<1x2x64xf32>
    tpu.vector_store %arg9[%c2, %c0_83, %c0_84], %341 {strides = array<i32>} : memref<8x2x64xf32, #tpu.memory_space<vmem>>, vector<1x2x64xf32>,
    %342 = arith.truncf %281 : vector<2x64xf32> to vector<2x64xbf16>
    %cst_85 = arith.constant dense<0.000000e+00> : vector<2x256xf32>
    %343 = tpu.matmul %342, %22, %cst_85 {dimension_numbers = #tpu.dot_dimension_numbers<[1], [0], [0], [1], [0, 0, 1, 1], [], []>} : vector<2x64xbf16>, vector<64x256xbf16>, vector<2x256xf32> -> vector<2x256xf32>
    %344 = arith.addf %19, %343 : vector<2x256xf32>
    %345 = vector.extract_strided_slice %344 {offsets = [0, 0], sizes = [2, 192], strides = [1, 1]} : vector<2x256xf32> to vector<2x192xf32>
    %cst_86 = arith.constant 5.000000e-01 : f32
    %346 = vector.broadcast %cst_86 : f32 to vector<2x192xf32>
    %347 = arith.mulf %346, %345 : vector<2x192xf32>
    %348 = math.tanh %347 : vector<2x192xf32>
    %cst_87 = arith.constant 5.000000e-01 : f32
    %349 = vector.broadcast %cst_87 : f32 to vector<2x192xf32>
    %350 = arith.mulf %349, %348 : vector<2x192xf32>
    %cst_88 = arith.constant 5.000000e-01 : f32
    %351 = vector.broadcast %cst_88 : f32 to vector<2x192xf32>
    %352 = arith.addf %350, %351 : vector<2x192xf32>
    %353 = vector.extract_strided_slice %352 {offsets = [0, 0], sizes = [2, 64], strides = [1, 1]} : vector<2x192xf32> to vector<2x64xf32>
    %354 = vector.extract_strided_slice %352 {offsets = [0, 64], sizes = [2, 64], strides = [1, 1]} : vector<2x192xf32> to vector<2x64xf32>
    %355 = vector.extract_strided_slice %352 {offsets = [0, 128], sizes = [2, 64], strides = [1, 1]} : vector<2x192xf32> to vector<2x64xf32>
    %356 = vector.extract_strided_slice %344 {offsets = [0, 192], sizes = [2, 64], strides = [1, 1]} : vector<2x256xf32> to vector<2x64xf32>
    %357 = math.tanh %356 : vector<2x64xf32>
    %358 = arith.mulf %354, %279 : vector<2x64xf32>
    %359 = arith.mulf %353, %357 : vector<2x64xf32>
    %360 = arith.addf %358, %359 : vector<2x64xf32>
    %361 = math.tanh %360 : vector<2x64xf32>
    %362 = arith.mulf %355, %361 : vector<2x64xf32>
    %363 = arith.truncf %281 : vector<2x64xf32> to vector<2x64xbf16>
    %364 = arith.truncf %305 : vector<2x64xf32> to vector<2x64xbf16>
    %365 = tpu.concatenate %363, %364 in 1 : vector<2x64xbf16>, vector<2x64xbf16> -> vector<2x128xbf16>
    %cst_89 = arith.constant dense<0.000000e+00> : vector<2x256xf32>
    %366 = tpu.matmul %365, %23, %cst_89 {dimension_numbers = #tpu.dot_dimension_numbers<[1], [0], [0], [1], [0, 0, 1, 1], [], []>} : vector<2x128xbf16>, vector<128x256xbf16>, vector<2x256xf32> -> vector<2x256xf32>
    %367 = vector.broadcast %24 : vector<1x256xf32> to vector<2x256xf32>
    %368 = arith.addf %366, %367 : vector<2x256xf32>
    %369 = vector.extract_strided_slice %368 {offsets = [0, 0], sizes = [2, 192], strides = [1, 1]} : vector<2x256xf32> to vector<2x192xf32>
    %cst_90 = arith.constant 5.000000e-01 : f32
    %370 = vector.broadcast %cst_90 : f32 to vector<2x192xf32>
    %371 = arith.mulf %370, %369 : vector<2x192xf32>
    %372 = math.tanh %371 : vector<2x192xf32>
    %cst_91 = arith.constant 5.000000e-01 : f32
    %373 = vector.broadcast %cst_91 : f32 to vector<2x192xf32>
    %374 = arith.mulf %373, %372 : vector<2x192xf32>
    %cst_92 = arith.constant 5.000000e-01 : f32
    %375 = vector.broadcast %cst_92 : f32 to vector<2x192xf32>
    %376 = arith.addf %374, %375 : vector<2x192xf32>
    %377 = vector.extract_strided_slice %376 {offsets = [0, 0], sizes = [2, 64], strides = [1, 1]} : vector<2x192xf32> to vector<2x64xf32>
    %378 = vector.extract_strided_slice %376 {offsets = [0, 64], sizes = [2, 64], strides = [1, 1]} : vector<2x192xf32> to vector<2x64xf32>
    %379 = vector.extract_strided_slice %376 {offsets = [0, 128], sizes = [2, 64], strides = [1, 1]} : vector<2x192xf32> to vector<2x64xf32>
    %380 = vector.extract_strided_slice %368 {offsets = [0, 192], sizes = [2, 64], strides = [1, 1]} : vector<2x256xf32> to vector<2x64xf32>
    %381 = math.tanh %380 : vector<2x64xf32>
    %382 = arith.mulf %378, %303 : vector<2x64xf32>
    %383 = arith.mulf %377, %381 : vector<2x64xf32>
    %384 = arith.addf %382, %383 : vector<2x64xf32>
    %385 = math.tanh %384 : vector<2x64xf32>
    %386 = arith.mulf %379, %385 : vector<2x64xf32>
    %387 = arith.truncf %305 : vector<2x64xf32> to vector<2x64xbf16>
    %388 = arith.truncf %329 : vector<2x64xf32> to vector<2x64xbf16>
    %389 = tpu.concatenate %387, %388 in 1 : vector<2x64xbf16>, vector<2x64xbf16> -> vector<2x128xbf16>
    %cst_93 = arith.constant dense<0.000000e+00> : vector<2x256xf32>
    %390 = tpu.matmul %389, %25, %cst_93 {dimension_numbers = #tpu.dot_dimension_numbers<[1], [0], [0], [1], [0, 0, 1, 1], [], []>} : vector<2x128xbf16>, vector<128x256xbf16>, vector<2x256xf32> -> vector<2x256xf32>
    %391 = vector.broadcast %26 : vector<1x256xf32> to vector<2x256xf32>
    %392 = arith.addf %390, %391 : vector<2x256xf32>
    %393 = vector.extract_strided_slice %392 {offsets = [0, 0], sizes = [2, 192], strides = [1, 1]} : vector<2x256xf32> to vector<2x192xf32>
    %cst_94 = arith.constant 5.000000e-01 : f32
    %394 = vector.broadcast %cst_94 : f32 to vector<2x192xf32>
    %395 = arith.mulf %394, %393 : vector<2x192xf32>
    %396 = math.tanh %395 : vector<2x192xf32>
    %cst_95 = arith.constant 5.000000e-01 : f32
    %397 = vector.broadcast %cst_95 : f32 to vector<2x192xf32>
    %398 = arith.mulf %397, %396 : vector<2x192xf32>
    %cst_96 = arith.constant 5.000000e-01 : f32
    %399 = vector.broadcast %cst_96 : f32 to vector<2x192xf32>
    %400 = arith.addf %398, %399 : vector<2x192xf32>
    %401 = vector.extract_strided_slice %400 {offsets = [0, 0], sizes = [2, 64], strides = [1, 1]} : vector<2x192xf32> to vector<2x64xf32>
    %402 = vector.extract_strided_slice %400 {offsets = [0, 64], sizes = [2, 64], strides = [1, 1]} : vector<2x192xf32> to vector<2x64xf32>
    %403 = vector.extract_strided_slice %400 {offsets = [0, 128], sizes = [2, 64], strides = [1, 1]} : vector<2x192xf32> to vector<2x64xf32>
    %404 = vector.extract_strided_slice %392 {offsets = [0, 192], sizes = [2, 64], strides = [1, 1]} : vector<2x256xf32> to vector<2x64xf32>
    %405 = math.tanh %404 : vector<2x64xf32>
    %406 = arith.mulf %402, %327 : vector<2x64xf32>
    %407 = arith.mulf %401, %405 : vector<2x64xf32>
    %408 = arith.addf %406, %407 : vector<2x64xf32>
    %409 = math.tanh %408 : vector<2x64xf32>
    %410 = arith.mulf %403, %409 : vector<2x64xf32>
    %cst_97 = arith.constant dense<0xFF800000> : vector<2xf32>
    %411 = vector.multi_reduction <maximumf>, %410, %cst_97 [1] : vector<2x64xf32> to vector<2xf32>
    %412 = vector.shape_cast %411 : vector<2xf32> to vector<2x1xf32>
    %413 = vector.broadcast %412 : vector<2x1xf32> to vector<2x64xf32>
    %414 = arith.subf %410, %413 : vector<2x64xf32>
    %415 = math.exp %414 : vector<2x64xf32>
    %cst_98 = arith.constant dense<0.000000e+00> : vector<2xf32>
    %416 = vector.multi_reduction <add>, %415, %cst_98 [1] : vector<2x64xf32> to vector<2xf32>
    %417 = vector.shape_cast %416 : vector<2xf32> to vector<2x1xf32>
    %418 = vector.broadcast %417 : vector<2x1xf32> to vector<2x64xf32>
    %419 = arith.divf %415, %418 : vector<2x64xf32>
    %c3 = arith.constant 3 : index
    %c0_99 = arith.constant 0 : index
    %c0_100 = arith.constant 0 : index
    %420 = vector.load %arg9[%c3, %c0_99, %c0_100] : memref<8x2x64xf32, #tpu.memory_space<vmem>>, vector<1x2x64xf32>
    %421 = vector.shape_cast %420 : vector<1x2x64xf32> to vector<2x64xf32>
    %422 = vector.shape_cast %419 : vector<2x64xf32> to vector<1x2x64xf32>
    tpu.vector_store %arg9[%c3, %c0_99, %c0_100], %422 {strides = array<i32>} : memref<8x2x64xf32, #tpu.memory_space<vmem>>, vector<1x2x64xf32>,
    %423 = arith.truncf %362 : vector<2x64xf32> to vector<2x64xbf16>
    %cst_101 = arith.constant dense<0.000000e+00> : vector<2x256xf32>
    %424 = tpu.matmul %423, %22, %cst_101 {dimension_numbers = #tpu.dot_dimension_numbers<[1], [0], [0], [1], [0, 0, 1, 1], [], []>} : vector<2x64xbf16>, vector<64x256xbf16>, vector<2x256xf32> -> vector<2x256xf32>
    %425 = arith.addf %20, %424 : vector<2x256xf32>
    %426 = vector.extract_strided_slice %425 {offsets = [0, 0], sizes = [2, 192], strides = [1, 1]} : vector<2x256xf32> to vector<2x192xf32>
    %cst_102 = arith.constant 5.000000e-01 : f32
    %427 = vector.broadcast %cst_102 : f32 to vector<2x192xf32>
    %428 = arith.mulf %427, %426 : vector<2x192xf32>
    %429 = math.tanh %428 : vector<2x192xf32>
    %cst_103 = arith.constant 5.000000e-01 : f32
    %430 = vector.broadcast %cst_103 : f32 to vector<2x192xf32>
    %431 = arith.mulf %430, %429 : vector<2x192xf32>
    %cst_104 = arith.constant 5.000000e-01 : f32
    %432 = vector.broadcast %cst_104 : f32 to vector<2x192xf32>
    %433 = arith.addf %431, %432 : vector<2x192xf32>
    %434 = vector.extract_strided_slice %433 {offsets = [0, 0], sizes = [2, 64], strides = [1, 1]} : vector<2x192xf32> to vector<2x64xf32>
    %435 = vector.extract_strided_slice %433 {offsets = [0, 64], sizes = [2, 64], strides = [1, 1]} : vector<2x192xf32> to vector<2x64xf32>
    %436 = vector.extract_strided_slice %433 {offsets = [0, 128], sizes = [2, 64], strides = [1, 1]} : vector<2x192xf32> to vector<2x64xf32>
    %437 = vector.extract_strided_slice %425 {offsets = [0, 192], sizes = [2, 64], strides = [1, 1]} : vector<2x256xf32> to vector<2x64xf32>
    %438 = math.tanh %437 : vector<2x64xf32>
    %439 = arith.mulf %435, %360 : vector<2x64xf32>
    %440 = arith.mulf %434, %438 : vector<2x64xf32>
    %441 = arith.addf %439, %440 : vector<2x64xf32>
    %442 = math.tanh %441 : vector<2x64xf32>
    %443 = arith.mulf %436, %442 : vector<2x64xf32>
    %444 = arith.truncf %362 : vector<2x64xf32> to vector<2x64xbf16>
    %445 = arith.truncf %386 : vector<2x64xf32> to vector<2x64xbf16>
    %446 = tpu.concatenate %444, %445 in 1 : vector<2x64xbf16>, vector<2x64xbf16> -> vector<2x128xbf16>
    %cst_105 = arith.constant dense<0.000000e+00> : vector<2x256xf32>
    %447 = tpu.matmul %446, %23, %cst_105 {dimension_numbers = #tpu.dot_dimension_numbers<[1], [0], [0], [1], [0, 0, 1, 1], [], []>} : vector<2x128xbf16>, vector<128x256xbf16>, vector<2x256xf32> -> vector<2x256xf32>
    %448 = vector.broadcast %24 : vector<1x256xf32> to vector<2x256xf32>
    %449 = arith.addf %447, %448 : vector<2x256xf32>
    %450 = vector.extract_strided_slice %449 {offsets = [0, 0], sizes = [2, 192], strides = [1, 1]} : vector<2x256xf32> to vector<2x192xf32>
    %cst_106 = arith.constant 5.000000e-01 : f32
    %451 = vector.broadcast %cst_106 : f32 to vector<2x192xf32>
    %452 = arith.mulf %451, %450 : vector<2x192xf32>
    %453 = math.tanh %452 : vector<2x192xf32>
    %cst_107 = arith.constant 5.000000e-01 : f32
    %454 = vector.broadcast %cst_107 : f32 to vector<2x192xf32>
    %455 = arith.mulf %454, %453 : vector<2x192xf32>
    %cst_108 = arith.constant 5.000000e-01 : f32
    %456 = vector.broadcast %cst_108 : f32 to vector<2x192xf32>
    %457 = arith.addf %455, %456 : vector<2x192xf32>
    %458 = vector.extract_strided_slice %457 {offsets = [0, 0], sizes = [2, 64], strides = [1, 1]} : vector<2x192xf32> to vector<2x64xf32>
    %459 = vector.extract_strided_slice %457 {offsets = [0, 64], sizes = [2, 64], strides = [1, 1]} : vector<2x192xf32> to vector<2x64xf32>
    %460 = vector.extract_strided_slice %457 {offsets = [0, 128], sizes = [2, 64], strides = [1, 1]} : vector<2x192xf32> to vector<2x64xf32>
    %461 = vector.extract_strided_slice %449 {offsets = [0, 192], sizes = [2, 64], strides = [1, 1]} : vector<2x256xf32> to vector<2x64xf32>
    %462 = math.tanh %461 : vector<2x64xf32>
    %463 = arith.mulf %459, %384 : vector<2x64xf32>
    %464 = arith.mulf %458, %462 : vector<2x64xf32>
    %465 = arith.addf %463, %464 : vector<2x64xf32>
    %466 = math.tanh %465 : vector<2x64xf32>
    %467 = arith.mulf %460, %466 : vector<2x64xf32>
    %468 = arith.truncf %386 : vector<2x64xf32> to vector<2x64xbf16>
    %469 = arith.truncf %410 : vector<2x64xf32> to vector<2x64xbf16>
    %470 = tpu.concatenate %468, %469 in 1 : vector<2x64xbf16>, vector<2x64xbf16> -> vector<2x128xbf16>
    %cst_109 = arith.constant dense<0.000000e+00> : vector<2x256xf32>
    %471 = tpu.matmul %470, %25, %cst_109 {dimension_numbers = #tpu.dot_dimension_numbers<[1], [0], [0], [1], [0, 0, 1, 1], [], []>} : vector<2x128xbf16>, vector<128x256xbf16>, vector<2x256xf32> -> vector<2x256xf32>
    %472 = vector.broadcast %26 : vector<1x256xf32> to vector<2x256xf32>
    %473 = arith.addf %471, %472 : vector<2x256xf32>
    %474 = vector.extract_strided_slice %473 {offsets = [0, 0], sizes = [2, 192], strides = [1, 1]} : vector<2x256xf32> to vector<2x192xf32>
    %cst_110 = arith.constant 5.000000e-01 : f32
    %475 = vector.broadcast %cst_110 : f32 to vector<2x192xf32>
    %476 = arith.mulf %475, %474 : vector<2x192xf32>
    %477 = math.tanh %476 : vector<2x192xf32>
    %cst_111 = arith.constant 5.000000e-01 : f32
    %478 = vector.broadcast %cst_111 : f32 to vector<2x192xf32>
    %479 = arith.mulf %478, %477 : vector<2x192xf32>
    %cst_112 = arith.constant 5.000000e-01 : f32
    %480 = vector.broadcast %cst_112 : f32 to vector<2x192xf32>
    %481 = arith.addf %479, %480 : vector<2x192xf32>
    %482 = vector.extract_strided_slice %481 {offsets = [0, 0], sizes = [2, 64], strides = [1, 1]} : vector<2x192xf32> to vector<2x64xf32>
    %483 = vector.extract_strided_slice %481 {offsets = [0, 64], sizes = [2, 64], strides = [1, 1]} : vector<2x192xf32> to vector<2x64xf32>
    %484 = vector.extract_strided_slice %481 {offsets = [0, 128], sizes = [2, 64], strides = [1, 1]} : vector<2x192xf32> to vector<2x64xf32>
    %485 = vector.extract_strided_slice %473 {offsets = [0, 192], sizes = [2, 64], strides = [1, 1]} : vector<2x256xf32> to vector<2x64xf32>
    %486 = math.tanh %485 : vector<2x64xf32>
    %487 = arith.mulf %483, %408 : vector<2x64xf32>
    %488 = arith.mulf %482, %486 : vector<2x64xf32>
    %489 = arith.addf %487, %488 : vector<2x64xf32>
    %490 = math.tanh %489 : vector<2x64xf32>
    %491 = arith.mulf %484, %490 : vector<2x64xf32>
    %cst_113 = arith.constant dense<0xFF800000> : vector<2xf32>
    %492 = vector.multi_reduction <maximumf>, %491, %cst_113 [1] : vector<2x64xf32> to vector<2xf32>
    %493 = vector.shape_cast %492 : vector<2xf32> to vector<2x1xf32>
    %494 = vector.broadcast %493 : vector<2x1xf32> to vector<2x64xf32>
    %495 = arith.subf %491, %494 : vector<2x64xf32>
    %496 = math.exp %495 : vector<2x64xf32>
    %cst_114 = arith.constant dense<0.000000e+00> : vector<2xf32>
    %497 = vector.multi_reduction <add>, %496, %cst_114 [1] : vector<2x64xf32> to vector<2xf32>
    %498 = vector.shape_cast %497 : vector<2xf32> to vector<2x1xf32>
    %499 = vector.broadcast %498 : vector<2x1xf32> to vector<2x64xf32>
    %500 = arith.divf %496, %499 : vector<2x64xf32>
    %c4 = arith.constant 4 : index
    %c0_115 = arith.constant 0 : index
    %c0_116 = arith.constant 0 : index
    %501 = vector.load %arg9[%c4, %c0_115, %c0_116] : memref<8x2x64xf32, #tpu.memory_space<vmem>>, vector<1x2x64xf32>
    %502 = vector.shape_cast %501 : vector<1x2x64xf32> to vector<2x64xf32>
    %503 = vector.shape_cast %500 : vector<2x64xf32> to vector<1x2x64xf32>
    tpu.vector_store %arg9[%c4, %c0_115, %c0_116], %503 {strides = array<i32>} : memref<8x2x64xf32, #tpu.memory_space<vmem>>, vector<1x2x64xf32>,
    %504 = arith.truncf %443 : vector<2x64xf32> to vector<2x64xbf16>
    %cst_117 = arith.constant dense<0.000000e+00> : vector<2x256xf32>
    %505 = tpu.matmul %504, %22, %cst_117 {dimension_numbers = #tpu.dot_dimension_numbers<[1], [0], [0], [1], [0, 0, 1, 1], [], []>} : vector<2x64xbf16>, vector<64x256xbf16>, vector<2x256xf32> -> vector<2x256xf32>
    %506 = arith.addf %21, %505 : vector<2x256xf32>
    %507 = vector.extract_strided_slice %506 {offsets = [0, 0], sizes = [2, 192], strides = [1, 1]} : vector<2x256xf32> to vector<2x192xf32>
    %cst_118 = arith.constant 5.000000e-01 : f32
    %508 = vector.broadcast %cst_118 : f32 to vector<2x192xf32>
    %509 = arith.mulf %508, %507 : vector<2x192xf32>
    %510 = math.tanh %509 : vector<2x192xf32>
    %cst_119 = arith.constant 5.000000e-01 : f32
    %511 = vector.broadcast %cst_119 : f32 to vector<2x192xf32>
    %512 = arith.mulf %511, %510 : vector<2x192xf32>
    %cst_120 = arith.constant 5.000000e-01 : f32
    %513 = vector.broadcast %cst_120 : f32 to vector<2x192xf32>
    %514 = arith.addf %512, %513 : vector<2x192xf32>
    %515 = vector.extract_strided_slice %514 {offsets = [0, 0], sizes = [2, 64], strides = [1, 1]} : vector<2x192xf32> to vector<2x64xf32>
    %516 = vector.extract_strided_slice %514 {offsets = [0, 64], sizes = [2, 64], strides = [1, 1]} : vector<2x192xf32> to vector<2x64xf32>
    %517 = vector.extract_strided_slice %514 {offsets = [0, 128], sizes = [2, 64], strides = [1, 1]} : vector<2x192xf32> to vector<2x64xf32>
    %518 = vector.extract_strided_slice %506 {offsets = [0, 192], sizes = [2, 64], strides = [1, 1]} : vector<2x256xf32> to vector<2x64xf32>
    %519 = math.tanh %518 : vector<2x64xf32>
    %520 = arith.mulf %516, %441 : vector<2x64xf32>
    %521 = arith.mulf %515, %519 : vector<2x64xf32>
    %522 = arith.addf %520, %521 : vector<2x64xf32>
    %523 = math.tanh %522 : vector<2x64xf32>
    %524 = arith.mulf %517, %523 : vector<2x64xf32>
    %525 = arith.truncf %443 : vector<2x64xf32> to vector<2x64xbf16>
    %526 = arith.truncf %467 : vector<2x64xf32> to vector<2x64xbf16>
    %527 = tpu.concatenate %525, %526 in 1 : vector<2x64xbf16>, vector<2x64xbf16> -> vector<2x128xbf16>
    %cst_121 = arith.constant dense<0.000000e+00> : vector<2x256xf32>
    %528 = tpu.matmul %527, %23, %cst_121 {dimension_numbers = #tpu.dot_dimension_numbers<[1], [0], [0], [1], [0, 0, 1, 1], [], []>} : vector<2x128xbf16>, vector<128x256xbf16>, vector<2x256xf32> -> vector<2x256xf32>
    %529 = vector.broadcast %24 : vector<1x256xf32> to vector<2x256xf32>
    %530 = arith.addf %528, %529 : vector<2x256xf32>
    %531 = vector.extract_strided_slice %530 {offsets = [0, 0], sizes = [2, 192], strides = [1, 1]} : vector<2x256xf32> to vector<2x192xf32>
    %cst_122 = arith.constant 5.000000e-01 : f32
    %532 = vector.broadcast %cst_122 : f32 to vector<2x192xf32>
    %533 = arith.mulf %532, %531 : vector<2x192xf32>
    %534 = math.tanh %533 : vector<2x192xf32>
    %cst_123 = arith.constant 5.000000e-01 : f32
    %535 = vector.broadcast %cst_123 : f32 to vector<2x192xf32>
    %536 = arith.mulf %535, %534 : vector<2x192xf32>
    %cst_124 = arith.constant 5.000000e-01 : f32
    %537 = vector.broadcast %cst_124 : f32 to vector<2x192xf32>
    %538 = arith.addf %536, %537 : vector<2x192xf32>
    %539 = vector.extract_strided_slice %538 {offsets = [0, 0], sizes = [2, 64], strides = [1, 1]} : vector<2x192xf32> to vector<2x64xf32>
    %540 = vector.extract_strided_slice %538 {offsets = [0, 64], sizes = [2, 64], strides = [1, 1]} : vector<2x192xf32> to vector<2x64xf32>
    %541 = vector.extract_strided_slice %538 {offsets = [0, 128], sizes = [2, 64], strides = [1, 1]} : vector<2x192xf32> to vector<2x64xf32>
    %542 = vector.extract_strided_slice %530 {offsets = [0, 192], sizes = [2, 64], strides = [1, 1]} : vector<2x256xf32> to vector<2x64xf32>
    %543 = math.tanh %542 : vector<2x64xf32>
    %544 = arith.mulf %540, %465 : vector<2x64xf32>
    %545 = arith.mulf %539, %543 : vector<2x64xf32>
    %546 = arith.addf %544, %545 : vector<2x64xf32>
    %547 = math.tanh %546 : vector<2x64xf32>
    %548 = arith.mulf %541, %547 : vector<2x64xf32>
    %549 = arith.truncf %467 : vector<2x64xf32> to vector<2x64xbf16>
    %550 = arith.truncf %491 : vector<2x64xf32> to vector<2x64xbf16>
    %551 = tpu.concatenate %549, %550 in 1 : vector<2x64xbf16>, vector<2x64xbf16> -> vector<2x128xbf16>
    %cst_125 = arith.constant dense<0.000000e+00> : vector<2x256xf32>
    %552 = tpu.matmul %551, %25, %cst_125 {dimension_numbers = #tpu.dot_dimension_numbers<[1], [0], [0], [1], [0, 0, 1, 1], [], []>} : vector<2x128xbf16>, vector<128x256xbf16>, vector<2x256xf32> -> vector<2x256xf32>
    %553 = vector.broadcast %26 : vector<1x256xf32> to vector<2x256xf32>
    %554 = arith.addf %552, %553 : vector<2x256xf32>
    %555 = vector.extract_strided_slice %554 {offsets = [0, 0], sizes = [2, 192], strides = [1, 1]} : vector<2x256xf32> to vector<2x192xf32>
    %cst_126 = arith.constant 5.000000e-01 : f32
    %556 = vector.broadcast %cst_126 : f32 to vector<2x192xf32>
    %557 = arith.mulf %556, %555 : vector<2x192xf32>
    %558 = math.tanh %557 : vector<2x192xf32>
    %cst_127 = arith.constant 5.000000e-01 : f32
    %559 = vector.broadcast %cst_127 : f32 to vector<2x192xf32>
    %560 = arith.mulf %559, %558 : vector<2x192xf32>
    %cst_128 = arith.constant 5.000000e-01 : f32
    %561 = vector.broadcast %cst_128 : f32 to vector<2x192xf32>
    %562 = arith.addf %560, %561 : vector<2x192xf32>
    %563 = vector.extract_strided_slice %562 {offsets = [0, 0], sizes = [2, 64], strides = [1, 1]} : vector<2x192xf32> to vector<2x64xf32>
    %564 = vector.extract_strided_slice %562 {offsets = [0, 64], sizes = [2, 64], strides = [1, 1]} : vector<2x192xf32> to vector<2x64xf32>
    %565 = vector.extract_strided_slice %562 {offsets = [0, 128], sizes = [2, 64], strides = [1, 1]} : vector<2x192xf32> to vector<2x64xf32>
    %566 = vector.extract_strided_slice %554 {offsets = [0, 192], sizes = [2, 64], strides = [1, 1]} : vector<2x256xf32> to vector<2x64xf32>
    %567 = math.tanh %566 : vector<2x64xf32>
    %568 = arith.mulf %564, %489 : vector<2x64xf32>
    %569 = arith.mulf %563, %567 : vector<2x64xf32>
    %570 = arith.addf %568, %569 : vector<2x64xf32>
    %571 = math.tanh %570 : vector<2x64xf32>
    %572 = arith.mulf %565, %571 : vector<2x64xf32>
    %cst_129 = arith.constant dense<0xFF800000> : vector<2xf32>
    %573 = vector.multi_reduction <maximumf>, %572, %cst_129 [1] : vector<2x64xf32> to vector<2xf32>
    %574 = vector.shape_cast %573 : vector<2xf32> to vector<2x1xf32>
    %575 = vector.broadcast %574 : vector<2x1xf32> to vector<2x64xf32>
    %576 = arith.subf %572, %575 : vector<2x64xf32>
    %577 = math.exp %576 : vector<2x64xf32>
    %cst_130 = arith.constant dense<0.000000e+00> : vector<2xf32>
    %578 = vector.multi_reduction <add>, %577, %cst_130 [1] : vector<2x64xf32> to vector<2xf32>
    %579 = vector.shape_cast %578 : vector<2xf32> to vector<2x1xf32>
    %580 = vector.broadcast %579 : vector<2x1xf32> to vector<2x64xf32>
    %581 = arith.divf %577, %580 : vector<2x64xf32>
    %c5 = arith.constant 5 : index
    %c0_131 = arith.constant 0 : index
    %c0_132 = arith.constant 0 : index
    %582 = vector.load %arg9[%c5, %c0_131, %c0_132] : memref<8x2x64xf32, #tpu.memory_space<vmem>>, vector<1x2x64xf32>
    %583 = vector.shape_cast %582 : vector<1x2x64xf32> to vector<2x64xf32>
    %584 = vector.shape_cast %581 : vector<2x64xf32> to vector<1x2x64xf32>
    tpu.vector_store %arg9[%c5, %c0_131, %c0_132], %584 {strides = array<i32>} : memref<8x2x64xf32, #tpu.memory_space<vmem>>, vector<1x2x64xf32>,
    %585 = arith.truncf %524 : vector<2x64xf32> to vector<2x64xbf16>
    %586 = arith.truncf %548 : vector<2x64xf32> to vector<2x64xbf16>
    %587 = tpu.concatenate %585, %586 in 1 : vector<2x64xbf16>, vector<2x64xbf16> -> vector<2x128xbf16>
    %cst_133 = arith.constant dense<0.000000e+00> : vector<2x256xf32>
    %588 = tpu.matmul %587, %23, %cst_133 {dimension_numbers = #tpu.dot_dimension_numbers<[1], [0], [0], [1], [0, 0, 1, 1], [], []>} : vector<2x128xbf16>, vector<128x256xbf16>, vector<2x256xf32> -> vector<2x256xf32>
    %589 = vector.broadcast %24 : vector<1x256xf32> to vector<2x256xf32>
    %590 = arith.addf %588, %589 : vector<2x256xf32>
    %591 = vector.extract_strided_slice %590 {offsets = [0, 0], sizes = [2, 192], strides = [1, 1]} : vector<2x256xf32> to vector<2x192xf32>
    %cst_134 = arith.constant 5.000000e-01 : f32
    %592 = vector.broadcast %cst_134 : f32 to vector<2x192xf32>
    %593 = arith.mulf %592, %591 : vector<2x192xf32>
    %594 = math.tanh %593 : vector<2x192xf32>
    %cst_135 = arith.constant 5.000000e-01 : f32
    %595 = vector.broadcast %cst_135 : f32 to vector<2x192xf32>
    %596 = arith.mulf %595, %594 : vector<2x192xf32>
    %cst_136 = arith.constant 5.000000e-01 : f32
    %597 = vector.broadcast %cst_136 : f32 to vector<2x192xf32>
    %598 = arith.addf %596, %597 : vector<2x192xf32>
    %599 = vector.extract_strided_slice %598 {offsets = [0, 0], sizes = [2, 64], strides = [1, 1]} : vector<2x192xf32> to vector<2x64xf32>
    %600 = vector.extract_strided_slice %598 {offsets = [0, 64], sizes = [2, 64], strides = [1, 1]} : vector<2x192xf32> to vector<2x64xf32>
    %601 = vector.extract_strided_slice %598 {offsets = [0, 128], sizes = [2, 64], strides = [1, 1]} : vector<2x192xf32> to vector<2x64xf32>
    %602 = vector.extract_strided_slice %590 {offsets = [0, 192], sizes = [2, 64], strides = [1, 1]} : vector<2x256xf32> to vector<2x64xf32>
    %603 = math.tanh %602 : vector<2x64xf32>
    %604 = arith.mulf %600, %546 : vector<2x64xf32>
    %605 = arith.mulf %599, %603 : vector<2x64xf32>
    %606 = arith.addf %604, %605 : vector<2x64xf32>
    %607 = math.tanh %606 : vector<2x64xf32>
    %608 = arith.mulf %601, %607 : vector<2x64xf32>
    %609 = arith.truncf %548 : vector<2x64xf32> to vector<2x64xbf16>
    %610 = arith.truncf %572 : vector<2x64xf32> to vector<2x64xbf16>
    %611 = tpu.concatenate %609, %610 in 1 : vector<2x64xbf16>, vector<2x64xbf16> -> vector<2x128xbf16>
    %cst_137 = arith.constant dense<0.000000e+00> : vector<2x256xf32>
    %612 = tpu.matmul %611, %25, %cst_137 {dimension_numbers = #tpu.dot_dimension_numbers<[1], [0], [0], [1], [0, 0, 1, 1], [], []>} : vector<2x128xbf16>, vector<128x256xbf16>, vector<2x256xf32> -> vector<2x256xf32>
    %613 = vector.broadcast %26 : vector<1x256xf32> to vector<2x256xf32>
    %614 = arith.addf %612, %613 : vector<2x256xf32>
    %615 = vector.extract_strided_slice %614 {offsets = [0, 0], sizes = [2, 192], strides = [1, 1]} : vector<2x256xf32> to vector<2x192xf32>
    %cst_138 = arith.constant 5.000000e-01 : f32
    %616 = vector.broadcast %cst_138 : f32 to vector<2x192xf32>
    %617 = arith.mulf %616, %615 : vector<2x192xf32>
    %618 = math.tanh %617 : vector<2x192xf32>
    %cst_139 = arith.constant 5.000000e-01 : f32
    %619 = vector.broadcast %cst_139 : f32 to vector<2x192xf32>
    %620 = arith.mulf %619, %618 : vector<2x192xf32>
    %cst_140 = arith.constant 5.000000e-01 : f32
    %621 = vector.broadcast %cst_140 : f32 to vector<2x192xf32>
    %622 = arith.addf %620, %621 : vector<2x192xf32>
    %623 = vector.extract_strided_slice %622 {offsets = [0, 0], sizes = [2, 64], strides = [1, 1]} : vector<2x192xf32> to vector<2x64xf32>
    %624 = vector.extract_strided_slice %622 {offsets = [0, 64], sizes = [2, 64], strides = [1, 1]} : vector<2x192xf32> to vector<2x64xf32>
    %625 = vector.extract_strided_slice %622 {offsets = [0, 128], sizes = [2, 64], strides = [1, 1]} : vector<2x192xf32> to vector<2x64xf32>
    %626 = vector.extract_strided_slice %614 {offsets = [0, 192], sizes = [2, 64], strides = [1, 1]} : vector<2x256xf32> to vector<2x64xf32>
    %627 = math.tanh %626 : vector<2x64xf32>
    %628 = arith.mulf %624, %570 : vector<2x64xf32>
    %629 = arith.mulf %623, %627 : vector<2x64xf32>
    %630 = arith.addf %628, %629 : vector<2x64xf32>
    %631 = math.tanh %630 : vector<2x64xf32>
    %632 = arith.mulf %625, %631 : vector<2x64xf32>
    %cst_141 = arith.constant dense<0xFF800000> : vector<2xf32>
    %633 = vector.multi_reduction <maximumf>, %632, %cst_141 [1] : vector<2x64xf32> to vector<2xf32>
    %634 = vector.shape_cast %633 : vector<2xf32> to vector<2x1xf32>
    %635 = vector.broadcast %634 : vector<2x1xf32> to vector<2x64xf32>
    %636 = arith.subf %632, %635 : vector<2x64xf32>
    %637 = math.exp %636 : vector<2x64xf32>
    %cst_142 = arith.constant dense<0.000000e+00> : vector<2xf32>
    %638 = vector.multi_reduction <add>, %637, %cst_142 [1] : vector<2x64xf32> to vector<2xf32>
    %639 = vector.shape_cast %638 : vector<2xf32> to vector<2x1xf32>
    %640 = vector.broadcast %639 : vector<2x1xf32> to vector<2x64xf32>
    %641 = arith.divf %637, %640 : vector<2x64xf32>
    %c6 = arith.constant 6 : index
    %c0_143 = arith.constant 0 : index
    %c0_144 = arith.constant 0 : index
    %642 = vector.load %arg9[%c6, %c0_143, %c0_144] : memref<8x2x64xf32, #tpu.memory_space<vmem>>, vector<1x2x64xf32>
    %643 = vector.shape_cast %642 : vector<1x2x64xf32> to vector<2x64xf32>
    %644 = vector.shape_cast %641 : vector<2x64xf32> to vector<1x2x64xf32>
    tpu.vector_store %arg9[%c6, %c0_143, %c0_144], %644 {strides = array<i32>} : memref<8x2x64xf32, #tpu.memory_space<vmem>>, vector<1x2x64xf32>,
    %645 = arith.truncf %608 : vector<2x64xf32> to vector<2x64xbf16>
    %646 = arith.truncf %632 : vector<2x64xf32> to vector<2x64xbf16>
    %647 = tpu.concatenate %645, %646 in 1 : vector<2x64xbf16>, vector<2x64xbf16> -> vector<2x128xbf16>
    %cst_145 = arith.constant dense<0.000000e+00> : vector<2x256xf32>
    %648 = tpu.matmul %647, %25, %cst_145 {dimension_numbers = #tpu.dot_dimension_numbers<[1], [0], [0], [1], [0, 0, 1, 1], [], []>} : vector<2x128xbf16>, vector<128x256xbf16>, vector<2x256xf32> -> vector<2x256xf32>
    %649 = vector.broadcast %26 : vector<1x256xf32> to vector<2x256xf32>
    %650 = arith.addf %648, %649 : vector<2x256xf32>
    %651 = vector.extract_strided_slice %650 {offsets = [0, 0], sizes = [2, 192], strides = [1, 1]} : vector<2x256xf32> to vector<2x192xf32>
    %cst_146 = arith.constant 5.000000e-01 : f32
    %652 = vector.broadcast %cst_146 : f32 to vector<2x192xf32>
    %653 = arith.mulf %652, %651 : vector<2x192xf32>
    %654 = math.tanh %653 : vector<2x192xf32>
    %cst_147 = arith.constant 5.000000e-01 : f32
    %655 = vector.broadcast %cst_147 : f32 to vector<2x192xf32>
    %656 = arith.mulf %655, %654 : vector<2x192xf32>
    %cst_148 = arith.constant 5.000000e-01 : f32
    %657 = vector.broadcast %cst_148 : f32 to vector<2x192xf32>
    %658 = arith.addf %656, %657 : vector<2x192xf32>
    %659 = vector.extract_strided_slice %658 {offsets = [0, 0], sizes = [2, 64], strides = [1, 1]} : vector<2x192xf32> to vector<2x64xf32>
    %660 = vector.extract_strided_slice %658 {offsets = [0, 64], sizes = [2, 64], strides = [1, 1]} : vector<2x192xf32> to vector<2x64xf32>
    %661 = vector.extract_strided_slice %658 {offsets = [0, 128], sizes = [2, 64], strides = [1, 1]} : vector<2x192xf32> to vector<2x64xf32>
    %662 = vector.extract_strided_slice %650 {offsets = [0, 192], sizes = [2, 64], strides = [1, 1]} : vector<2x256xf32> to vector<2x64xf32>
    %663 = math.tanh %662 : vector<2x64xf32>
    %664 = arith.mulf %660, %630 : vector<2x64xf32>
    %665 = arith.mulf %659, %663 : vector<2x64xf32>
    %666 = arith.addf %664, %665 : vector<2x64xf32>
    %667 = math.tanh %666 : vector<2x64xf32>
    %668 = arith.mulf %661, %667 : vector<2x64xf32>
    %cst_149 = arith.constant dense<0xFF800000> : vector<2xf32>
    %669 = vector.multi_reduction <maximumf>, %668, %cst_149 [1] : vector<2x64xf32> to vector<2xf32>
    %670 = vector.shape_cast %669 : vector<2xf32> to vector<2x1xf32>
    %671 = vector.broadcast %670 : vector<2x1xf32> to vector<2x64xf32>
    %672 = arith.subf %668, %671 : vector<2x64xf32>
    %673 = math.exp %672 : vector<2x64xf32>
    %cst_150 = arith.constant dense<0.000000e+00> : vector<2xf32>
    %674 = vector.multi_reduction <add>, %673, %cst_150 [1] : vector<2x64xf32> to vector<2xf32>
    %675 = vector.shape_cast %674 : vector<2xf32> to vector<2x1xf32>
    %676 = vector.broadcast %675 : vector<2x1xf32> to vector<2x64xf32>
    %677 = arith.divf %673, %676 : vector<2x64xf32>
    %c7 = arith.constant 7 : index
    %c0_151 = arith.constant 0 : index
    %c0_152 = arith.constant 0 : index
    %678 = vector.load %arg9[%c7, %c0_151, %c0_152] : memref<8x2x64xf32, #tpu.memory_space<vmem>>, vector<1x2x64xf32>
    %679 = vector.shape_cast %678 : vector<1x2x64xf32> to vector<2x64xf32>
    %680 = vector.shape_cast %677 : vector<2x64xf32> to vector<1x2x64xf32>
    tpu.vector_store %arg9[%c7, %c0_151, %c0_152], %680 {strides = array<i32>} : memref<8x2x64xf32, #tpu.memory_space<vmem>>, vector<1x2x64xf32>,
    return
  }
}

</mosaic_0001>

<bundles_post_ra>
// kernel: mymodel_forward.1
= control target key start
LH: loop header
LB: loop body
LE: loop exit
PB: predicated region body
PF: predicated region fallthrough
CT: control target
= control target key end

     0   :  { %14 = vsyncpa [#allocation3], 0  ;;  %s3996_s0 = inlined_call_operand.vmem [shape: s32[16,1], index: 0, kind: input, shape index: {}]   ;;  %s3997_s1 = inlined_call_operand.hbm [shape: f32[128,128], index: 1, kind: input, shape index: {}]   ;;  %s3998_s2 = inlined_call_operand.hbm [shape: bf16[128,256], index: 2, kind: input, shape index: {}]   ;;  %s3999_s3 = inlined_call_operand.hbm [shape: bf16[64,256], index: 3, kind: input, shape index: {}]   ;;  %s4000_s4 = inlined_call_operand.vmem [shape: f32[1,256], index: 4, kind: input, shape index: {}]   ;;  %s4001_s5 = inlined_call_operand.hbm [shape: bf16[128,256], index: 5, kind: input, shape index: {}]   ;;  %s4002_s6 = inlined_call_operand.vmem [shape: f32[1,256], index: 6, kind: input, shape index: {}]   ;;  %s4003_s7 = inlined_call_operand.hbm [shape: bf16[128,256], index: 7, kind: input, shape index: {}]   ;;  %s4004_s8 = inlined_call_operand.vmem [shape: f32[1,256], index: 8, kind: input, shape index: {}]   ;;  %s4005_s9 = inlined_call_operand.hbm [shape: f32[8,2,64], index: 9, kind: output, shape index: {}]  }
   0x1   :  { %15 = vsyncpa [#allocation6], 0 }
   0x2   :  { %16 = vsyncpa [#allocation9], 0 }
   0x3   :  { %17 = vsyncpa [#allocation4], 0  ;;  %s37_s11 = sshll.u32 %s3998_s2, 4  ;;  %s3008_s12 = smov [#allocation5]   ;;  %s38_s11 = int_to_ptr.hbm [resolvable:$true] %s37_s11 }
   0x4   :  { %s39_s13 = sshll.u32 %s3008_s12, 4  ;;  %s65_s16 = sshll.u32 %s4001_s5, 4  ;;  %s40_s13 = int_to_ptr.vmem [resolvable:$true] %s39_s13  ;;  %s66_s16 = int_to_ptr.hbm [resolvable:$true] %s65_s16 }
   0x5   :  { %s3009_s17 = smov 128   ;;  %s3010_s18 = smov 8  }
   0x6   :  { %45 = dma.hbm_to_vmem [thread:$0]  %s38_s11, 2048, %s40_s13, [#allocation6], %s3009_s17, %s3009_s17, %s3010_s18  }
   0x7   :  { %s3011_s19 = smov [#allocation8]   ;;  %s24_s23 = sshll.u32 %s3997_s1, 4  ;;  %s25_s23 = int_to_ptr.hbm [resolvable:$true] %s24_s23 }
   0x8   :  { %s67_s20 = sshll.u32 %s3011_s19, 4  ;;  %s50_s25 = sshll.u32 %s3999_s3, 4  ;;  %s68_s20 = int_to_ptr.vmem [resolvable:$true] %s67_s20  ;;  %s51_s25 = int_to_ptr.hbm [resolvable:$true] %s50_s25 }
   0x9   :  { %73 = dma.hbm_to_vmem [thread:$0]  %s66_s16, 2048, %s68_s20, [#allocation9], %s3009_s17, %s3009_s17, %s3010_s18  }
   0xa   :  { %s3012_s26 = smov [#allocation2]   ;;  %s3013_s5 = smov [#allocation7]  }
   0xb   :  { %s26_s27 = sshll.u32 %s3012_s26, 4  ;;  %s52_s28 = sshll.u32 %s3013_s5, 4  ;;  %s27_s27 = int_to_ptr.vmem [resolvable:$true] %s26_s27  ;;  %s53_s28 = int_to_ptr.vmem [resolvable:$true] %s52_s28 }
   0xc   :  { %32 = dma.hbm_to_vmem [thread:$0]  %s25_s23, 2048, %s27_s27, [#allocation3], %s3009_s17, %s3009_s17, %s3010_s18  }
   0xd   :  { %s80_s10 = sshll.u32 %s4003_s7, 4  ;;  %s3014_s1 = smov [#allocation10]   ;;  %s81_s10 = int_to_ptr.hbm [resolvable:$true] %s80_s10 }
   0xe   :  { %58 = dma.hbm_to_vmem [thread:$0]  %s51_s25, 1024, %s53_s28, [#allocation6], %s3009_s17, %s3009_s17, %s3010_s18  }
   0xf   :  { %s82_s11 = sshll.u32 %s3014_s1, 4  ;;  %s83_s11 = int_to_ptr.vmem [resolvable:$true] %s82_s11 }
  0x10   :  { %88 = dma.hbm_to_vmem [thread:$0]  %s81_s10, 2048, %s83_s11, [#allocation9], %s3009_s17, %s3009_s17, %s3010_s18  }
  0x11   :  { %3000 = dma.done.wait [#allocation3], 2048  }
  0x12   :  { %3001 = vsyncadd [#allocation3], 4294965248 }
  0x13   :  { %3002 = dma.done.wait [#allocation6], 3072  }
  0x14   :  { %3003 = vsyncadd [#allocation6], 4294964224 }
  0x15   :  { %3004 = dma.done.wait [#allocation9], 4096  }
  0x16   :  { %3005 = vsyncadd [#allocation9], 4294963200  ;;  %v3015_v0 = vmov 0   ;;  %v112_v1 = vld [vmem:[%s3996_s0] sm:$0xff]  ;;  %v143_v2 = vld [vmem:[#allocation2 + $0x78] sm:$0xff]  ;;  %s3017_s15 = smov 64  }
  0x17   :  { %2631 = vset.pattern.permute.xlu0 %v3015_v0  ;;  %144 = vmatpush.msra.mxu0 %v143_v2  ;;  %v142_v3 = vld [vmem:[#allocation2 + $0x70] sm:$0xff]  ;;  %v141_v4 = vld [vmem:[#allocation2 + $0x68] sm:$0xff]  ;;  %v140_v5 = vld [vmem:[#allocation2 + $0x60] sm:$0xff]  ;;  %vm380_vm2 = vcmask 523264   ;;  %vm920_vm3 = vcmask 517120   ;;  %s2301_s21 = sshll.u32 %s4005_s9, 4  ;;  %s2302_s21 = int_to_ptr.hbm [resolvable:$true] %s2301_s21 }
  0x18   :  { %117 = vperm.xlu0 %2631, %v112_v1   ;;  %v113_v6 = vld [vmem:[%s3996_s0 + $0x8] sm:$0xff]  ;;  %v139_v7 = vld [vmem:[#allocation2 + $0x58] sm:$0xff]  ;;  %v138_v8 = vld [vmem:[#allocation2 + $0x50] sm:$0xff]  ;;  %v114_v1 = vlaneseq  ;;  %s3019_s22 = smov 32   ;;  %s3020_s23 = smov 2  }
  0x19   :  { %145 = vmatpush.msra.mxu0 %v142_v3  ;;  %v137_v9 = vld [vmem:[#allocation2 + $0x48] sm:$0xff]  ;;  %v136_v10 = vld [vmem:[#allocation2 + $0x40] sm:$0xff]  ;;  %v135_v11 = vld [vmem:[#allocation2 + $0x38] sm:$0xff] }
  0x1a   :  { %v134_v12 = vld [vmem:[#allocation2 + $0x30] sm:$0xff]  ;;  %v133_v13 = vld [vmem:[#allocation2 + $0x28] sm:$0xff]  ;;  %v132_v14 = vld [vmem:[#allocation2 + $0x20] sm:$0xff] }
  0x1b   :  { %146 = vmatpush.msra.mxu0 %v141_v4  ;;  %v131_v15 = vld [vmem:[#allocation2 + $0x18] sm:$0xff]  ;;  %v130_v16 = vld [vmem:[#allocation2 + $0x10] sm:$0xff]  ;;  %v129_v17 = vld [vmem:[#allocation2 + $0x8] sm:$0xff] }
  0x1c   :  { %v128_v18 = vld [vmem:[#allocation2] sm:$0xff]  ;;  %v2410_v19 = vld [vmem:[#allocation7 + $0x30] sm:$0xf]  ;;  %v2585_v20 = vld [vmem:[#allocation7 + $0x34] sm:$0xf0] }
  0x1d   :  { %147 = vmatpush.msra.mxu0 %v140_v5  ;;  %v2402_v21 = vld [vmem:[#allocation7 + $0x20] sm:$0xf]  ;;  %v3093_v22 = vor.u32 %v2585_v20, %v2410_v19  ;;  %v2583_v23 = vld [vmem:[#allocation7 + $0x24] sm:$0xf0]  ;;  %v2378_v24 = vld [vmem:[#allocation5 + $0x70] sm:$0xf] }
  0x1e   :  { %v2577_v25 = vld [vmem:[#allocation5 + $0x74] sm:$0xf0]  ;;  %v2576_v27 = vld [vmem:[#allocation5 + $0x74] sm:$0xf]  ;;  %v2380_v28 = vld [vmem:[#allocation5 + $0x78] sm:$0xf0]  ;;  %v3096_v29 = vor.u32 %v2583_v23, %v2402_v21 }
  0x1f   :  { %148 = vmatpush.msra.mxu0 %v139_v7  ;;  %v2379_v26 = vor.u32 %v2577_v25, %v2378_v24  ;;  %388 = vmatpush.bf16.msra.mxu3 %v3093_v22  ;;  %v2383_v30 = vor.u32 %v2576_v27, %v2380_v28  ;;  %v2394_v31 = vld [vmem:[#allocation7 + $0x10] sm:$0xf]  ;;  %v2370_v32 = vld [vmem:[#allocation5 + $0x60] sm:$0xf]  ;;  %v2575_v33 = vld [vmem:[#allocation5 + $0x64] sm:$0xf0] }
  0x20   :  { %120 = vperm.xlu0 %2631, %v113_v6   ;;  %v2581_v34 = vld [vmem:[#allocation7 + $0x14] sm:$0xf0]  ;;  %v2371_v35 = vor.u32 %v2575_v33, %v2370_v32  ;;  %v2574_v36 = vld [vmem:[#allocation5 + $0x64] sm:$0xf]  ;;  %v2372_v37 = vld [vmem:[#allocation5 + $0x68] sm:$0xf0] }
  0x21   :  { %149 = vmatpush.msra.mxu0 %v138_v8  ;;  %270 = vmatpush.bf16.msra.mxu1 %v2379_v26  ;;  %v2375_v38 = vor.u32 %v2574_v36, %v2372_v37  ;;  %v2362_v39 = vld [vmem:[#allocation5 + $0x50] sm:$0xf]  ;;  %v2573_v40 = vld [vmem:[#allocation5 + $0x54] sm:$0xf0]  ;;  %v2572_v41 = vld [vmem:[#allocation5 + $0x54] sm:$0xf]  ;;  %v3100_v43 = vor.u32 %v2581_v34, %v2394_v31 }
  0x22   :  { %284 = vmatpush.bf16.msra.mxu2 %v2383_v30  ;;  %v2364_v42 = vld [vmem:[#allocation5 + $0x58] sm:$0xf0]  ;;  %v2386_v44 = vld [vmem:[#allocation7] sm:$0xf]  ;;  %v2579_v45 = vld [vmem:[#allocation7 + $0x4] sm:$0xf0]  ;;  %v2363_v46 = vor.u32 %v2573_v40, %v2362_v39 }
  0x23   :  { %150 = vmatpush.msra.mxu0 %v137_v9  ;;  %389 = vmatpush.bf16.msra.mxu3 %v3096_v29  ;;  %v2584_v47 = vld [vmem:[#allocation7 + $0x34] sm:$0xf]  ;;  %v2367_v48 = vor.u32 %v2572_v41, %v2364_v42  ;;  %v2412_v49 = vld [vmem:[#allocation7 + $0x38] sm:$0xf0]  ;;  %v2354_v50 = vld [vmem:[#allocation5 + $0x40] sm:$0xf]  ;;  %v3104_v54 = vor.u32 %v2579_v45, %v2386_v44 }
  0x24   :  { %v2571_v51 = vld [vmem:[#allocation5 + $0x44] sm:$0xf0]  ;;  %v2570_v52 = vld [vmem:[#allocation5 + $0x44] sm:$0xf]  ;;  %v2356_v53 = vld [vmem:[#allocation5 + $0x48] sm:$0xf0]  ;;  %v3107_v55 = vor.u32 %v2584_v47, %v2412_v49 }
  0x25   :  { %151 = vmatpush.msra.mxu0 %v136_v10  ;;  %271 = vmatpush.bf16.msra.mxu1 %v2371_v35  ;;  %v2355_v56 = vor.u32 %v2571_v51, %v2354_v50  ;;  %v2582_v57 = vld [vmem:[#allocation7 + $0x24] sm:$0xf]  ;;  %v2359_v58 = vor.u32 %v2570_v52, %v2356_v53  ;;  %v2404_v59 = vld [vmem:[#allocation7 + $0x28] sm:$0xf0]  ;;  %v2346_v60 = vld [vmem:[#allocation5 + $0x30] sm:$0xf] }
  0x26   :  { %285 = vmatpush.bf16.msra.mxu2 %v2375_v38  ;;  %v2569_v61 = vld [vmem:[#allocation5 + $0x34] sm:$0xf0]  ;;  %v2568_v62 = vld [vmem:[#allocation5 + $0x34] sm:$0xf]  ;;  %v2348_v63 = vld [vmem:[#allocation5 + $0x38] sm:$0xf0]  ;;  %v3112_v2 = vor.u32 %v2582_v57, %v2404_v59 }
  0x27   :  { %152 = vmatpush.msra.mxu0 %v135_v11  ;;  %390 = vmatpush.bf16.msra.mxu3 %v3100_v43  ;;  %v2347_v3 = vor.u32 %v2569_v61, %v2346_v60  ;;  %v2351_v4 = vor.u32 %v2568_v62, %v2348_v63  ;;  %v2580_v5 = vld [vmem:[#allocation7 + $0x14] sm:$0xf]  ;;  %v2396_v6 = vld [vmem:[#allocation7 + $0x18] sm:$0xf0]  ;;  %v115_v7 = vand.u32 127, %v114_v1  ;;  %v3016_v10 = vmov 1.0  }
  0x28   :  { %v3116_v8 = vor.u32 %v2580_v5, %v2396_v6  ;;  %v2388_v19 = vld [vmem:[#allocation7 + $0x8] sm:$0xf0]  ;;  %v2330_v21 = vld [vmem:[#allocation5 + $0x10] sm:$0xf]  ;;  %v2565_v23 = vld [vmem:[#allocation5 + $0x14] sm:$0xf0] }
  0x29   :  { %153 = vmatpush.msra.mxu0 %v134_v12  ;;  %272 = vmatpush.bf16.msra.mxu1 %v2363_v46  ;;  %v2338_v12 = vld [vmem:[#allocation5 + $0x20] sm:$0xf]  ;;  %v2564_v24 = vld [vmem:[#allocation5 + $0x14] sm:$0xf]  ;;  %v2331_v25 = vor.u32 %v2565_v23, %v2330_v21  ;;  %v2332_v26 = vld [vmem:[#allocation5 + $0x18] sm:$0xf0] }
  0x2a   :  { %286 = vmatpush.bf16.msra.mxu2 %v2367_v48  ;;  %v2335_v27 = vor.u32 %v2564_v24, %v2332_v26  ;;  %v2322_v28 = vld [vmem:[#allocation5] sm:$0xf]  ;;  %v2563_v30 = vld [vmem:[#allocation5 + $0x4] sm:$0xf0]  ;;  %v2562_v31 = vld [vmem:[#allocation5 + $0x4] sm:$0xf] }
  0x2b   :  { %154 = vmatpush.msra.mxu0 %v133_v13  ;;  %391 = vmatpush.bf16.msra.mxu3 %v3104_v54  ;;  %v2567_v13 = vld [vmem:[#allocation5 + $0x24] sm:$0xf0]  ;;  %v2323_v32 = vor.u32 %v2563_v30, %v2322_v28  ;;  %v2324_v33 = vld [vmem:[#allocation5 + $0x8] sm:$0xf0]  ;;  %v3138_v41 = vld [vmem:[%s4000_s4] sm:$0x3] }
  0x2c   :  { %v2327_v34 = vor.u32 %v2562_v31, %v2324_v33  ;;  %4030 = vst [vmem:[#allocation16_spill] sm:$0xff] %v3138_v41  ;;  %v4007_v42 = vperm.slane %v3138_v41, 1  ;;  %v4006_v48 = vperm.slane %v3138_v41, 0  ;;  %v2476_v60 = vld [vmem:[#allocation8 + $0x70] sm:$0xf] }
  0x2d   :  { %155 = vmatpush.msra.mxu0 %v132_v14  ;;  %273 = vmatpush.bf16.msra.mxu1 %v2355_v56  ;;  %v2566_v14 = vld [vmem:[#allocation5 + $0x24] sm:$0xf]  ;;  %v2601_v61 = vld [vmem:[#allocation8 + $0x74] sm:$0xf0]  ;;  %v2600_v62 = vld [vmem:[#allocation8 + $0x74] sm:$0xf] }
  0x2e   :  { %287 = vmatpush.bf16.msra.mxu2 %v2359_v58  ;;  %392 = vmatmul.bf16.vlgmr.msra.gmra.mxu3 %v3015_v0  ;;  %v3157_v63 = vor.u32 %v2601_v61, %v2476_v60  ;;  %v2478_v1 = vld [vmem:[#allocation8 + $0x78] sm:$0xf0]  ;;  %v2598_v6 = vld [vmem:[#allocation8 + $0x64] sm:$0xf]  ;;  %v2454_v21 = vld [vmem:[#allocation8 + $0x48] sm:$0xf0] }
  0x2f   :  { %156 = vmatpush.msra.mxu0 %v131_v15  ;;  %401 = vmatpush.bf16.msrb.mxu3 %v3107_v55  ;;  %v2339_v15 = vor.u32 %v2567_v13, %v2338_v12  ;;  %v3159_v5 = vor.u32 %v2600_v62, %v2478_v1  ;;  %v2597_v12 = vld [vmem:[#allocation8 + $0x54] sm:$0xf0]  ;;  %v2596_v13 = vld [vmem:[#allocation8 + $0x54] sm:$0xf]  ;;  %v2446_v28 = vld [vmem:[#allocation8 + $0x38] sm:$0xf0] }
  0x30   :  { %v2593_v26 = vld [vmem:[#allocation8 + $0x34] sm:$0xf0]  ;;  %v2591_v33 = vld [vmem:[#allocation8 + $0x24] sm:$0xf0]  ;;  %v2422_v60 = vld [vmem:[#allocation8 + $0x8] sm:$0xf0] }
  0x31   :  { %157 = vmatpush.msra.mxu0 %v130_v16  ;;  %274 = vmatpush.bf16.msra.mxu1 %v2347_v3  ;;  %v2340_v16 = vld [vmem:[#allocation5 + $0x28] sm:$0xf0]  ;;  %v2468_v3 = vld [vmem:[#allocation8 + $0x60] sm:$0xf] }
  0x32   :  { %288 = vmatpush.bf16.msra.mxu2 %v2351_v4  ;;  %v2599_v4 = vld [vmem:[#allocation8 + $0x64] sm:$0xf0] }
  0x33   :  { %158 = vmatpush.msra.mxu0 %v129_v17  ;;  %402 = vmatpush.bf16.msrb.mxu3 %v3112_v2  ;;  %v2343_v17 = vor.u32 %v2566_v14, %v2340_v16  ;;  %v2462_v14 = vld [vmem:[#allocation8 + $0x58] sm:$0xf0] }
  0x34   :  { %v3171_v16 = vor.u32 %v2596_v13, %v2462_v14 }
  0x35   :  { %159 = vmatpush.msra.mxu0 %v128_v18  ;;  %v2578_v18 = vld [vmem:[#allocation7 + $0x4] sm:$0xf]  ;;  %275 = vmatpush.bf16.msra.mxu1 %v2339_v15 }
  0x36   :  { %v3123_v20 = vor.u32 %v2578_v18, %v2388_v19  ;;  %289 = vmatpush.bf16.msra.mxu2 %v2343_v17  ;;  %v2452_v17 = vld [vmem:[#allocation8 + $0x40] sm:$0xf]  ;;  %v2595_v18 = vld [vmem:[#allocation8 + $0x44] sm:$0xf0]  ;;  %v2594_v19 = vld [vmem:[#allocation8 + $0x44] sm:$0xf] }
  0x37   :  { %446 = vmatpush.bf16.msrb.mxu0 %v3093_v22  ;;  %403 = vmatpush.bf16.msrb.mxu3 %v3116_v8  ;;  %v3174_v23 = vor.u32 %v2595_v18, %v2452_v17  ;;  %v3177_v24 = vor.u32 %v2594_v19, %v2454_v21  ;;  %v322_v18 = vld [vmem:[%s4002_s6] sm:$0x3] }
  0x38   :  { %v3240_v21 = vperm.slane %v322_v18, 1 }
  0x39   :  { %276 = vmatpush.bf16.msra.mxu1 %v2331_v25  ;;  %v2444_v25 = vld [vmem:[#allocation8 + $0x30] sm:$0xf] }
  0x3a   :  { %290 = vmatpush.bf16.msra.mxu2 %v2335_v27  ;;  %v2592_v27 = vld [vmem:[#allocation8 + $0x34] sm:$0xf]  ;;  %v3180_v30 = vor.u32 %v2593_v26, %v2444_v25  ;;  %4033 = vst [vmem:[#allocation19_spill] sm:$0xff] %v3240_v21 }
  0x3b   :  { %447 = vmatpush.bf16.msrb.mxu0 %v3096_v29  ;;  %404 = vmatpush.bf16.msrb.mxu3 %v3123_v20  ;;  %v3183_v31 = vor.u32 %v2592_v27, %v2446_v28 }
  0x3d   :  { %277 = vmatpush.bf16.msra.mxu1 %v2323_v32  ;;  %v2436_v32 = vld [vmem:[#allocation8 + $0x20] sm:$0xf] }
  0x3e   :  { %405 = vmatmul.bf16.vlgmr.msrb.gmra.mxu3 %v3015_v0  ;;  %291 = vmatpush.bf16.msra.mxu2 %v2327_v34  ;;  %v2590_v34 = vld [vmem:[#allocation8 + $0x24] sm:$0xf] }
  0x3f   :  { %448 = vmatpush.bf16.msrb.mxu0 %v3100_v43  ;;  %605 = vmatpush.bf16.msra.mxu3 %v3159_v5 }
  0x41   :  { %459 = vmatpush.bf16.msrb.mxu1 %v3107_v55 }
  0x42   :  { %592 = vmatpush.bf16.msrb.mxu2 %v3157_v63 }
  0x43   :  { %449 = vmatpush.bf16.msrb.mxu0 %v3104_v54 }
  0x45   :  { %460 = vmatpush.bf16.msrb.mxu1 %v3112_v2 }
  0x49   :  { %461 = vmatpush.bf16.msrb.mxu1 %v3116_v8 }
  0x4d   :  { %462 = vmatpush.bf16.msrb.mxu1 %v3123_v20 }
  0x8a   :  { %v118_v9 = vpop.permute.xlu0 %117 }
  0x8b   :  { %vm122_vm0 = vcmp.eq.s32.totalorder %v115_v7, %v118_v9  ;;  %v3162_v9 = vor.u32 %v2599_v4, %v2468_v3 }
  0x8c   :  { %2318 = vmatmul.msk.f32.vlgmr.msra.gmra.mxu0 %vm122_vm0, %v3016_v10 }
  0x8d   :  { %656 = vmatpush.bf16.msra.mxu0 %v3093_v22  ;;  %593 = vmatpush.bf16.msrb.mxu2 %v3162_v9 }
  0x91   :  { %657 = vmatpush.bf16.msra.mxu0 %v3096_v29 }
  0x92   :  { %v121_v11 = vpop.permute.xlu0 %120 }
  0x93   :  { %vm123_vm1 = vcmp.eq.s32.totalorder %v115_v7, %v121_v11  ;;  %v2470_v7 = vld [vmem:[#allocation8 + $0x68] sm:$0xf0]  ;;  %v2460_v11 = vld [vmem:[#allocation8 + $0x50] sm:$0xf] }
  0x94   :  { %2319 = vmatmul.msk.f32.gmra.mxu0 %vm123_vm1, %v3016_v10  ;;  %v3165_v10 = vor.u32 %v2598_v6, %v2470_v7  ;;  %v3168_v15 = vor.u32 %v2597_v12, %v2460_v11 }
  0x95   :  { %658 = vmatpush.bf16.msra.mxu0 %v3100_v43 }
  0x96   :  { %606 = vmatpush.bf16.msra.mxu3 %v3165_v10  ;;  %594 = vmatpush.bf16.msrb.mxu2 %v3168_v15 }
  0x99   :  { %659 = vmatpush.bf16.msra.mxu0 %v3104_v54 }
  0x9a   :  { %607 = vmatpush.bf16.msra.mxu3 %v3171_v16  ;;  %595 = vmatpush.bf16.msrb.mxu2 %v3174_v23 }
  0x9e   :  { %608 = vmatpush.bf16.msra.mxu3 %v3177_v24  ;;  %596 = vmatpush.bf16.msrb.mxu2 %v3180_v30 }
  0xa2   :  { %609 = vmatpush.bf16.msra.mxu3 %v3183_v31 }
  0xb1   :  { %v393_v36 = vpop.f32.mrf.mxu3 }
  0xb9   :  { %v395_v0 = vpop.f32.mrf.mxu3 }
  0xba   :  { %v2428_v0 = vld [vmem:[#allocation8 + $0x10] sm:$0xf] }
  0xc1   :  { %v406_v39 = vpop.f32.mrf.mxu3 }
  0xc9   :  { %v408_v40 = vpop.f32.mrf.mxu3 }
  0xca   :  { %v2588_v40 = vld [vmem:[#allocation8 + $0x14] sm:$0xf] }
 0x109   :  { %v161_v35 = vpop.f32.mrf.mxu0 }
 0x111   :  { %v164_v37 = vpop.f32.mrf.mxu0 }
 0x112   :  { %v167_v38 = vpack.c.bf16 %v164_v37, %v161_v35  ;;  %v2438_v35 = vld [vmem:[#allocation8 + $0x28] sm:$0xf0] }
 0x113   :  { %v3189_v37 = vor.u32 %v2590_v34, %v2438_v35 }
 0x114   :  { %278 = vmatmul.bf16.vlgmr.msra.gmra.mxu1 %v167_v38  ;;  %292 = vmatmul.bf16.vlgmr.msra.gmra.mxu2 %v167_v38  ;;  %v2589_v38 = vld [vmem:[#allocation8 + $0x14] sm:$0xf0] }
 0x115   :  { %669 = vmatpush.bf16.msra.mxu1 %v3107_v55  ;;  %610 = vmatpush.bf16.msra.mxu3 %v3189_v37 }
 0x119   :  { %670 = vmatpush.bf16.msra.mxu1 %v3112_v2 }
 0x11d   :  { %671 = vmatpush.bf16.msra.mxu1 %v3116_v8 }
 0x121   :  { %672 = vmatpush.bf16.msra.mxu1 %v3123_v20 }
 0x191   :  { %v279_v49 = vpop.f32.mrf.mxu1 }
 0x192   :  { %v3153_v50 = vadd.f32 %v279_v49, %v4006_v48 }
 0x194   :  { %v410_v51 = vadd.f32 %v393_v36, %v3153_v50  ;;  %v3186_v36 = vor.u32 %v2591_v33, %v2436_v32 }
 0x196   :  { %v412_v52 = vmul.f32 0.5, %v410_v51  ;;  %597 = vmatpush.bf16.msrb.mxu2 %v3186_v36  ;;  %v3194_v51 = vor.u32 %v2589_v38, %v2428_v0  ;;  %v3249_v38 = vperm.slane %v322_v18, 0  ;;  %v2546_v18 = vld [vmem:[#allocation10 + $0x78] sm:$0xf0] }
 0x197   :  { %v293_v44 = vpop.f32.mrf.mxu2 }
 0x198   :  { %v3143_v45 = vadd.f32 %v293_v44, %v4007_v42  ;;  %v2430_v44 = vld [vmem:[#allocation8 + $0x18] sm:$0xf0]  ;;  %4034 = vst [vmem:[#allocation20_spill] sm:$0xff] %v3249_v38 }
 0x19a   :  { %v3146_v46 = vadd.f32 %v406_v39, %v3143_v45  ;;  %598 = vmatpush.bf16.msrb.mxu2 %v3194_v51 }
 0x19c   :  { %2632 = vtanh.f32 %v3146_v46  ;;  %v413_v62 = vmul.f32 0.5, %v3146_v46  ;;  %v3230_v46 = vpop.f32.mrf.mxu1 }
 0x19d   :  { %2634 = vtanh.f32 %v412_v52  ;;  %v3197_v52 = vor.u32 %v2588_v40, %v2430_v44  ;;  %4031 = vst [vmem:[#allocation17_spill] sm:$0xff] %v3230_v46 }
 0x19f   :  { %611 = vmatpush.bf16.msra.mxu3 %v3197_v52  ;;  %v3232_v12 = vpop.f32.mrf.mxu2 }
 0x1a0   :  { %4032 = vst [vmem:[#allocation18_spill] sm:$0xff] %v3232_v12 }
 0x1a2   :  { %v2633_v47 = vpop.eup %2632 }
 0x1a3   :  { %423 = vrot.lane.b32.xlu1 %v2633_v47, %s3017_s15  ;;  %v2635_v53 = vpop.eup %2634 }
 0x1a4   :  { %v416_v56 = vmul.f32 0.5, %v2635_v53 }
 0x1a6   :  { %v418_v57 = vadd.f32 0.5, %v416_v56  ;;  %v2420_v56 = vld [vmem:[#allocation8] sm:$0xf] }
 0x1a8   :  { %v421_v39 = vmul.f32 0.0, %v418_v57 }
 0x215   :  { %v424_v58 = vpop.permute.xlu1 %423 }
 0x216   :  { %v426_v59 = vmul.f32 %v424_v58, %v418_v57  ;;  %v2587_v57 = vld [vmem:[#allocation8 + $0x4] sm:$0xf0]  ;;  %v2586_v58 = vld [vmem:[#allocation8 + $0x4] sm:$0xf] }
 0x217   :  { %v3205_v61 = vor.u32 %v2586_v58, %v2422_v60 }
 0x218   :  { %428 = vrot.lane.b32.xlu1 %v426_v59, %s3017_s15  ;;  %v3203_v59 = vor.u32 %v2587_v57, %v2420_v56 }
 0x219   :  { %612 = vmatpush.bf16.msra.mxu3 %v3205_v61 }
 0x21a   :  { %599 = vmatpush.bf16.msrb.mxu2 %v3203_v59 }
 0x28a   :  { %v429_v47 = vpop.permute.xlu1 %428 }
 0x28b   :  { %v3191_v49 = vadd.f32 %v429_v47, %v421_v39 }
 0x28d   :  { %2636 = vtanh.f32 %v3191_v49 }
 0x28e   :  { %2638 = vtanh.f32 %v413_v62 }
 0x293   :  { %v2637_v53 = vpop.eup %2636 }
 0x294   :  { %434 = vrot.lane.b32.xlu2 %v2637_v53, %s3017_s15  ;;  %v2639_v1 = vpop.eup %2638 }
 0x295   :  { %v417_v3 = vmul.f32 0.5, %v2639_v1 }
 0x297   :  { %v419_v4 = vadd.f32 0.5, %v417_v3 }
 0x2ee   :  { %v435_v6 = vpop.permute.xlu2 %434 }
 0x2ef   :  { %v437_v7 = vmul.f32 %v435_v6, %v419_v4 }
 0x2f1   :  { %v438_v11 = vpack.c.bf16 %v437_v7, %v437_v7 }
 0x2f3   :  { %2416 = vmatmul.msk.bf16.vlgmr.msrb.gmra.mxu0 %vm380_vm2, %v438_v11  ;;  %2417 = vmatmul.msk.bf16.vlgmr.msrb.gmra.mxu1 %vm380_vm2, %v438_v11 }
 0x2f4   :  { %2482 = vmatmul.msk.bf16.vlgmr.msrb.gmra.mxu2 %vm380_vm2, %v438_v11  ;;  %2483 = vmatmul.msk.bf16.vlgmr.msra.gmra.mxu3 %vm380_vm2, %v438_v11  ;;  %v2544_v11 = vld [vmem:[#allocation10 + $0x70] sm:$0xf] }
 0x2f5   :  { %728 = vmatpush.bf16.msrb.mxu0 %v3157_v63  ;;  %741 = vmatpush.bf16.msrb.mxu1 %v3159_v5 }
 0x2f9   :  { %729 = vmatpush.bf16.msrb.mxu0 %v3162_v9  ;;  %742 = vmatpush.bf16.msrb.mxu1 %v3165_v10 }
 0x2fd   :  { %730 = vmatpush.bf16.msrb.mxu0 %v3168_v15  ;;  %743 = vmatpush.bf16.msrb.mxu1 %v3171_v16 }
 0x301   :  { %731 = vmatpush.bf16.msrb.mxu0 %v3174_v23  ;;  %744 = vmatpush.bf16.msrb.mxu1 %v3177_v24 }
 0x305   :  { %732 = vmatpush.bf16.msrb.mxu0 %v3180_v30  ;;  %745 = vmatpush.bf16.msrb.mxu1 %v3183_v31 }
 0x309   :  { %733 = vmatpush.bf16.msrb.mxu0 %v3186_v36  ;;  %746 = vmatpush.bf16.msrb.mxu1 %v3189_v37 }
 0x30d   :  { %734 = vmatpush.bf16.msrb.mxu0 %v3194_v51  ;;  %747 = vmatpush.bf16.msrb.mxu1 %v3197_v52 }
 0x311   :  { %735 = vmatpush.bf16.msrb.mxu0 %v3203_v59  ;;  %748 = vmatpush.bf16.msrb.mxu1 %v3205_v61 }
 0x370   :  { %v451_v13 = vpop.f32.mrf.mxu0  ;;  %v464_v14 = vpop.f32.mrf.mxu1 }
 0x371   :  { %v471_v17 = vrot.slane %v464_v14, 6  ;;  %v470_v47 = vrot.slane %v451_v13, 6  ;;  %v2617_v13 = vld [vmem:[#allocation10 + $0x74] sm:$0xf0]  ;;  %v2616_v14 = vld [vmem:[#allocation10 + $0x74] sm:$0xf] }
 0x373   :  { %v3238_v19 = vadd.f32 %v471_v17, %v3143_v45  ;;  %v474_v56 = vadd.f32 %v470_v47, %v3153_v50  ;;  %v3258_v17 = vor.u32 %v2617_v13, %v2544_v11  ;;  %v2608_v11 = vld [vmem:[#allocation10 + $0x34] sm:$0xf]  ;;  %v2514_v13 = vld [vmem:[#allocation10 + $0x38] sm:$0xf0] }
 0x375   :  { %2640 = vtanh.f32 %v3238_v19  ;;  %v476_v60 = vmul.f32 0.5, %v474_v56  ;;  %868 = vmatpush.bf16.msra.mxu2 %v3258_v17  ;;  %v2520_v56 = vld [vmem:[#allocation10 + $0x40] sm:$0xf] }
 0x377   :  { %v601_v25 = vpop.f32.mrf.mxu2  ;;  %v614_v26 = vpop.f32.mrf.mxu3 }
 0x378   :  { %v3244_v27 = vadd.f32 %v614_v26, %v3240_v21  ;;  %v453_v28 = vpop.f32.mrf.mxu0  ;;  %v466_v32 = vpop.f32.mrf.mxu1  ;;  %v602_v39 = vadd.f32 %v601_v25, %v3249_v38  ;;  %v2536_v25 = vld [vmem:[#allocation10 + $0x60] sm:$0xf]  ;;  %v2615_v26 = vld [vmem:[#allocation10 + $0x64] sm:$0xf0] }
 0x379   :  { %v3260_v28 = vor.u32 %v2616_v14, %v2546_v18  ;;  %v2614_v32 = vld [vmem:[#allocation10 + $0x64] sm:$0xf]  ;;  %v486_v14 = vrot.slane %v3191_v49, 6 }
 0x37a   :  { %2642 = vtanh.f32 %v3244_v27  ;;  %v618_v40 = vmul.f32 0.5, %v602_v39  ;;  %v2613_v39 = vld [vmem:[#allocation10 + $0x54] sm:$0xf0] }
 0x37b   :  { %v2641_v33 = vpop.eup %2640  ;;  %881 = vmatpush.bf16.msrb.mxu3 %v3260_v28 }
 0x37c   :  { %490 = vrot.lane.b32.xlu0 %v2641_v33, %s3017_s15  ;;  %2644 = vtanh.f32 %v618_v40  ;;  %v2538_v33 = vld [vmem:[#allocation10 + $0x68] sm:$0xf0]  ;;  %v2612_v40 = vld [vmem:[#allocation10 + $0x54] sm:$0xf] }
 0x37d   :  { %2646 = vtanh.f32 %v476_v60  ;;  %v2610_v60 = vld [vmem:[#allocation10 + $0x44] sm:$0xf] }
 0x37f   :  { %v603_v34 = vpop.f32.mrf.mxu2  ;;  %v616_v35 = vpop.f32.mrf.mxu3 }
 0x380   :  { %v2643_v0 = vpop.eup %2642  ;;  %v3263_v34 = vor.u32 %v2615_v26, %v2536_v25  ;;  %v3266_v35 = vor.u32 %v2614_v32, %v2538_v33  ;;  %v3285_v26 = vor.u32 %v2608_v11, %v2514_v13  ;;  %v2504_v32 = vld [vmem:[#allocation10 + $0x20] sm:$0xf]  ;;  %v2607_v33 = vld [vmem:[#allocation10 + $0x24] sm:$0xf0]  ;;  %v2605_v11 = vld [vmem:[#allocation10 + $0x14] sm:$0xf0] }
 0x381   :  { %629 = vrot.lane.b32.xlu2 %v2643_v0, %s3017_s15  ;;  %v2528_v0 = vld [vmem:[#allocation10 + $0x50] sm:$0xf]  ;;  %v2604_v13 = vld [vmem:[#allocation10 + $0x14] sm:$0xf] }
 0x382   :  { %v2645_v44 = vpop.eup %2644  ;;  %869 = vmatpush.bf16.msra.mxu2 %v3263_v34  ;;  %v3269_v47 = vor.u32 %v2613_v39, %v2528_v0  ;;  %882 = vmatpush.bf16.msrb.mxu3 %v3266_v35  ;;  %v2606_v39 = vld [vmem:[#allocation10 + $0x24] sm:$0xf] }
 0x383   :  { %v622_v53 = vmul.f32 0.5, %v2645_v44  ;;  %v2647_v1 = vpop.eup %2646  ;;  %v2530_v44 = vld [vmem:[#allocation10 + $0x58] sm:$0xf0] }
 0x384   :  { %v480_v3 = vmul.f32 0.5, %v2647_v1 }
 0x385   :  { %v3253_v57 = vadd.f32 0.5, %v622_v53  ;;  %v3272_v53 = vor.u32 %v2612_v40, %v2530_v44  ;;  %v2506_v40 = vld [vmem:[#allocation10 + $0x28] sm:$0xf0] }
 0x386   :  { %v482_v4 = vadd.f32 0.5, %v480_v3  ;;  %870 = vmatpush.bf16.msra.mxu2 %v3269_v47  ;;  %v3294_v49 = vor.u32 %v2606_v39, %v2506_v40  ;;  %v2490_v40 = vld [vmem:[#allocation10 + $0x8] sm:$0xf0] }
 0x387   :  { %883 = vmatpush.bf16.msrb.mxu3 %v3272_v53 }
 0x388   :  { %v488_v25 = vmul.f32 %v486_v14, %v482_v4 }
 0x3db   :  { %v630_v58 = vpop.permute.xlu2 %629 }
 0x3dc   :  { %v632_v62 = vmul.f32 %v630_v58, %v3253_v57  ;;  %v2611_v58 = vld [vmem:[#allocation10 + $0x44] sm:$0xf0] }
 0x3dd   :  { %v3275_v1 = vor.u32 %v2611_v58, %v2520_v56  ;;  %v3290_v56 = vor.u32 %v2607_v33, %v2504_v32  ;;  %v2488_v32 = vld [vmem:[#allocation10] sm:$0xf]  ;;  %v2603_v33 = vld [vmem:[#allocation10 + $0x4] sm:$0xf0] }
 0x3de   :  { %634 = vrot.lane.b32.xlu1 %v632_v62, %s3017_s15  ;;  %v2522_v62 = vld [vmem:[#allocation10 + $0x48] sm:$0xf0]  ;;  %v3310_v39 = vor.u32 %v2603_v33, %v2488_v32 }
 0x3df   :  { %v3278_v3 = vor.u32 %v2610_v60, %v2522_v62  ;;  %871 = vmatpush.bf16.msra.mxu2 %v3275_v1 }
 0x3e0   :  { %4035 = vst [vmem:[#allocation21_spill] sm:$0xff] %v3310_v39 }
 0x3e1   :  { %884 = vmatpush.bf16.msrb.mxu3 %v3278_v3 }
 0x3e5   :  { %885 = vmatpush.bf16.msrb.mxu3 %v3285_v26 }
 0x3e9   :  { %886 = vmatpush.bf16.msrb.mxu3 %v3294_v49 }
 0x3ee   :  { %v491_v6 = vpop.permute.xlu0 %490 }
 0x3ef   :  { %v493_v7 = vmul.f32 %v491_v6, %v482_v4  ;;  %v2512_v6 = vld [vmem:[#allocation10 + $0x30] sm:$0xf]  ;;  %v627_v4 = vmul.f32 0.0, %v3253_v57  ;;  %v2498_v57 = vld [vmem:[#allocation10 + $0x18] sm:$0xf0] }
 0x3f1   :  { %495 = vrot.lane.b32.xlu2 %v493_v7, %s3017_s15  ;;  %v2609_v7 = vld [vmem:[#allocation10 + $0x34] sm:$0xf0] }
 0x3f2   :  { %v3282_v18 = vor.u32 %v2609_v7, %v2512_v6  ;;  %v2496_v7 = vld [vmem:[#allocation10 + $0x10] sm:$0xf] }
 0x3f3   :  { %v3304_v14 = vor.u32 %v2605_v11, %v2496_v7 }
 0x3f4   :  { %872 = vmatpush.bf16.msra.mxu2 %v3282_v18 }
 0x3f8   :  { %873 = vmatpush.bf16.msra.mxu2 %v3290_v56 }
 0x3fc   :  { %874 = vmatpush.bf16.msra.mxu2 %v3304_v14 }
 0x400   :  { %875 = vmatpush.bf16.msra.mxu2 %v3310_v39 }
 0x404   :  { %1030 = vmatpush.bf16.msrb.mxu2 %v3157_v63 }
 0x408   :  { %1031 = vmatpush.bf16.msrb.mxu2 %v3162_v9 }
 0x40c   :  { %1032 = vmatpush.bf16.msrb.mxu2 %v3168_v15 }
 0x410   :  { %1033 = vmatpush.bf16.msrb.mxu2 %v3174_v23 }
 0x414   :  { %1034 = vmatpush.bf16.msrb.mxu2 %v3180_v30 }
 0x418   :  { %1035 = vmatpush.bf16.msrb.mxu2 %v3186_v36 }
 0x41c   :  { %1036 = vmatpush.bf16.msrb.mxu2 %v3194_v51 }
 0x420   :  { %1037 = vmatpush.bf16.msrb.mxu2 %v3203_v59 }
 0x44b   :  { %v496_v0 = vpop.permute.xlu2 %495 }
 0x44c   :  { %v3287_v44 = vadd.f32 %v496_v0, %v488_v25  ;;  %v3306_v25 = vor.u32 %v2604_v13, %v2498_v57  ;;  %v2602_v0 = vld [vmem:[#allocation10 + $0x4] sm:$0xf] }
 0x44e   :  { %2648 = vtanh.f32 %v3287_v44  ;;  %887 = vmatpush.bf16.msrb.mxu3 %v3306_v25 }
 0x450   :  { %v635_v58 = vpop.permute.xlu1 %634 }
 0x451   :  { %v3297_v60 = vadd.f32 %v635_v58, %v627_v4  ;;  %v3312_v4 = vor.u32 %v2602_v0, %v2490_v40  ;;  %v477_v58 = vmul.f32 0.5, %v3238_v19 }
 0x453   :  { %2650 = vtanh.f32 %v3297_v60  ;;  %4036 = vst [vmem:[#allocation22_spill] sm:$0xff] %v3312_v4  ;;  %888 = vmatpush.bf16.msrb.mxu3 %v3312_v4 }
 0x454   :  { %v2649_v62 = vpop.eup %2648  ;;  %2652 = vtanh.f32 %v477_v58 }
 0x455   :  { %501 = vrot.lane.b32.xlu1 %v2649_v62, %s3017_s15  ;;  %v619_v62 = vmul.f32 0.5, %v3244_v27 }
 0x457   :  { %1043 = vmatpush.bf16.msra.mxu3 %v3159_v5  ;;  %2654 = vtanh.f32 %v619_v62 }
 0x459   :  { %v2651_v6 = vpop.eup %2650 }
 0x45a   :  { %640 = vrot.lane.b32.xlu0 %v2651_v6, %s3017_s15  ;;  %v2653_v6 = vpop.eup %2652 }
 0x45b   :  { %1044 = vmatpush.bf16.msra.mxu3 %v3165_v10  ;;  %v481_v19 = vmul.f32 0.5, %v2653_v6 }
 0x45d   :  { %v2655_v7 = vpop.eup %2654  ;;  %v483_v11 = vadd.f32 0.5, %v481_v19 }
 0x45e   :  { %v623_v57 = vmul.f32 0.5, %v2655_v7 }
 0x45f   :  { %1045 = vmatpush.bf16.msra.mxu3 %v3171_v16 }
 0x460   :  { %v625_v33 = vadd.f32 0.5, %v623_v57 }
 0x463   :  { %1046 = vmatpush.bf16.msra.mxu3 %v3177_v24 }
 0x467   :  { %1047 = vmatpush.bf16.msra.mxu3 %v3183_v31 }
 0x46b   :  { %1048 = vmatpush.bf16.msra.mxu3 %v3189_v37 }
 0x46f   :  { %1049 = vmatpush.bf16.msra.mxu3 %v3197_v52 }
 0x473   :  { %1050 = vmatpush.bf16.msra.mxu3 %v3205_v61 }
 0x4c7   :  { %v502_v13 = vpop.permute.xlu1 %501 }
 0x4c8   :  { %v504_v27 = vmul.f32 %v502_v13, %v483_v11 }
 0x4ca   :  { %v644_v32 = vpack.c.bf16 %v504_v27, %v504_v27  ;;  %v339_v27 = vld [vmem:[%s4004_s8] sm:$0x3]  ;;  %s3018_s8 = smov [#allocation11]  }
 0x4cb   :  { %s2299_s18 = sshll.u32 %s3018_s8, 4  ;;  %s2300_s18 = int_to_ptr.vmem [resolvable:$true] %s2299_s18 }
 0x4cc   :  { %v646_v0 = vunpack.c.l.b16 %v644_v32  ;;  %v641_v40 = vpop.permute.xlu0 %640 }
 0x4cd   :  { %v643_v58 = vmul.f32 %v641_v40, %v625_v33  ;;  %v3373_v40 = vperm.slane %v339_v27, 1 }
 0x4ce   :  { %v647_v62 = vpack.c.b16 %v646_v0, %v646_v0 }
 0x4cf   :  { %v715_v6 = vpack.c.bf16 %v643_v58, %v643_v58  ;;  %4037 = vst [vmem:[#allocation23_spill] sm:$0xff] %v3373_v40 }
 0x4d0   :  { %v648_v48 = vrot.slane %v647_v62, 1 }
 0x4d1   :  { %2550 = vmatmul.msk.bf16.vlgmr.msra.gmra.mxu2 %vm380_vm2, %v715_v6  ;;  %2551 = vmatmul.msk.bf16.vlgmr.msrb.gmra.mxu3 %vm380_vm2, %v715_v6  ;;  %v717_v19 = vunpack.c.l.b16 %v715_v6 }
 0x4d2   :  { %2484 = vmatmul.msk.bf16.vlgmr.msra.gmra.mxu0 %vm380_vm2, %v648_v48  ;;  %2485 = vmatmul.msk.bf16.vlgmr.msra.gmra.mxu1 %vm380_vm2, %v648_v48 }
 0x4d3   :  { %v718_v7 = vpack.c.b16 %v717_v19, %v717_v19  ;;  %958 = vmatpush.bf16.msra.mxu0 %v3093_v22  ;;  %971 = vmatpush.bf16.msra.mxu1 %v3107_v55 }
 0x4d4   :  { %1182 = vmatpush.bf16.msra.mxu2 %v3093_v22  ;;  %1195 = vmatpush.bf16.msrb.mxu3 %v3107_v55 }
 0x4d5   :  { %v719_v11 = vrot.slane %v718_v7, 7 }
 0x4d7   :  { %720 = vrot.lane.b32.xlu2 %v719_v11, %s3017_s15  ;;  %959 = vmatpush.bf16.msra.mxu0 %v3096_v29 }
 0x4d8   :  { %972 = vmatpush.bf16.msra.mxu1 %v3112_v2  ;;  %1183 = vmatpush.bf16.msra.mxu2 %v3096_v29 }
 0x4d9   :  { %1196 = vmatpush.bf16.msrb.mxu3 %v3112_v2 }
 0x4db   :  { %960 = vmatpush.bf16.msra.mxu0 %v3100_v43 }
 0x4dc   :  { %973 = vmatpush.bf16.msra.mxu1 %v3116_v8  ;;  %1184 = vmatpush.bf16.msra.mxu2 %v3100_v43 }
 0x4dd   :  { %1197 = vmatpush.bf16.msrb.mxu3 %v3116_v8 }
 0x4df   :  { %961 = vmatpush.bf16.msra.mxu0 %v3104_v54 }
 0x4e0   :  { %974 = vmatpush.bf16.msra.mxu1 %v3123_v20  ;;  %1185 = vmatpush.bf16.msra.mxu2 %v3104_v54 }
 0x4e1   :  { %1198 = vmatpush.bf16.msrb.mxu3 %v3123_v20 }
 0x531   :  { %v721_v48 = vpop.permute.xlu2 %720 }
 0x532   :  { %v724_v13 = vsel %vm380_vm2, %v644_v32, %v721_v48 }
 0x533   :  { %v726_v57 = vrot.slane %v724_v13, 1 }
 0x535   :  { %736 = vmatmul.bf16.vlgmr.msrb.gmra.mxu0 %v726_v57  ;;  %749 = vmatmul.bf16.vlgmr.msrb.gmra.mxu1 %v726_v57 }
 0x536   :  { %1092 = vmatpush.bf16.msrb.mxu0 %v3258_v17  ;;  %1105 = vmatpush.bf16.msrb.mxu1 %v3260_v28 }
 0x53a   :  { %1093 = vmatpush.bf16.msrb.mxu0 %v3263_v34  ;;  %1106 = vmatpush.bf16.msrb.mxu1 %v3266_v35 }
 0x53e   :  { %1094 = vmatpush.bf16.msrb.mxu0 %v3269_v47  ;;  %1107 = vmatpush.bf16.msrb.mxu1 %v3272_v53 }
 0x542   :  { %1095 = vmatpush.bf16.msrb.mxu0 %v3275_v1  ;;  %1108 = vmatpush.bf16.msrb.mxu1 %v3278_v3 }
 0x546   :  { %1096 = vmatpush.bf16.msrb.mxu0 %v3282_v18  ;;  %1109 = vmatpush.bf16.msrb.mxu1 %v3285_v26 }
 0x54a   :  { %1097 = vmatpush.bf16.msrb.mxu0 %v3290_v56  ;;  %1110 = vmatpush.bf16.msrb.mxu1 %v3294_v49 }
 0x54e   :  { %1098 = vmatpush.bf16.msrb.mxu0 %v3304_v14  ;;  %1111 = vmatpush.bf16.msrb.mxu1 %v3306_v25 }
 0x54f   :  { %v661_v32 = vpop.f32.mrf.mxu0  ;;  %v674_v33 = vpop.f32.mrf.mxu1 }
 0x550   :  { %v681_v0 = vrot.slane %v674_v33, 4 }
 0x552   :  { %v3376_v58 = vadd.f32 %v681_v0, %v3143_v45  ;;  %1099 = vmatpush.bf16.msrb.mxu0 %v3310_v39  ;;  %1112 = vmatpush.bf16.msrb.mxu1 %v3312_v4  ;;  %v680_v0 = vrot.slane %v661_v32, 4 }
 0x554   :  { %2656 = vtanh.f32 %v3376_v58  ;;  %v877_v62 = vpop.f32.mrf.mxu2  ;;  %v890_v6 = vpop.f32.mrf.mxu3  ;;  %v684_v42 = vadd.f32 %v680_v0, %v3153_v50 }
 0x555   :  { %v3382_v19 = vadd.f32 %v890_v6, %v3373_v40 }
 0x556   :  { %v686_v46 = vmul.f32 0.5, %v684_v42 }
 0x557   :  { %2658 = vtanh.f32 %v3382_v19  ;;  %v663_v7 = vpop.f32.mrf.mxu0  ;;  %v676_v11 = vpop.f32.mrf.mxu1 }
 0x558   :  { %2660 = vtanh.f32 %v686_v46 }
 0x55a   :  { %v2657_v48 = vpop.eup %2656 }
 0x55b   :  { %700 = vrot.lane.b32.xlu2 %v2657_v48, %s3017_s15 }
 0x55c   :  { %v879_v13 = vpop.f32.mrf.mxu2  ;;  %v892_v57 = vpop.f32.mrf.mxu3 }
 0x55d   :  { %v2659_v33 = vpop.eup %2658  ;;  %v3392_v13 = vperm.slane %v339_v27, 0  ;;  %v696_v27 = vrot.slane %v3287_v44, 6 }
 0x55e   :  { %905 = vrot.lane.b32.xlu0 %v2659_v33, %s3017_s15  ;;  %v2661_v12 = vpop.eup %2660 }
 0x55f   :  { %v690_v6 = vmul.f32 0.5, %v2661_v12  ;;  %4038 = vst [vmem:[#allocation24_spill] sm:$0xff] %v3392_v13  ;;  %v878_v32 = vadd.f32 %v877_v62, %v3392_v13 }
 0x561   :  { %v692_v11 = vadd.f32 0.5, %v690_v6  ;;  %v894_v12 = vmul.f32 0.5, %v878_v32 }
 0x5b2   :  { %v737_v41 = vpop.f32.mrf.mxu0  ;;  %v750_v4 = vpop.f32.mrf.mxu1 }
 0x5b3   :  { %v3389_v7 = vadd.f32 %v750_v4, %v3240_v21  ;;  %v738_v62 = vadd.f32 %v737_v41, %v3249_v38  ;;  %v687_v41 = vmul.f32 0.5, %v3376_v58 }
 0x5b5   :  { %2662 = vtanh.f32 %v3389_v7  ;;  %v701_v48 = vpop.permute.xlu2 %700  ;;  %v754_v32 = vmul.f32 0.5, %v738_v62 }
 0x5b6   :  { %v703_v57 = vmul.f32 %v701_v48, %v692_v11  ;;  %2664 = vtanh.f32 %v894_v12  ;;  %v698_v48 = vmul.f32 %v696_v27, %v692_v11 }
 0x5b8   :  { %705 = vrot.lane.b32.xlu2 %v703_v57, %s3017_s15 }
 0x5ba   :  { %v739_v42 = vpop.f32.mrf.mxu0  ;;  %v752_v46 = vpop.f32.mrf.mxu1 }
 0x5bb   :  { %v2663_v33 = vpop.eup %2662 }
 0x5bc   :  { %765 = vrot.lane.b32.xlu1 %v2663_v33, %s3017_s15  ;;  %v2665_v4 = vpop.eup %2664 }
 0x5bd   :  { %v898_v0 = vmul.f32 0.5, %v2665_v4 }
 0x5bf   :  { %v900_v6 = vadd.f32 0.5, %v898_v0 }
 0x5c1   :  { %v903_v44 = vmul.f32 0.0, %v900_v6 }
 0x5d0   :  { %v906_v21 = vpop.permute.xlu0 %905 }
 0x5d1   :  { %v908_v39 = vmul.f32 %v906_v21, %v900_v6 }
 0x5d3   :  { %910 = vrot.lane.b32.xlu0 %v908_v39, %s3017_s15 }
 0x612   :  { %v706_v57 = vpop.permute.xlu2 %705 }
 0x613   :  { %v3399_v40 = vadd.f32 %v706_v57, %v698_v48 }
 0x615   :  { %2666 = vtanh.f32 %v3399_v40 }
 0x616   :  { %2668 = vtanh.f32 %v754_v32 }
 0x61b   :  { %v2667_v42 = vpop.eup %2666 }
 0x61c   :  { %711 = vrot.lane.b32.xlu2 %v2667_v42, %s3017_s15  ;;  %v2669_v46 = vpop.eup %2668 }
 0x61d   :  { %v758_v33 = vmul.f32 0.5, %v2669_v46 }
 0x61f   :  { %v760_v21 = vadd.f32 0.5, %v758_v33 }
 0x621   :  { %v763_v58 = vmul.f32 %v760_v21, %v3297_v60 }
 0x62e   :  { %v766_v12 = vpop.permute.xlu1 %765 }
 0x62f   :  { %v768_v39 = vmul.f32 %v766_v12, %v760_v21 }
 0x631   :  { %770 = vrot.lane.b32.xlu1 %v768_v39, %s3017_s15 }
 0x645   :  { %v911_v11 = vpop.permute.xlu0 %910 }
 0x646   :  { %v3405_v4 = vadd.f32 %v911_v11, %v903_v44  ;;  %v895_v11 = vmul.f32 0.5, %v3382_v19  ;;  %v755_v19 = vmul.f32 0.5, %v3389_v7 }
 0x648   :  { %2670 = vtanh.f32 %v3405_v4 }
 0x649   :  { %2672 = vtanh.f32 %v687_v41 }
 0x64e   :  { %v2671_v0 = vpop.eup %2670 }
 0x64f   :  { %916 = vrot.lane.b32.xlu0 %v2671_v0, %s3017_s15  ;;  %v2673_v27 = vpop.eup %2672 }
 0x650   :  { %v691_v48 = vmul.f32 0.5, %v2673_v27 }
 0x652   :  { %v693_v57 = vadd.f32 0.5, %v691_v48 }
 0x676   :  { %v712_v62 = vpop.permute.xlu2 %711 }
 0x677   :  { %v714_v42 = vmul.f32 %v712_v62, %v693_v57 }
 0x679   :  { %v3410_v32 = vpack.c.bf16 %v714_v42, %v714_v42 }
 0x67b   :  { %v948_v6 = vunpack.c.l.b16 %v3410_v32 }
 0x67d   :  { %v949_v46 = vpack.c.b16 %v948_v6, %v948_v6 }
 0x67f   :  { %v950_v33 = vrot.slane %v949_v46, 2 }
 0x681   :  { %2552 = vmatmul.msk.bf16.vlgmr.msra.gmra.mxu0 %vm380_vm2, %v950_v33  ;;  %2553 = vmatmul.msk.bf16.vlgmr.msra.gmra.mxu1 %vm380_vm2, %v950_v33 }
 0x682   :  { %1248 = vmatpush.bf16.msra.mxu0 %v3157_v63  ;;  %1261 = vmatpush.bf16.msra.mxu1 %v3159_v5 }
 0x686   :  { %1249 = vmatpush.bf16.msra.mxu0 %v3162_v9  ;;  %1262 = vmatpush.bf16.msra.mxu1 %v3165_v10 }
 0x68a   :  { %1250 = vmatpush.bf16.msra.mxu0 %v3168_v15  ;;  %1263 = vmatpush.bf16.msra.mxu1 %v3171_v16 }
 0x68e   :  { %1251 = vmatpush.bf16.msra.mxu0 %v3174_v23  ;;  %1264 = vmatpush.bf16.msra.mxu1 %v3177_v24 }
 0x692   :  { %1252 = vmatpush.bf16.msra.mxu0 %v3180_v30  ;;  %1265 = vmatpush.bf16.msra.mxu1 %v3183_v31 }
 0x696   :  { %1253 = vmatpush.bf16.msra.mxu0 %v3186_v36  ;;  %1266 = vmatpush.bf16.msra.mxu1 %v3189_v37 }
 0x69a   :  { %1254 = vmatpush.bf16.msra.mxu0 %v3194_v51  ;;  %1267 = vmatpush.bf16.msra.mxu1 %v3197_v52 }
 0x69e   :  { %1255 = vmatpush.bf16.msra.mxu0 %v3203_v59  ;;  %1268 = vmatpush.bf16.msra.mxu1 %v3205_v61 }
 0x6a3   :  { %v771_v12 = vpop.permute.xlu1 %770 }
 0x6a4   :  { %v3432_v39 = vadd.f32 %v771_v12, %v763_v58 }
 0x6a6   :  { %2674 = vtanh.f32 %v3432_v39 }
 0x6a7   :  { %2676 = vtanh.f32 %v895_v11 }
 0x6a8   :  { %2678 = vtanh.f32 %v755_v19 }
 0x6ac   :  { %v2675_v44 = vpop.eup %2674 }
 0x6ad   :  { %776 = vrot.lane.b32.xlu1 %v2675_v44, %s3017_s15  ;;  %v2677_v0 = vpop.eup %2676 }
 0x6ae   :  { %v899_v41 = vmul.f32 0.5, %v2677_v0  ;;  %v2679_v58 = vpop.eup %2678 }
 0x6af   :  { %v759_v12 = vmul.f32 0.5, %v2679_v58 }
 0x6b0   :  { %v901_v27 = vadd.f32 0.5, %v899_v41 }
 0x6b1   :  { %v761_v44 = vadd.f32 0.5, %v759_v12 }
 0x6c1   :  { %v917_v48 = vpop.permute.xlu0 %916 }
 0x6c2   :  { %v3437_v57 = vmul.f32 %v917_v48, %v901_v27 }
 0x6c4   :  { %4039 = vst [vmem:[#allocation25_spill] sm:$0xff] %v3437_v57  ;;  %v1082_v60 = vpack.c.bf16 %v3437_v57, %v3437_v57 }
 0x6c6   :  { %v1084_v21 = vunpack.c.l.b16 %v1082_v60 }
 0x6c8   :  { %v1085_v62 = vpack.c.b16 %v1084_v21, %v1084_v21 }
 0x6ca   :  { %1086 = vrot.lane.b32.xlu0 %v1085_v62, %s3017_s15 }
 0x6fe   :  { %v963_v42 = vpop.f32.mrf.mxu0  ;;  %v976_v6 = vpop.f32.mrf.mxu1 }
 0x6ff   :  { %v983_v27 = vrot.slane %v976_v6, 2 }
 0x701   :  { %v3444_v60 = vadd.f32 %v983_v27, %v3143_v45  ;;  %v982_v45 = vrot.slane %v963_v42, 2 }
 0x703   :  { %2680 = vtanh.f32 %v3444_v60 }
 0x706   :  { %v965_v46 = vpop.f32.mrf.mxu0  ;;  %v978_v33 = vpop.f32.mrf.mxu1 }
 0x709   :  { %v2681_v62 = vpop.eup %2680 }
 0x71f   :  { %v777_v11 = vpop.permute.xlu1 %776 }
 0x720   :  { %v779_v0 = vmul.f32 %v777_v11, %v761_v44 }
 0x722   :  { %v1017_v41 = vpack.c.bf16 %v779_v0, %v779_v0 }
 0x724   :  { %v1019_v48 = vunpack.c.l.b16 %v1017_v41 }
 0x726   :  { %v1020_v57 = vpack.c.b16 %v1019_v48, %v1019_v48  ;;  %v4041_v48 = vld [vmem:[#allocation21_spill] sm:$0xff] }
 0x728   :  { %v1021_v21 = vrot.slane %v1020_v57, 6  ;;  %v986_v57 = vadd.f32 %v982_v45, %v3153_v50 }
 0x72a   :  { %1022 = vrot.lane.b32.xlu1 %v1021_v21, %s3017_s15  ;;  %v988_v6 = vmul.f32 0.5, %v986_v57  ;;  %v4042_v21 = vld [vmem:[#allocation22_spill] sm:$0xff] }
 0x72c   :  { %2682 = vtanh.f32 %v988_v6  ;;  %v998_v6 = vrot.slane %v3399_v40, 6 }
 0x732   :  { %1002 = vrot.lane.b32.xlu1 %v2681_v62, %s3017_s15  ;;  %v2683_v33 = vpop.eup %2682 }
 0x733   :  { %v992_v44 = vmul.f32 0.5, %v2683_v33 }
 0x735   :  { %v994_v11 = vadd.f32 0.5, %v992_v44 }
 0x73c   :  { %v1087_v7 = vpop.permute.xlu0 %1086 }
 0x73d   :  { %v1090_v46 = vsel %vm380_vm2, %v1017_v41, %v1087_v7  ;;  %v4040_v41 = vld [vmem:[#allocation23_spill] sm:$0xff] }
 0x73e   :  { %1100 = vmatmul.bf16.vlgmr.msrb.gmra.mxu0 %v1090_v46  ;;  %1113 = vmatmul.bf16.vlgmr.msrb.gmra.mxu1 %v1090_v46 }
 0x73f   :  { %1396 = vmatpush.bf16.msrb.mxu0 %v3093_v22  ;;  %1409 = vmatpush.bf16.msrb.mxu1 %v3107_v55 }
 0x743   :  { %1397 = vmatpush.bf16.msrb.mxu0 %v3096_v29  ;;  %1410 = vmatpush.bf16.msrb.mxu1 %v3112_v2 }
 0x747   :  { %1398 = vmatpush.bf16.msrb.mxu0 %v3100_v43  ;;  %1411 = vmatpush.bf16.msrb.mxu1 %v3116_v8 }
 0x74b   :  { %1399 = vmatpush.bf16.msrb.mxu0 %v3104_v54  ;;  %1412 = vmatpush.bf16.msrb.mxu1 %v3123_v20 }
 0x79c   :  { %v1023_v19 = vpop.permute.xlu1 %1022 }
 0x79d   :  { %v1026_v58 = vsel %vm380_vm2, %v3410_v32, %v1023_v19  ;;  %v1000_v19 = vmul.f32 %v998_v6, %v994_v11 }
 0x79e   :  { %v1028_v12 = vrot.slane %v1026_v58, 2 }
 0x7a0   :  { %1038 = vmatmul.bf16.vlgmr.msrb.gmra.mxu2 %v1028_v12  ;;  %1051 = vmatmul.bf16.vlgmr.msra.gmra.mxu3 %v1028_v12 }
 0x7a1   :  { %1310 = vmatpush.bf16.msrb.mxu2 %v3258_v17  ;;  %1323 = vmatpush.bf16.msra.mxu3 %v3260_v28 }
 0x7a4   :  { %v1003_v0 = vpop.permute.xlu1 %1002 }
 0x7a5   :  { %v1005_v42 = vmul.f32 %v1003_v0, %v994_v11  ;;  %1311 = vmatpush.bf16.msrb.mxu2 %v3263_v34  ;;  %1324 = vmatpush.bf16.msra.mxu3 %v3266_v35 }
 0x7a7   :  { %1007 = vrot.lane.b32.xlu1 %v1005_v42, %s3017_s15 }
 0x7a9   :  { %1312 = vmatpush.bf16.msrb.mxu2 %v3269_v47  ;;  %1325 = vmatpush.bf16.msra.mxu3 %v3272_v53 }
 0x7ad   :  { %1313 = vmatpush.bf16.msrb.mxu2 %v3275_v1  ;;  %1326 = vmatpush.bf16.msra.mxu3 %v3278_v3 }
 0x7b1   :  { %1314 = vmatpush.bf16.msrb.mxu2 %v3282_v18  ;;  %1327 = vmatpush.bf16.msra.mxu3 %v3285_v26 }
 0x7b5   :  { %1315 = vmatpush.bf16.msrb.mxu2 %v3290_v56  ;;  %1328 = vmatpush.bf16.msra.mxu3 %v3294_v49 }
 0x7b9   :  { %1316 = vmatpush.bf16.msrb.mxu2 %v3304_v14  ;;  %1329 = vmatpush.bf16.msra.mxu3 %v3306_v25 }
 0x7bb   :  { %v1101_v50 = vpop.f32.mrf.mxu0  ;;  %v1114_v32 = vpop.f32.mrf.mxu1 }
 0x7bc   :  { %v3477_v27 = vadd.f32 %v1114_v32, %v4040_v41  ;;  %v1102_v45 = vadd.f32 %v1101_v50, %v3392_v13 }
 0x7bd   :  { %1317 = vmatpush.bf16.msrb.mxu2 %v4041_v48  ;;  %1330 = vmatpush.bf16.msra.mxu3 %v4042_v21 }
 0x7be   :  { %2684 = vtanh.f32 %v3477_v27  ;;  %v1118_v57 = vmul.f32 0.5, %v1102_v45 }
 0x7c0   :  { %2686 = vtanh.f32 %v1118_v57 }
 0x7c3   :  { %v1103_v62 = vpop.f32.mrf.mxu0  ;;  %v1116_v7 = vpop.f32.mrf.mxu1 }
 0x7c4   :  { %v2685_v46 = vpop.eup %2684 }
 0x7c5   :  { %1129 = vrot.lane.b32.xlu2 %v2685_v46, %s3017_s15  ;;  %v4043_v46 = vld [vmem:[#allocation19_spill] sm:$0xff] }
 0x7c6   :  { %v2687_v33 = vpop.eup %2686 }
 0x7c7   :  { %v1122_v44 = vmul.f32 0.5, %v2687_v33 }
 0x7c9   :  { %v1124_v0 = vadd.f32 0.5, %v1122_v44 }
 0x7cb   :  { %v1127_v6 = vmul.f32 %v1124_v0, %v3405_v4 }
 0x819   :  { %v1008_v58 = vpop.permute.xlu1 %1007 }
 0x81a   :  { %v3485_v12 = vadd.f32 %v1008_v58, %v1000_v19  ;;  %v989_v58 = vmul.f32 0.5, %v3444_v60 }
 0x81c   :  { %2688 = vtanh.f32 %v3485_v12 }
 0x81f   :  { %v1130_v42 = vpop.permute.xlu2 %1129 }
 0x820   :  { %v1132_v32 = vmul.f32 %v1130_v42, %v1124_v0 }
 0x822   :  { %v2689_v62 = vpop.eup %2688  ;;  %1134 = vrot.lane.b32.xlu2 %v1132_v32, %s3017_s15 }
 0x823   :  { %v1039_v7 = vpop.f32.mrf.mxu2  ;;  %v1052_v50 = vpop.f32.mrf.mxu3  ;;  %1013 = vrot.lane.b32.xlu1 %v2689_v62, %s3017_s15 }
 0x824   :  { %v3491_v40 = vadd.f32 %v1052_v50, %v4043_v46  ;;  %v1040_v42 = vadd.f32 %v1039_v7, %v3249_v38  ;;  %v1119_v7 = vmul.f32 0.5, %v3477_v27 }
 0x826   :  { %2690 = vtanh.f32 %v3491_v40  ;;  %v1056_v62 = vmul.f32 0.5, %v1040_v42 }
 0x82b   :  { %v1041_v11 = vpop.f32.mrf.mxu2  ;;  %v1054_v45 = vpop.f32.mrf.mxu3 }
 0x82c   :  { %v2691_v57 = vpop.eup %2690 }
 0x82d   :  { %1067 = vrot.lane.b32.xlu0 %v2691_v57, %s3017_s15 }
 0x87c   :  { %v1135_v33 = vpop.permute.xlu2 %1134 }
 0x87d   :  { %v3496_v19 = vadd.f32 %v1135_v33, %v1127_v6 }
 0x87f   :  { %4044 = vst [vmem:[#allocation23_spill] sm:$0xff] %v3496_v19  ;;  %2692 = vtanh.f32 %v3496_v19 }
 0x880   :  { %2694 = vtanh.f32 %v989_v58 }
 0x881   :  { %2696 = vtanh.f32 %v1056_v62 }
 0x882   :  { %2698 = vtanh.f32 %v1119_v7 }
 0x885   :  { %v2693_v44 = vpop.eup %2692 }
 0x886   :  { %1140 = vrot.lane.b32.xlu2 %v2693_v44, %s3017_s15  ;;  %v2695_v32 = vpop.eup %2694 }
 0x887   :  { %v993_v50 = vmul.f32 0.5, %v2695_v32  ;;  %v2697_v0 = vpop.eup %2696 }
 0x888   :  { %v1060_v33 = vmul.f32 0.5, %v2697_v0 }
 0x889   :  { %v995_v11 = vadd.f32 0.5, %v993_v50 }
 0x88a   :  { %v1062_v46 = vadd.f32 0.5, %v1060_v33 }
 0x88c   :  { %v1065_v0 = vmul.f32 %v1062_v46, %v3432_v39 }
 0x895   :  { %v1014_v45 = vpop.permute.xlu1 %1013 }
 0x896   :  { %v1016_v4 = vmul.f32 %v1014_v45, %v995_v11 }
 0x898   :  { %v3502_v57 = vpack.c.bf16 %v1016_v4, %v1016_v4 }
 0x89a   :  { %v1172_v6 = vunpack.c.l.b16 %v3502_v57 }
 0x89c   :  { %v1173_v60 = vpack.c.b16 %v1172_v6, %v1172_v6 }
 0x89e   :  { %v1174_v19 = vrot.slane %v1173_v60, 3 }
 0x89f   :  { %v1068_v44 = vpop.permute.xlu0 %1067 }
 0x8a0   :  { %v1070_v58 = vmul.f32 %v1068_v44, %v1062_v46  ;;  %2554 = vmatmul.msk.bf16.vlgmr.msra.gmra.mxu2 %vm380_vm2, %v1174_v19  ;;  %2555 = vmatmul.msk.bf16.vlgmr.msrb.gmra.mxu3 %vm380_vm2, %v1174_v19  ;;  %v2699_v19 = vpop.eup %2698 }
 0x8a1   :  { %1464 = vmatpush.bf16.msra.mxu2 %v3157_v63  ;;  %1477 = vmatpush.bf16.msrb.mxu3 %v3159_v5  ;;  %v1123_v42 = vmul.f32 0.5, %v2699_v19  ;;  %v1057_v19 = vmul.f32 0.5, %v3491_v40 }
 0x8a2   :  { %1072 = vrot.lane.b32.xlu0 %v1070_v58, %s3017_s15 }
 0x8a3   :  { %v1125_v32 = vadd.f32 0.5, %v1123_v42 }
 0x8a5   :  { %1465 = vmatpush.bf16.msra.mxu2 %v3162_v9  ;;  %1478 = vmatpush.bf16.msrb.mxu3 %v3165_v10 }
 0x8a9   :  { %1466 = vmatpush.bf16.msra.mxu2 %v3168_v15  ;;  %1479 = vmatpush.bf16.msrb.mxu3 %v3171_v16 }
 0x8ad   :  { %1467 = vmatpush.bf16.msra.mxu2 %v3174_v23  ;;  %1480 = vmatpush.bf16.msrb.mxu3 %v3177_v24 }
 0x8b1   :  { %1468 = vmatpush.bf16.msra.mxu2 %v3180_v30  ;;  %1481 = vmatpush.bf16.msrb.mxu3 %v3183_v31 }
 0x8b5   :  { %1469 = vmatpush.bf16.msra.mxu2 %v3186_v36  ;;  %1482 = vmatpush.bf16.msrb.mxu3 %v3189_v37 }
 0x8b9   :  { %1470 = vmatpush.bf16.msra.mxu2 %v3194_v51  ;;  %1483 = vmatpush.bf16.msrb.mxu3 %v3197_v52 }
 0x8bd   :  { %1471 = vmatpush.bf16.msra.mxu2 %v3203_v59  ;;  %1484 = vmatpush.bf16.msrb.mxu3 %v3205_v61 }
 0x8e0   :  { %v1141_v62 = vpop.permute.xlu2 %1140 }
 0x8e1   :  { %v3525_v50 = vmul.f32 %v1141_v62, %v1125_v32 }
 0x8e3   :  { %4045 = vst [vmem:[#allocation21_spill] sm:$0xff] %v3525_v50  ;;  %v1300_v11 = vpack.c.bf16 %v3525_v50, %v3525_v50 }
 0x8e5   :  { %v1302_v45 = vunpack.c.l.b16 %v1300_v11 }
 0x8e7   :  { %v1303_v4 = vpack.c.b16 %v1302_v45, %v1302_v45 }
 0x8e9   :  { %1304 = vrot.lane.b32.xlu2 %v1303_v4, %s3017_s15 }
 0x914   :  { %v1073_v6 = vpop.permute.xlu0 %1072 }
 0x915   :  { %v3531_v33 = vadd.f32 %v1073_v6, %v1065_v0  ;;  %v4047_v6 = vld [vmem:[#allocation16_spill] sm:$0xff] }
 0x916   :  { %v4048_v50 = vperm.slane %v4047_v6, 1 }
 0x917   :  { %4046 = vst [vmem:[#allocation22_spill] sm:$0xff] %v3531_v33  ;;  %2700 = vtanh.f32 %v3531_v33 }
 0x918   :  { %2702 = vtanh.f32 %v1057_v19  ;;  %v4051_v19 = vld [vmem:[#allocation17_spill] sm:$0xff] }
 0x91d   :  { %v2701_v27 = vpop.eup %2700 }
 0x91e   :  { %1078 = vrot.lane.b32.xlu0 %v2701_v27, %s3017_s15  ;;  %v2703_v42 = vpop.eup %2702  ;;  %v4049_v27 = vld [vmem:[#allocation18_spill] sm:$0xff] }
 0x91f   :  { %v1061_v32 = vmul.f32 0.5, %v2703_v42  ;;  %v3540_v33 = vadd.f32 %v4049_v27, %v4048_v50 }
 0x921   :  { %v1063_v62 = vadd.f32 0.5, %v1061_v32 }
 0x923   :  { %v1187_v60 = vpop.f32.mrf.mxu2  ;;  %v1200_v44 = vpop.f32.mrf.mxu3 }
 0x924   :  { %v3545_v40 = vadd.f32 %v1200_v44, %v3540_v33  ;;  %v4050_v44 = vperm.slane %v4047_v6, 0 }
 0x926   :  { %2704 = vtanh.f32 %v3545_v40  ;;  %v3559_v42 = vadd.f32 %v4051_v19, %v4050_v44 }
 0x928   :  { %v1204_v32 = vadd.f32 %v1187_v60, %v3559_v42 }
 0x92b   :  { %v1189_v58 = vpop.f32.mrf.mxu2  ;;  %v1202_v7 = vpop.f32.mrf.mxu3 }
 0x92c   :  { %v2705_v50 = vpop.eup %2704 }
 0x943   :  { %v1305_v45 = vpop.permute.xlu2 %1304 }
 0x990   :  { %v1079_v11 = vpop.permute.xlu0 %1078 }
 0x991   :  { %v1081_v39 = vmul.f32 %v1079_v11, %v1063_v62  ;;  %v1206_v62 = vmul.f32 0.5, %v1204_v32 }
 0x993   :  { %v1235_v46 = vpack.c.bf16 %v1081_v39, %v1081_v39  ;;  %2706 = vtanh.f32 %v1206_v62  ;;  %v1216_v62 = vrot.slane %v3485_v12, 6 }
 0x995   :  { %v1237_v4 = vunpack.c.l.b16 %v1235_v46  ;;  %v1308_v0 = vsel %vm380_vm2, %v1235_v46, %v1305_v45 }
 0x996   :  { %1318 = vmatmul.bf16.vlgmr.msrb.gmra.mxu2 %v1308_v0  ;;  %1331 = vmatmul.bf16.vlgmr.msra.gmra.mxu3 %v1308_v0 }
 0x997   :  { %v1238_v58 = vpack.c.b16 %v1237_v4, %v1237_v4  ;;  %1616 = vmatpush.bf16.msrb.mxu2 %v3093_v22  ;;  %1629 = vmatpush.bf16.msra.mxu3 %v3107_v55 }
 0x999   :  { %v1239_v7 = vrot.slane %v1238_v58, 5  ;;  %v2707_v11 = vpop.eup %2706 }
 0x99a   :  { %v1210_v4 = vmul.f32 0.5, %v2707_v11 }
 0x99b   :  { %1240 = vrot.lane.b32.xlu0 %v1239_v7, %s3017_s15  ;;  %1617 = vmatpush.bf16.msrb.mxu2 %v3096_v29 }
 0x99c   :  { %1630 = vmatpush.bf16.msra.mxu3 %v3112_v2  ;;  %v1212_v0 = vadd.f32 0.5, %v1210_v4 }
 0x99e   :  { %v1218_v11 = vmul.f32 %v1216_v62, %v1212_v0 }
 0x99f   :  { %1618 = vmatpush.bf16.msrb.mxu2 %v3100_v43 }
 0x9a0   :  { %1631 = vmatpush.bf16.msra.mxu3 %v3116_v8 }
 0x9a3   :  { %1220 = vrot.lane.b32.xlu0 %v2705_v50, %s3017_s15  ;;  %1619 = vmatpush.bf16.msrb.mxu2 %v3104_v54 }
 0x9a4   :  { %1632 = vmatpush.bf16.msra.mxu3 %v3123_v20 }
 0xa0d   :  { %v1241_v39 = vpop.permute.xlu0 %1240 }
 0xa0e   :  { %v1244_v46 = vsel %vm380_vm2, %v3502_v57, %v1241_v39 }
 0xa0f   :  { %v1246_v45 = vrot.slane %v1244_v46, 3 }
 0xa11   :  { %1256 = vmatmul.bf16.vlgmr.msra.gmra.mxu0 %v1246_v45  ;;  %1269 = vmatmul.bf16.vlgmr.msra.gmra.mxu1 %v1246_v45 }
 0xa12   :  { %1526 = vmatpush.bf16.msra.mxu0 %v3258_v17  ;;  %1539 = vmatpush.bf16.msra.mxu1 %v3260_v28 }
 0xa15   :  { %v1221_v6 = vpop.permute.xlu0 %1220 }
 0xa16   :  { %v1223_v27 = vmul.f32 %v1221_v6, %v1212_v0  ;;  %1527 = vmatpush.bf16.msra.mxu0 %v3263_v34  ;;  %1540 = vmatpush.bf16.msra.mxu1 %v3266_v35 }
 0xa18   :  { %1225 = vrot.lane.b32.xlu0 %v1223_v27, %s3017_s15  ;;  %v4052_v27 = vld [vmem:[#allocation19_spill] sm:$0xff] }
 0xa19   :  { %v1319_v60 = vpop.f32.mrf.mxu2  ;;  %v1332_v58 = vpop.f32.mrf.mxu3 }
 0xa1a   :  { %v3570_v57 = vadd.f32 %v1332_v58, %v4040_v41  ;;  %1528 = vmatpush.bf16.msra.mxu0 %v3269_v47  ;;  %1541 = vmatpush.bf16.msra.mxu1 %v3272_v53  ;;  %v1320_v19 = vadd.f32 %v1319_v60, %v3392_v13 }
 0xa1c   :  { %2708 = vtanh.f32 %v3570_v57  ;;  %v1336_v32 = vmul.f32 0.5, %v1320_v19 }
 0xa1e   :  { %1529 = vmatpush.bf16.msra.mxu0 %v3275_v1  ;;  %1542 = vmatpush.bf16.msra.mxu1 %v3278_v3  ;;  %2710 = vtanh.f32 %v1336_v32 }
 0xa21   :  { %v1321_v7 = vpop.f32.mrf.mxu2  ;;  %v1334_v50 = vpop.f32.mrf.mxu3 }
 0xa22   :  { %v2709_v44 = vpop.eup %2708  ;;  %1530 = vmatpush.bf16.msra.mxu0 %v3282_v18  ;;  %1543 = vmatpush.bf16.msra.mxu1 %v3285_v26 }
 0xa23   :  { %1347 = vrot.lane.b32.xlu1 %v2709_v44, %s3017_s15 }
 0xa24   :  { %v2711_v45 = vpop.eup %2710 }
 0xa25   :  { %v1340_v7 = vmul.f32 0.5, %v2711_v45 }
 0xa26   :  { %1531 = vmatpush.bf16.msra.mxu0 %v3290_v56  ;;  %1544 = vmatpush.bf16.msra.mxu1 %v3294_v49 }
 0xa27   :  { %v1342_v12 = vadd.f32 0.5, %v1340_v7  ;;  %v1207_v7 = vmul.f32 0.5, %v3545_v40  ;;  %v4054_v40 = vld [vmem:[#allocation22_spill] sm:$0xff] }
 0xa2a   :  { %1532 = vmatpush.bf16.msra.mxu0 %v3304_v14  ;;  %1545 = vmatpush.bf16.msra.mxu1 %v3306_v25 }
 0xa2e   :  { %1533 = vmatpush.bf16.msra.mxu0 %v4041_v48  ;;  %1546 = vmatpush.bf16.msra.mxu1 %v4042_v21 }
 0xa8a   :  { %v1226_v39 = vpop.permute.xlu0 %1225 }
 0xa8b   :  { %v3588_v46 = vadd.f32 %v1226_v39, %v1218_v11 }
 0xa8d   :  { %2712 = vtanh.f32 %v3588_v46 }
 0xa8e   :  { %v1257_v4 = vpop.f32.mrf.mxu0  ;;  %v1270_v6 = vpop.f32.mrf.mxu1 }
 0xa8f   :  { %v3592_v58 = vadd.f32 %v1270_v6, %v4052_v27  ;;  %v1258_v62 = vadd.f32 %v1257_v4, %v3249_v38  ;;  %v4053_v4 = vld [vmem:[#allocation23_spill] sm:$0xff] }
 0xa91   :  { %2714 = vtanh.f32 %v3592_v58  ;;  %v1274_v11 = vmul.f32 0.5, %v1258_v62  ;;  %v1345_v62 = vmul.f32 %v1342_v12, %v4053_v4 }
 0xa93   :  { %v2713_v60 = vpop.eup %2712  ;;  %2716 = vtanh.f32 %v1274_v11 }
 0xa94   :  { %1231 = vrot.lane.b32.xlu0 %v2713_v60, %s3017_s15  ;;  %2718 = vtanh.f32 %v1207_v7  ;;  %v1337_v7 = vmul.f32 0.5, %v3570_v57 }
 0xa95   :  { %v1348_v50 = vpop.permute.xlu1 %1347 }
 0xa96   :  { %v1350_v0 = vmul.f32 %v1348_v50, %v1342_v12  ;;  %v1259_v44 = vpop.f32.mrf.mxu0  ;;  %v1272_v19 = vpop.f32.mrf.mxu1 }
 0xa97   :  { %v2715_v32 = vpop.eup %2714 }
 0xa98   :  { %1285 = vrot.lane.b32.xlu2 %v2715_v32, %s3017_s15  ;;  %1352 = vrot.lane.b32.xlu1 %v1350_v0, %s3017_s15 }
 0xa99   :  { %v2717_v39 = vpop.eup %2716 }
 0xa9a   :  { %v1278_v45 = vmul.f32 0.5, %v2717_v39  ;;  %v2719_v60 = vpop.eup %2718 }
 0xa9b   :  { %v1211_v50 = vmul.f32 0.5, %v2719_v60 }
 0xa9c   :  { %v1280_v6 = vadd.f32 0.5, %v1278_v45 }
 0xa9d   :  { %v1213_v44 = vadd.f32 0.5, %v1211_v50 }
 0xaf2   :  { %v1286_v13 = vpop.permute.xlu2 %1285 }
 0xaf3   :  { %v1288_v27 = vmul.f32 %v1286_v13, %v1280_v6 }
 0xaf5   :  { %1290 = vrot.lane.b32.xlu2 %v1288_v27, %s3017_s15  ;;  %v1283_v27 = vmul.f32 %v1280_v6, %v4054_v40 }
 0xb06   :  { %v1232_v19 = vpop.permute.xlu0 %1231 }
 0xb07   :  { %v1234_v32 = vmul.f32 %v1232_v19, %v1213_v44 }
 0xb09   :  { %v3601_v0 = vpack.c.bf16 %v1234_v32, %v1234_v32 }
 0xb0a   :  { %v1353_v11 = vpop.permute.xlu1 %1352 }
 0xb0b   :  { %v3604_v38 = vadd.f32 %v1353_v11, %v1345_v62  ;;  %2556 = vmatmul.msk.bf16.vlgmr.msrb.gmra.mxu0 %vm380_vm2, %v3601_v0  ;;  %2557 = vmatmul.msk.bf16.vlgmr.msrb.gmra.mxu1 %vm380_vm2, %v3601_v0 }
 0xb0c   :  { %1688 = vmatpush.bf16.msrb.mxu0 %v3157_v63  ;;  %1701 = vmatpush.bf16.msrb.mxu1 %v3159_v5 }
 0xb0d   :  { %2720 = vtanh.f32 %v3604_v38 }
 0xb10   :  { %1689 = vmatpush.bf16.msrb.mxu0 %v3162_v9  ;;  %1702 = vmatpush.bf16.msrb.mxu1 %v3165_v10 }
 0xb13   :  { %v2721_v13 = vpop.eup %2720 }
 0xb14   :  { %1358 = vrot.lane.b32.xlu1 %v2721_v13, %s3017_s15  ;;  %1690 = vmatpush.bf16.msrb.mxu0 %v3168_v15 }
 0xb15   :  { %1703 = vmatpush.bf16.msrb.mxu1 %v3171_v16 }
 0xb18   :  { %1691 = vmatpush.bf16.msrb.mxu0 %v3174_v23 }
 0xb19   :  { %1704 = vmatpush.bf16.msrb.mxu1 %v3177_v24 }
 0xb1c   :  { %1692 = vmatpush.bf16.msrb.mxu0 %v3180_v30 }
 0xb1d   :  { %1705 = vmatpush.bf16.msrb.mxu1 %v3183_v31 }
 0xb20   :  { %1693 = vmatpush.bf16.msrb.mxu0 %v3186_v36 }
 0xb21   :  { %1706 = vmatpush.bf16.msrb.mxu1 %v3189_v37 }
 0xb24   :  { %1694 = vmatpush.bf16.msrb.mxu0 %v3194_v51 }
 0xb25   :  { %1707 = vmatpush.bf16.msrb.mxu1 %v3197_v52 }
 0xb28   :  { %1695 = vmatpush.bf16.msrb.mxu0 %v3203_v59 }
 0xb29   :  { %1708 = vmatpush.bf16.msrb.mxu1 %v3205_v61 }
 0xb4f   :  { %v1291_v12 = vpop.permute.xlu2 %1290 }
 0xb50   :  { %v3629_v39 = vadd.f32 %v1291_v12, %v1283_v27 }
 0xb52   :  { %2722 = vtanh.f32 %v3629_v39 }
 0xb53   :  { %2724 = vtanh.f32 %v1337_v7  ;;  %v1275_v7 = vmul.f32 0.5, %v3592_v58 }
 0xb58   :  { %v2723_v45 = vpop.eup %2722 }
 0xb59   :  { %1296 = vrot.lane.b32.xlu2 %v2723_v45, %s3017_s15  ;;  %v2725_v60 = vpop.eup %2724 }
 0xb5a   :  { %v1341_v50 = vmul.f32 0.5, %v2725_v60 }
 0xb5c   :  { %v1343_v44 = vadd.f32 0.5, %v1341_v50 }
 0xb86   :  { %v1359_v19 = vpop.permute.xlu1 %1358 }
 0xb87   :  { %v3634_v32 = vmul.f32 %v1359_v19, %v1343_v44 }
 0xb88   :  { %v1401_v4 = vpop.f32.mrf.mxu0  ;;  %v1414_v62 = vpop.f32.mrf.mxu1 }
 0xb89   :  { %4055 = vst [vmem:[#allocation16_spill] sm:$0xff] %v3634_v32  ;;  %v1421_v6 = vrot.slane %v1414_v62, 6  ;;  %v1516_v11 = vpack.c.bf16 %v3634_v32, %v3634_v32 }
 0xb8b   :  { %v1518_v13 = vunpack.c.l.b16 %v1516_v11  ;;  %v3639_v40 = vadd.f32 %v1421_v6, %v3540_v33 }
 0xb8d   :  { %v1519_v27 = vpack.c.b16 %v1518_v13, %v1518_v13  ;;  %2726 = vtanh.f32 %v3639_v40 }
 0xb8e   :  { %2728 = vtanh.f32 %v1275_v7 }
 0xb8f   :  { %1520 = vrot.lane.b32.xlu1 %v1519_v27, %s3017_s15  ;;  %v1420_v27 = vrot.slane %v1401_v4, 6 }
 0xb90   :  { %v1403_v57 = vpop.f32.mrf.mxu0  ;;  %v1416_v12 = vpop.f32.mrf.mxu1 }
 0xb91   :  { %v1424_v57 = vadd.f32 %v1420_v27, %v3559_v42 }
 0xb93   :  { %v2727_v45 = vpop.eup %2726  ;;  %v1426_v12 = vmul.f32 0.5, %v1424_v57 }
 0xb94   :  { %v2729_v60 = vpop.eup %2728 }
 0xb95   :  { %v1279_v50 = vmul.f32 0.5, %v2729_v60  ;;  %2730 = vtanh.f32 %v1426_v12 }
 0xb97   :  { %1440 = vrot.lane.b32.xlu1 %v2727_v45, %s3017_s15  ;;  %v1281_v44 = vadd.f32 0.5, %v1279_v50 }
 0xb9b   :  { %v2731_v32 = vpop.eup %2730 }
 0xb9c   :  { %v1430_v7 = vmul.f32 0.5, %v2731_v32 }
 0xb9e   :  { %v1432_v60 = vadd.f32 0.5, %v1430_v7  ;;  %v1427_v7 = vmul.f32 0.5, %v3639_v40 }
 0xbb3   :  { %v1297_v19 = vpop.permute.xlu2 %1296 }
 0xbb4   :  { %v1299_v62 = vmul.f32 %v1297_v19, %v1281_v44 }
 0xbb6   :  { %v1455_v6 = vpack.c.bf16 %v1299_v62, %v1299_v62 }
 0xbb8   :  { %v1457_v11 = vunpack.c.l.b16 %v1455_v6 }
 0xbba   :  { %v1458_v13 = vpack.c.b16 %v1457_v11, %v1457_v11  ;;  %v4056_v11 = vld [vmem:[#allocation19_spill] sm:$0xff] }
 0xbbc   :  { %1459 = vrot.lane.b32.xlu2 %v1458_v13, %s3017_s15 }
 0xc01   :  { %v1521_v45 = vpop.permute.xlu1 %1520 }
 0xc02   :  { %v1524_v58 = vsel %vm380_vm2, %v1455_v6, %v1521_v45  ;;  %v4057_v45 = vld [vmem:[#allocation24_spill] sm:$0xff] }
 0xc03   :  { %1534 = vmatmul.bf16.vlgmr.msra.gmra.mxu0 %v1524_v58  ;;  %1547 = vmatmul.bf16.vlgmr.msra.gmra.mxu1 %v1524_v58 }
 0xc04   :  { %1840 = vmatpush.bf16.msra.mxu0 %v3093_v22  ;;  %1853 = vmatpush.bf16.msra.mxu1 %v3107_v55 }
 0xc08   :  { %1841 = vmatpush.bf16.msra.mxu0 %v3096_v29  ;;  %1854 = vmatpush.bf16.msra.mxu1 %v3112_v2  ;;  %v1436_v29 = vrot.slane %v3588_v46, 6 }
 0xc09   :  { %v1441_v4 = vpop.permute.xlu1 %1440 }
 0xc0a   :  { %v1443_v50 = vmul.f32 %v1441_v4, %v1432_v60 }
 0xc0c   :  { %1445 = vrot.lane.b32.xlu1 %v1443_v50, %s3017_s15  ;;  %1842 = vmatpush.bf16.msra.mxu0 %v3100_v43  ;;  %v1438_v43 = vmul.f32 %v1436_v29, %v1432_v60  ;;  %v4058_v60 = vld [vmem:[#allocation20_spill] sm:$0xff] }
 0xc0d   :  { %1855 = vmatpush.bf16.msra.mxu1 %v3116_v8 }
 0xc10   :  { %1843 = vmatpush.bf16.msra.mxu0 %v3104_v54 }
 0xc11   :  { %1856 = vmatpush.bf16.msra.mxu1 %v3123_v20 }
 0xc16   :  { %v1460_v22 = vpop.permute.xlu2 %1459 }
 0xc17   :  { %v1462_v55 = vsel %vm380_vm2, %v3601_v0, %v1460_v22 }
 0xc18   :  { %1472 = vmatmul.bf16.vlgmr.msra.gmra.mxu2 %v1462_v55  ;;  %1485 = vmatmul.bf16.vlgmr.msrb.gmra.mxu3 %v1462_v55 }
 0xc19   :  { %1750 = vmatpush.bf16.msra.mxu2 %v3258_v17  ;;  %1763 = vmatpush.bf16.msrb.mxu3 %v3260_v28 }
 0xc1d   :  { %1751 = vmatpush.bf16.msra.mxu2 %v3263_v34  ;;  %1764 = vmatpush.bf16.msrb.mxu3 %v3266_v35 }
 0xc21   :  { %1752 = vmatpush.bf16.msra.mxu2 %v3269_v47  ;;  %1765 = vmatpush.bf16.msrb.mxu3 %v3272_v53 }
 0xc25   :  { %1753 = vmatpush.bf16.msra.mxu2 %v3275_v1  ;;  %1766 = vmatpush.bf16.msrb.mxu3 %v3278_v3 }
 0xc29   :  { %1754 = vmatpush.bf16.msra.mxu2 %v3282_v18  ;;  %1767 = vmatpush.bf16.msrb.mxu3 %v3285_v26 }
 0xc2d   :  { %1755 = vmatpush.bf16.msra.mxu2 %v3290_v56  ;;  %1768 = vmatpush.bf16.msrb.mxu3 %v3294_v49 }
 0xc31   :  { %1756 = vmatpush.bf16.msra.mxu2 %v3304_v14  ;;  %1769 = vmatpush.bf16.msrb.mxu3 %v3306_v25 }
 0xc35   :  { %1757 = vmatpush.bf16.msra.mxu2 %v4041_v48  ;;  %1770 = vmatpush.bf16.msrb.mxu3 %v4042_v21 }
 0xc7e   :  { %v1446_v54 = vpop.permute.xlu1 %1445 }
 0xc7f   :  { %v3676_v2 = vadd.f32 %v1446_v54, %v1438_v43 }
 0xc80   :  { %v1535_v8 = vpop.f32.mrf.mxu0  ;;  %v1548_v20 = vpop.f32.mrf.mxu1 }
 0xc81   :  { %2732 = vtanh.f32 %v3676_v2  ;;  %v3680_v0 = vadd.f32 %v1548_v20, %v4040_v41  ;;  %v1536_v58 = vadd.f32 %v1535_v8, %v4057_v45 }
 0xc83   :  { %2734 = vtanh.f32 %v3680_v0  ;;  %v1552_v50 = vmul.f32 0.5, %v1536_v58 }
 0xc87   :  { %v2733_v32 = vpop.eup %2732 }
 0xc88   :  { %v1537_v44 = vpop.f32.mrf.mxu0  ;;  %v1550_v19 = vpop.f32.mrf.mxu1  ;;  %1451 = vrot.lane.b32.xlu1 %v2733_v32, %s3017_s15 }
 0xc89   :  { %v2735_v62 = vpop.eup %2734 }
 0xc8a   :  { %1563 = vrot.lane.b32.xlu0 %v2735_v62, %s3017_s15 }
 0xc9b   :  { %v1473_v46 = vpop.f32.mrf.mxu2  ;;  %v1486_v6 = vpop.f32.mrf.mxu3 }
 0xc9c   :  { %v3686_v13 = vadd.f32 %v1486_v6, %v4056_v11  ;;  %v1474_v4 = vadd.f32 %v1473_v46, %v4058_v60 }
 0xc9e   :  { %2736 = vtanh.f32 %v3686_v13  ;;  %v1490_v22 = vmul.f32 0.5, %v1474_v4 }
 0xc9f   :  { %2738 = vtanh.f32 %v1427_v7 }
 0xca0   :  { %2740 = vtanh.f32 %v1552_v50 }
 0xca1   :  { %2742 = vtanh.f32 %v1490_v22 }
 0xca3   :  { %v1475_v27 = vpop.f32.mrf.mxu2  ;;  %v1488_v57 = vpop.f32.mrf.mxu3 }
 0xca4   :  { %v2737_v12 = vpop.eup %2736 }
 0xca5   :  { %1501 = vrot.lane.b32.xlu2 %v2737_v12, %s3017_s15  ;;  %v2739_v55 = vpop.eup %2738 }
 0xca6   :  { %v2741_v29 = vpop.eup %2740  ;;  %v1431_v43 = vmul.f32 0.5, %v2739_v55 }
 0xca7   :  { %v2743_v54 = vpop.eup %2742  ;;  %v1556_v20 = vmul.f32 0.5, %v2741_v29 }
 0xca8   :  { %v1433_v32 = vadd.f32 0.5, %v1431_v43  ;;  %v1494_v19 = vmul.f32 0.5, %v2743_v54 }
 0xca9   :  { %v1558_v6 = vadd.f32 0.5, %v1556_v20 }
 0xcaa   :  { %v1496_v46 = vadd.f32 0.5, %v1494_v19 }
 0xcab   :  { %v1561_v43 = vmul.f32 %v1558_v6, %v3604_v38 }
 0xcac   :  { %v1499_v50 = vmul.f32 %v1496_v46, %v3629_v39 }
 0xcfa   :  { %v1452_v44 = vpop.permute.xlu1 %1451 }
 0xcfb   :  { %v1454_v62 = vmul.f32 %v1452_v44, %v1433_v32 }
 0xcfc   :  { %v1564_v8 = vpop.permute.xlu0 %1563 }
 0xcfd   :  { %v3693_v27 = vpack.c.bf16 %v1454_v62, %v1454_v62  ;;  %v1566_v40 = vmul.f32 %v1564_v8, %v1558_v6  ;;  %v1491_v8 = vmul.f32 0.5, %v3686_v13 }
 0xcff   :  { %v1606_v57 = vunpack.c.l.b16 %v3693_v27  ;;  %v1502_v12 = vpop.permute.xlu2 %1501  ;;  %1568 = vrot.lane.b32.xlu0 %v1566_v40, %s3017_s15 }
 0xd00   :  { %v1504_v58 = vmul.f32 %v1502_v12, %v1496_v46 }
 0xd01   :  { %v1607_v7 = vpack.c.b16 %v1606_v57, %v1606_v57 }
 0xd02   :  { %1506 = vrot.lane.b32.xlu2 %v1504_v58, %s3017_s15 }
 0xd03   :  { %v1608_v4 = vrot.slane %v1607_v7, 1 }
 0xd05   :  { %2558 = vmatmul.msk.bf16.vlgmr.msrb.gmra.mxu2 %vm380_vm2, %v1608_v4  ;;  %2559 = vmatmul.msk.bf16.vlgmr.msra.gmra.mxu3 %vm380_vm2, %v1608_v4 }
 0xd06   :  { %1912 = vmatpush.bf16.msrb.mxu2 %v3157_v63  ;;  %1925 = vmatpush.bf16.msra.mxu3 %v3159_v5 }
 0xd0a   :  { %1913 = vmatpush.bf16.msrb.mxu2 %v3162_v9  ;;  %1926 = vmatpush.bf16.msra.mxu3 %v3165_v10 }
 0xd0e   :  { %1914 = vmatpush.bf16.msrb.mxu2 %v3168_v15  ;;  %1927 = vmatpush.bf16.msra.mxu3 %v3171_v16 }
 0xd12   :  { %1915 = vmatpush.bf16.msrb.mxu2 %v3174_v23  ;;  %1928 = vmatpush.bf16.msra.mxu3 %v3177_v24 }
 0xd16   :  { %1916 = vmatpush.bf16.msrb.mxu2 %v3180_v30  ;;  %1929 = vmatpush.bf16.msra.mxu3 %v3183_v31 }
 0xd1a   :  { %1917 = vmatpush.bf16.msrb.mxu2 %v3186_v36  ;;  %1930 = vmatpush.bf16.msra.mxu3 %v3189_v37 }
 0xd1e   :  { %1918 = vmatpush.bf16.msrb.mxu2 %v3194_v51  ;;  %1931 = vmatpush.bf16.msra.mxu3 %v3197_v52 }
 0xd22   :  { %1919 = vmatpush.bf16.msrb.mxu2 %v3203_v59  ;;  %1932 = vmatpush.bf16.msra.mxu3 %v3205_v61 }
 0xd5c   :  { %v1507_v22 = vpop.permute.xlu2 %1506 }
 0xd5d   :  { %v3717_v55 = vadd.f32 %v1507_v22, %v1499_v50  ;;  %v1553_v50 = vmul.f32 0.5, %v3680_v0 }
 0xd5f   :  { %2744 = vtanh.f32 %v3717_v55 }
 0xd65   :  { %v2745_v29 = vpop.eup %2744 }
 0xd66   :  { %1512 = vrot.lane.b32.xlu2 %v2745_v29, %s3017_s15 }
 0xd71   :  { %v1569_v54 = vpop.permute.xlu0 %1568 }
 0xd72   :  { %v3722_v20 = vadd.f32 %v1569_v54, %v1561_v43 }
 0xd74   :  { %2746 = vtanh.f32 %v3722_v20 }
 0xd75   :  { %2748 = vtanh.f32 %v1491_v8 }
 0xd76   :  { %2750 = vtanh.f32 %v1553_v50 }
 0xd7a   :  { %v2747_v32 = vpop.eup %2746 }
 0xd7b   :  { %1574 = vrot.lane.b32.xlu0 %v2747_v32, %s3017_s15  ;;  %v2749_v40 = vpop.eup %2748 }
 0xd7c   :  { %v1495_v46 = vmul.f32 0.5, %v2749_v40  ;;  %v2751_v22 = vpop.eup %2750 }
 0xd7d   :  { %v1557_v29 = vmul.f32 0.5, %v2751_v22 }
 0xd7e   :  { %v1497_v57 = vadd.f32 0.5, %v1495_v46 }
 0xd7f   :  { %v1559_v43 = vadd.f32 0.5, %v1557_v29 }
 0xd88   :  { %v1621_v44 = vpop.f32.mrf.mxu2  ;;  %v1634_v39 = vpop.f32.mrf.mxu3 }
 0xd89   :  { %v1641_v32 = vrot.slane %v1634_v39, 4 }
 0xd8b   :  { %v3734_v8 = vadd.f32 %v1641_v32, %v3540_v33 }
 0xd8d   :  { %2752 = vtanh.f32 %v3734_v8 }
 0xd90   :  { %v1623_v19 = vpop.f32.mrf.mxu2  ;;  %v1636_v62 = vpop.f32.mrf.mxu3 }
 0xd93   :  { %v2753_v0 = vpop.eup %2752 }
 0xdc0   :  { %v1513_v12 = vpop.permute.xlu2 %1512 }
 0xdc1   :  { %v1515_v38 = vmul.f32 %v1513_v12, %v1497_v57 }
 0xdc3   :  { %v1675_v6 = vpack.c.bf16 %v1515_v38, %v1515_v38 }
 0xdc5   :  { %v1677_v58 = vunpack.c.l.b16 %v1675_v6 }
 0xdc7   :  { %v1678_v7 = vpack.c.b16 %v1677_v58, %v1677_v58 }
 0xdc9   :  { %v1679_v4 = vrot.slane %v1678_v7, 7 }
 0xdcb   :  { %1680 = vrot.lane.b32.xlu1 %v1679_v4, %s3017_s15 }
 0xded   :  { %v1575_v54 = vpop.permute.xlu0 %1574 }
 0xdee   :  { %v3729_v13 = vmul.f32 %v1575_v54, %v1559_v43 }
 0xdf0   :  { %v1740_v19 = vpack.c.bf16 %v3729_v13, %v3729_v13 }
 0xdf2   :  { %v1742_v62 = vunpack.c.l.b16 %v1740_v19 }
 0xdf4   :  { %v1743_v40 = vpack.c.b16 %v1742_v62, %v1742_v62 }
 0xdf6   :  { %1744 = vrot.lane.b32.xlu0 %v1743_v40, %s3017_s15 }
 0xdfe   :  { %1660 = vrot.lane.b32.xlu0 %v2753_v0, %s3017_s15 }
 0xe3d   :  { %v1681_v46 = vpop.permute.xlu1 %1680 }
 0xe3e   :  { %v1684_v57 = vsel %vm380_vm2, %v3693_v27, %v1681_v46  ;;  %v1640_v27 = vrot.slane %v1621_v44, 4 }
 0xe3f   :  { %v1686_v39 = vrot.slane %v1684_v57, 1 }
 0xe40   :  { %v1644_v12 = vadd.f32 %v1640_v27, %v3559_v42  ;;  %v1647_v27 = vmul.f32 0.5, %v3734_v8 }
 0xe41   :  { %1696 = vmatmul.bf16.vlgmr.msrb.gmra.mxu0 %v1686_v39  ;;  %1709 = vmatmul.bf16.vlgmr.msrb.gmra.mxu1 %v1686_v39 }
 0xe42   :  { %1974 = vmatpush.bf16.msrb.mxu0 %v3258_v17  ;;  %1987 = vmatpush.bf16.msrb.mxu1 %v3260_v28  ;;  %v1646_v38 = vmul.f32 0.5, %v1644_v12 }
 0xe44   :  { %2754 = vtanh.f32 %v1646_v38 }
 0xe46   :  { %1975 = vmatpush.bf16.msrb.mxu0 %v3263_v34  ;;  %1988 = vmatpush.bf16.msrb.mxu1 %v3266_v35 }
 0xe4a   :  { %1976 = vmatpush.bf16.msrb.mxu0 %v3269_v47  ;;  %1989 = vmatpush.bf16.msrb.mxu1 %v3272_v53  ;;  %v2755_v58 = vpop.eup %2754 }
 0xe4b   :  { %v1650_v4 = vmul.f32 0.5, %v2755_v58 }
 0xe4d   :  { %v1652_v50 = vadd.f32 0.5, %v1650_v4 }
 0xe4e   :  { %1977 = vmatpush.bf16.msrb.mxu0 %v3275_v1  ;;  %1990 = vmatpush.bf16.msrb.mxu1 %v3278_v3 }
 0xe52   :  { %1978 = vmatpush.bf16.msrb.mxu0 %v3282_v18  ;;  %1991 = vmatpush.bf16.msrb.mxu1 %v3285_v26 }
 0xe56   :  { %1979 = vmatpush.bf16.msrb.mxu0 %v3290_v56  ;;  %1992 = vmatpush.bf16.msrb.mxu1 %v3294_v49 }
 0xe5a   :  { %1980 = vmatpush.bf16.msrb.mxu0 %v3304_v14  ;;  %1993 = vmatpush.bf16.msrb.mxu1 %v3306_v25 }
 0xe5e   :  { %1981 = vmatpush.bf16.msrb.mxu0 %v4041_v48  ;;  %1994 = vmatpush.bf16.msrb.mxu1 %v4042_v21 }
 0xe68   :  { %v1745_v7 = vpop.permute.xlu0 %1744 }
 0xe69   :  { %v1748_v44 = vsel %vm380_vm2, %v1675_v6, %v1745_v7 }
 0xe6a   :  { %1758 = vmatmul.bf16.vlgmr.msra.gmra.mxu2 %v1748_v44  ;;  %1771 = vmatmul.bf16.vlgmr.msrb.gmra.mxu3 %v1748_v44 }
 0xe6b   :  { %2066 = vmatpush.bf16.msra.mxu2 %v3157_v63  ;;  %2079 = vmatpush.bf16.msrb.mxu3 %v3159_v5 }
 0xe6f   :  { %2067 = vmatpush.bf16.msra.mxu2 %v3162_v9  ;;  %2080 = vmatpush.bf16.msrb.mxu3 %v3165_v10 }
 0xe70   :  { %v1661_v22 = vpop.permute.xlu0 %1660 }
 0xe71   :  { %v1663_v29 = vmul.f32 %v1661_v22, %v1652_v50 }
 0xe73   :  { %1665 = vrot.lane.b32.xlu0 %v1663_v29, %s3017_s15  ;;  %2068 = vmatpush.bf16.msra.mxu2 %v3168_v15 }
 0xe74   :  { %2081 = vmatpush.bf16.msrb.mxu3 %v3171_v16 }
 0xe77   :  { %2069 = vmatpush.bf16.msra.mxu2 %v3174_v23  ;;  %v1656_v23 = vrot.slane %v3676_v2, 6 }
 0xe78   :  { %2082 = vmatpush.bf16.msrb.mxu3 %v3177_v24 }
 0xe79   :  { %v1658_v24 = vmul.f32 %v1656_v23, %v1652_v50 }
 0xe7b   :  { %2070 = vmatpush.bf16.msra.mxu2 %v3180_v30 }
 0xe7c   :  { %2083 = vmatpush.bf16.msrb.mxu3 %v3183_v31 }
 0xe7f   :  { %2071 = vmatpush.bf16.msra.mxu2 %v3186_v36 }
 0xe80   :  { %2084 = vmatpush.bf16.msrb.mxu3 %v3189_v37 }
 0xe83   :  { %2072 = vmatpush.bf16.msra.mxu2 %v3194_v51 }
 0xe84   :  { %2085 = vmatpush.bf16.msrb.mxu3 %v3197_v52 }
 0xe87   :  { %2073 = vmatpush.bf16.msra.mxu2 %v3203_v59 }
 0xe88   :  { %2086 = vmatpush.bf16.msrb.mxu3 %v3205_v61 }
 0xebe   :  { %v1697_v63 = vpop.f32.mrf.mxu0  ;;  %v1710_v5 = vpop.f32.mrf.mxu1 }
 0xebf   :  { %v3777_v9 = vadd.f32 %v1710_v5, %v4056_v11  ;;  %v1698_v2 = vadd.f32 %v1697_v63, %v4058_v60 }
 0xec1   :  { %2756 = vtanh.f32 %v3777_v9  ;;  %v1714_v43 = vmul.f32 0.5, %v1698_v2 }
 0xec6   :  { %v1699_v10 = vpop.f32.mrf.mxu0  ;;  %v1712_v15 = vpop.f32.mrf.mxu1 }
 0xec7   :  { %v2757_v16 = vpop.eup %2756 }
 0xec8   :  { %1725 = vrot.lane.b32.xlu1 %v2757_v16, %s3017_s15 }
 0xee5   :  { %v1666_v30 = vpop.permute.xlu0 %1665 }
 0xee6   :  { %v3782_v31 = vadd.f32 %v1666_v30, %v1658_v24 }
 0xee8   :  { %2758 = vtanh.f32 %v3782_v31 }
 0xeed   :  { %v1759_v36 = vpop.f32.mrf.mxu2  ;;  %v1772_v37 = vpop.f32.mrf.mxu3 }
 0xeee   :  { %v2759_v51 = vpop.eup %2758  ;;  %v3786_v52 = vadd.f32 %v1772_v37, %v4040_v41  ;;  %v1760_v40 = vadd.f32 %v1759_v36, %v4057_v45 }
 0xeef   :  { %1671 = vrot.lane.b32.xlu0 %v2759_v51, %s3017_s15 }
 0xef0   :  { %2760 = vtanh.f32 %v3786_v52  ;;  %v1776_v46 = vmul.f32 0.5, %v1760_v40  ;;  %v1715_v40 = vmul.f32 0.5, %v3777_v9 }
 0xef1   :  { %2762 = vtanh.f32 %v1714_v43 }
 0xef2   :  { %2764 = vtanh.f32 %v1776_v46 }
 0xef3   :  { %2766 = vtanh.f32 %v1647_v27 }
 0xef5   :  { %v1761_v59 = vpop.f32.mrf.mxu2  ;;  %v1774_v61 = vpop.f32.mrf.mxu3 }
 0xef6   :  { %v2761_v6 = vpop.eup %2760  ;;  %v1777_v61 = vmul.f32 0.5, %v3786_v52 }
 0xef7   :  { %1787 = vrot.lane.b32.xlu2 %v2761_v6, %s3017_s15  ;;  %v2763_v54 = vpop.eup %2762 }
 0xef8   :  { %v1718_v32 = vmul.f32 0.5, %v2763_v54  ;;  %v2765_v57 = vpop.eup %2764 }
 0xef9   :  { %v1780_v39 = vmul.f32 0.5, %v2765_v57  ;;  %v2767_v7 = vpop.eup %2766 }
 0xefa   :  { %v1720_v19 = vadd.f32 0.5, %v1718_v32  ;;  %v1651_v44 = vmul.f32 0.5, %v2767_v7 }
 0xefb   :  { %v1782_v12 = vadd.f32 0.5, %v1780_v39 }
 0xefc   :  { %v1653_v4 = vadd.f32 0.5, %v1651_v44  ;;  %v1723_v16 = vmul.f32 %v1720_v19, %v3717_v55 }
 0xefd   :  { %v1785_v8 = vmul.f32 %v1782_v12, %v3722_v20 }
 0xf3a   :  { %v1726_v62 = vpop.permute.xlu1 %1725 }
 0xf3b   :  { %v1728_v0 = vmul.f32 %v1726_v62, %v1720_v19 }
 0xf3d   :  { %1730 = vrot.lane.b32.xlu1 %v1728_v0, %s3017_s15 }
 0xf51   :  { %v1788_v38 = vpop.permute.xlu2 %1787 }
 0xf52   :  { %v1790_v58 = vmul.f32 %v1788_v38, %v1782_v12 }
 0xf54   :  { %1792 = vrot.lane.b32.xlu2 %v1790_v58, %s3017_s15 }
 0xf61   :  { %v1672_v50 = vpop.permute.xlu0 %1671 }
 0xf62   :  { %v1674_v22 = vmul.f32 %v1672_v50, %v1653_v4 }
 0xf64   :  { %v3796_v29 = vpack.c.bf16 %v1674_v22, %v1674_v22 }
 0xf66   :  { %v1830_v63 = vunpack.c.l.b16 %v3796_v29 }
 0xf68   :  { %v1831_v5 = vpack.c.b16 %v1830_v63, %v1830_v63 }
 0xf6a   :  { %v1832_v10 = vrot.slane %v1831_v5, 2 }
 0xf6c   :  { %2560 = vmatmul.msk.bf16.vlgmr.msra.gmra.mxu0 %vm380_vm2, %v1832_v10  ;;  %2561 = vmatmul.msk.bf16.vlgmr.msra.gmra.mxu1 %vm380_vm2, %v1832_v10 }
 0xf6d   :  { %2128 = vmatpush.bf16.msra.mxu0 %v3258_v17  ;;  %2141 = vmatpush.bf16.msra.mxu1 %v3260_v28 }
 0xf71   :  { %2129 = vmatpush.bf16.msra.mxu0 %v3263_v34  ;;  %2142 = vmatpush.bf16.msra.mxu1 %v3266_v35 }
 0xf75   :  { %2130 = vmatpush.bf16.msra.mxu0 %v3269_v47  ;;  %2143 = vmatpush.bf16.msra.mxu1 %v3272_v53 }
 0xf79   :  { %2131 = vmatpush.bf16.msra.mxu0 %v3275_v1  ;;  %2144 = vmatpush.bf16.msra.mxu1 %v3278_v3 }
 0xf7d   :  { %2132 = vmatpush.bf16.msra.mxu0 %v3282_v18  ;;  %2145 = vmatpush.bf16.msra.mxu1 %v3285_v26 }
 0xf81   :  { %2133 = vmatpush.bf16.msra.mxu0 %v3290_v56  ;;  %2146 = vmatpush.bf16.msra.mxu1 %v3294_v49 }
 0xf85   :  { %2134 = vmatpush.bf16.msra.mxu0 %v3304_v14  ;;  %2147 = vmatpush.bf16.msra.mxu1 %v3306_v25 }
 0xf89   :  { %2135 = vmatpush.bf16.msra.mxu0 %v4041_v48  ;;  %2148 = vmatpush.bf16.msra.mxu1 %v4042_v21 }
 0xfae   :  { %v1793_v15 = vpop.permute.xlu2 %1792 }
 0xfaf   :  { %v3819_v23 = vadd.f32 %v1793_v15, %v1785_v8  ;;  %v1731_v24 = vpop.permute.xlu1 %1730 }
 0xfb0   :  { %v3821_v30 = vadd.f32 %v1731_v24, %v1723_v16 }
 0xfb1   :  { %2768 = vtanh.f32 %v3819_v23 }
 0xfb2   :  { %2770 = vtanh.f32 %v3821_v30 }
 0xfb3   :  { %2772 = vtanh.f32 %v1777_v61 }
 0xfb4   :  { %2774 = vtanh.f32 %v1715_v40 }
 0xfb7   :  { %v2769_v36 = vpop.eup %2768 }
 0xfb8   :  { %v2771_v37 = vpop.eup %2770  ;;  %1798 = vrot.lane.b32.xlu2 %v2769_v36, %s3017_s15 }
 0xfb9   :  { %1736 = vrot.lane.b32.xlu1 %v2771_v37, %s3017_s15  ;;  %v2773_v6 = vpop.eup %2772 }
 0xfba   :  { %v1781_v2 = vmul.f32 0.5, %v2773_v6  ;;  %v2775_v46 = vpop.eup %2774 }
 0xfbb   :  { %v1719_v57 = vmul.f32 0.5, %v2775_v46 }
 0xfbc   :  { %v1783_v43 = vadd.f32 0.5, %v1781_v2 }
 0xfbd   :  { %v1721_v52 = vadd.f32 0.5, %v1719_v57 }
 0xfe9   :  { %v3827_v51 = vpop.f32.mrf.mxu0  ;;  %v3829_v20 = vpop.f32.mrf.mxu1 }
 0xfea   :  { %v1864_v16 = vrot.slane %v3827_v51, 2 }
 0xfec   :  { %v1868_v36 = vadd.f32 %v1864_v16, %v3559_v42 }
 0xfee   :  { %v1870_v37 = vmul.f32 0.5, %v1868_v36 }
 0xff1   :  { %v1847_v55 = vpop.f32.mrf.mxu0  ;;  %v1860_v59 = vpop.f32.mrf.mxu1 }
0x1012   :  { %v1799_v54 = vpop.permute.xlu2 %1798 }
0x1013   :  { %v3832_v32 = vmul.f32 %v1799_v54, %v1783_v43 }
0x1015   :  { %v1964_v19 = vpack.c.bf16 %v3832_v32, %v3832_v32 }
0x1017   :  { %v1966_v62 = vunpack.c.l.b16 %v1964_v19 }
0x1019   :  { %v1967_v0 = vpack.c.b16 %v1966_v62, %v1966_v62 }
0x101b   :  { %1968 = vrot.lane.b32.xlu2 %v1967_v0, %s3017_s15 }
0x102b   :  { %v1737_v39 = vpop.permute.xlu1 %1736 }
0x102c   :  { %v1739_v27 = vmul.f32 %v1737_v39, %v1721_v52  ;;  %v1880_v39 = vrot.slane %v3782_v31, 6 }
0x102e   :  { %v1899_v12 = vpack.c.bf16 %v1739_v27, %v1739_v27 }
0x1030   :  { %v1901_v38 = vunpack.c.l.b16 %v1899_v12 }
0x1032   :  { %v1902_v58 = vpack.c.b16 %v1901_v38, %v1901_v38 }
0x1034   :  { %v1903_v7 = vrot.slane %v1902_v58, 6 }
0x1036   :  { %1904 = vrot.lane.b32.xlu0 %v1903_v7, %s3017_s15 }
0x1075   :  { %v1969_v44 = vpop.permute.xlu2 %1968 }
0x1076   :  { %v1972_v4 = vsel %vm380_vm2, %v1899_v12, %v1969_v44 }
0x1077   :  { %1982 = vmatmul.bf16.vlgmr.msrb.gmra.mxu0 %v1972_v4  ;;  %1995 = vmatmul.bf16.vlgmr.msrb.gmra.mxu1 %v1972_v4 }
0x10a8   :  { %v1905_v9 = vpop.permute.xlu0 %1904 }
0x10a9   :  { %v1908_v50 = vsel %vm380_vm2, %v3796_v29, %v1905_v9 }
0x10aa   :  { %v1910_v22 = vrot.slane %v1908_v50, 2 }
0x10ac   :  { %1920 = vmatmul.bf16.vlgmr.msrb.gmra.mxu2 %v1910_v22  ;;  %1933 = vmatmul.bf16.vlgmr.msra.gmra.mxu3 %v1910_v22 }
0x10ad   :  { %2217 = vmatpush.bf16.msrb.mxu2 %v3258_v17  ;;  %2230 = vmatpush.bf16.msra.mxu3 %v3260_v28 }
0x10b1   :  { %2218 = vmatpush.bf16.msrb.mxu2 %v3263_v34  ;;  %2231 = vmatpush.bf16.msra.mxu3 %v3266_v35 }
0x10b5   :  { %2219 = vmatpush.bf16.msrb.mxu2 %v3269_v47  ;;  %2232 = vmatpush.bf16.msra.mxu3 %v3272_v53 }
0x10b9   :  { %2220 = vmatpush.bf16.msrb.mxu2 %v3275_v1  ;;  %2233 = vmatpush.bf16.msra.mxu3 %v3278_v3 }
0x10bd   :  { %2221 = vmatpush.bf16.msrb.mxu2 %v3282_v18  ;;  %2234 = vmatpush.bf16.msra.mxu3 %v3285_v26  ;;  %v1865_v26 = vrot.slane %v3829_v20, 2 }
0x10c1   :  { %2222 = vmatpush.bf16.msrb.mxu2 %v3290_v56  ;;  %2235 = vmatpush.bf16.msra.mxu3 %v3294_v49  ;;  %v3866_v56 = vadd.f32 %v1865_v26, %v3540_v33 }
0x10c5   :  { %2223 = vmatpush.bf16.msrb.mxu2 %v3304_v14  ;;  %2236 = vmatpush.bf16.msra.mxu3 %v3306_v25 }
0x10c9   :  { %2224 = vmatpush.bf16.msrb.mxu2 %v4041_v48  ;;  %2237 = vmatpush.bf16.msra.mxu3 %v4042_v21 }
0x10f4   :  { %v1983_v17 = vpop.f32.mrf.mxu0  ;;  %v1996_v28 = vpop.f32.mrf.mxu1 }
0x10f5   :  { %v3859_v34 = vadd.f32 %v1996_v28, %v4040_v41  ;;  %v1984_v21 = vadd.f32 %v1983_v17, %v4057_v45 }
0x10f7   :  { %2776 = vtanh.f32 %v3859_v34  ;;  %v2000_v29 = vmul.f32 0.5, %v1984_v21  ;;  %v2001_v7 = vmul.f32 0.5, %v3859_v34 }
0x10fc   :  { %v1985_v35 = vpop.f32.mrf.mxu0  ;;  %v1998_v47 = vpop.f32.mrf.mxu1 }
0x10fd   :  { %v2777_v53 = vpop.eup %2776 }
0x10fe   :  { %2011 = vrot.lane.b32.xlu1 %v2777_v53, %s3017_s15 }
0x112f   :  { %v1921_v1 = vpop.f32.mrf.mxu2  ;;  %v1934_v3 = vpop.f32.mrf.mxu3 }
0x1130   :  { %v1935_v18 = vadd.f32 %v1934_v3, %v4056_v11  ;;  %v1922_v15 = vadd.f32 %v1921_v1, %v4058_v60 }
0x1132   :  { %2778 = vtanh.f32 %v1935_v18  ;;  %v1938_v24 = vmul.f32 0.5, %v1922_v15  ;;  %v1939_v44 = vmul.f32 0.5, %v1935_v18 }
0x1133   :  { %2780 = vtanh.f32 %v3866_v56 }
0x1134   :  { %2782 = vtanh.f32 %v2000_v29 }
0x1135   :  { %2784 = vtanh.f32 %v1938_v24 }
0x1136   :  { %2786 = vtanh.f32 %v1870_v37 }
0x1137   :  { %v1923_v49 = vpop.f32.mrf.mxu2  ;;  %v1936_v14 = vpop.f32.mrf.mxu3 }
0x1138   :  { %v2779_v25 = vpop.eup %2778  ;;  %v1871_v14 = vmul.f32 0.5, %v3866_v56 }
0x1139   :  { %1949 = vrot.lane.b32.xlu2 %v2779_v25, %s3017_s15  ;;  %v2781_v48 = vpop.eup %2780 }
0x113a   :  { %v2783_v63 = vpop.eup %2782 }
0x113b   :  { %v2004_v5 = vmul.f32 0.5, %v2783_v63  ;;  %v2785_v20 = vpop.eup %2784 }
0x113c   :  { %v1942_v55 = vmul.f32 0.5, %v2785_v20  ;;  %v2787_v61 = vpop.eup %2786 }
0x113d   :  { %v2006_v10 = vadd.f32 0.5, %v2004_v5  ;;  %v1874_v43 = vmul.f32 0.5, %v2787_v61 }
0x113e   :  { %v1944_v59 = vadd.f32 0.5, %v1942_v55 }
0x113f   :  { %v1876_v54 = vadd.f32 0.5, %v1874_v43  ;;  %v2009_v51 = vmul.f32 %v2006_v10, %v3819_v23 }
0x1140   :  { %v1947_v46 = vmul.f32 %v1944_v59, %v3821_v30 }
0x1141   :  { %1884 = vrot.lane.b32.xlu2 %v2781_v48, %s3017_s15  ;;  %v1882_v27 = vmul.f32 %v1880_v39, %v1876_v54 }
0x1170   :  { %v2012_v8 = vpop.permute.xlu1 %2011 }
0x1171   :  { %v2014_v33 = vmul.f32 %v2012_v8, %v2006_v10 }
0x1173   :  { %2016 = vrot.lane.b32.xlu0 %v2014_v33, %s3017_s15 }
0x1193   :  { %v1950_v6 = vpop.permute.xlu2 %1949 }
0x1194   :  { %v1952_v2 = vmul.f32 %v1950_v6, %v1944_v59 }
0x1196   :  { %1954 = vrot.lane.b32.xlu1 %v1952_v2, %s3017_s15 }
0x119b   :  { %v1885_v19 = vpop.permute.xlu2 %1884 }
0x119c   :  { %v1887_v62 = vmul.f32 %v1885_v19, %v1876_v54 }
0x119e   :  { %1889 = vrot.lane.b32.xlu1 %v1887_v62, %s3017_s15 }
0x11e5   :  { %v2017_v42 = vpop.permute.xlu0 %2016 }
0x11e6   :  { %v3879_v40 = vadd.f32 %v2017_v42, %v2009_v51 }
0x11e8   :  { %2788 = vtanh.f32 %v3879_v40 }
0x11ee   :  { %v2789_v0 = vpop.eup %2788 }
0x11ef   :  { %2022 = vrot.lane.b32.xlu0 %v2789_v0, %s3017_s15 }
0x1208   :  { %v1955_v57 = vpop.permute.xlu1 %1954 }
0x1209   :  { %v3884_v52 = vadd.f32 %v1955_v57, %v1947_v46 }
0x120b   :  { %2790 = vtanh.f32 %v3884_v52 }
0x1210   :  { %v1890_v12 = vpop.permute.xlu1 %1889 }
0x1211   :  { %v2791_v23 = vpop.eup %2790  ;;  %v1892_v38 = vadd.f32 %v1890_v12, %v1882_v27 }
0x1212   :  { %1960 = vrot.lane.b32.xlu2 %v2791_v23, %s3017_s15 }
0x1213   :  { %2792 = vtanh.f32 %v1892_v38 }
0x1214   :  { %2794 = vtanh.f32 %v2001_v7 }
0x1215   :  { %2796 = vtanh.f32 %v1939_v44 }
0x1216   :  { %2798 = vtanh.f32 %v1871_v14  ;;  %v1578_v14 = vsel %vm920_vm3, %v3729_v13, -inf }
0x1219   :  { %v2793_v58 = vpop.eup %2792 }
0x121a   :  { %1895 = vrot.lane.b32.xlu1 %v2793_v58, %s3017_s15  ;;  %v2795_v30 = vpop.eup %2794 }
0x121b   :  { %v2005_v4 = vmul.f32 0.5, %v2795_v30  ;;  %v2797_v22 = vpop.eup %2796 }
0x121c   :  { %v1943_v35 = vmul.f32 0.5, %v2797_v22  ;;  %v2799_v25 = vpop.eup %2798 }
0x121d   :  { %v2007_v9 = vadd.f32 0.5, %v2005_v4  ;;  %v1875_v48 = vmul.f32 0.5, %v2799_v25 }
0x121e   :  { %v1945_v53 = vadd.f32 0.5, %v1943_v35 }
0x121f   :  { %v1877_v29 = vadd.f32 0.5, %v1875_v48 }
0x1261   :  { %v2023_v50 = vpop.permute.xlu0 %2022 }
0x1262   :  { %v3891_v31 = vmul.f32 %v2023_v50, %v2007_v9 }
0x1264   :  { %v2118_v17 = vpack.c.bf16 %v3891_v31, %v3891_v31  ;;  %v2026_v25 = vsel %vm920_vm3, %v3891_v31, -inf }
0x1266   :  { %v2120_v28 = vunpack.c.l.b16 %v2118_v17 }
0x1268   :  { %v2121_v47 = vpack.c.b16 %v2120_v28, %v2120_v28 }
0x126a   :  { %2122 = vrot.lane.b32.xlu0 %v2121_v47, %s3017_s15 }
0x126c   :  { %v1961_v34 = vpop.permute.xlu2 %1960 }
0x126d   :  { %v1963_v1 = vmul.f32 %v1961_v34, %v1945_v53 }
0x126f   :  { %v2053_v3 = vpack.c.bf16 %v1963_v1, %v1963_v1 }
0x1271   :  { %v2055_v18 = vunpack.c.l.b16 %v2053_v3 }
0x1273   :  { %v2056_v26 = vpack.c.b16 %v2055_v18, %v2055_v18 }
0x1275   :  { %v2057_v49 = vrot.slane %v2056_v26, 5  ;;  %v4060_v26 = vld [vmem:[#allocation16_spill] sm:$0xff] }
0x1277   :  { %2058 = vrot.lane.b32.xlu2 %v2057_v49, %s3017_s15  ;;  %v1362_v49 = vsel %vm920_vm3, %v4060_v26, -inf }
0x128c   :  { %v1896_v21 = vpop.permute.xlu1 %1895 }
0x128d   :  { %v1898_v63 = vmul.f32 %v1896_v21, %v1877_v29 }
0x128f   :  { %v2052_v5 = vpack.c.bf16 %v1898_v63, %v1898_v63 }
0x12d1   :  { %v2059_v10 = vpop.permute.xlu2 %2058 }
0x12d2   :  { %v2062_v8 = vsel %vm380_vm2, %v2052_v5, %v2059_v10 }
0x12d3   :  { %v2064_v33 = vrot.slane %v2062_v8, 3 }
0x12d5   :  { %2074 = vmatmul.bf16.vlgmr.msra.gmra.mxu2 %v2064_v33  ;;  %2087 = vmatmul.bf16.vlgmr.msrb.gmra.mxu3 %v2064_v33 }
0x12dc   :  { %v2123_v15 = vpop.permute.xlu0 %2122 }
0x12dd   :  { %v2126_v16 = vsel %vm380_vm2, %v2053_v3, %v2123_v15 }
0x12de   :  { %2136 = vmatmul.bf16.vlgmr.msra.gmra.mxu0 %v2126_v16  ;;  %2149 = vmatmul.bf16.vlgmr.msra.gmra.mxu1 %v2126_v16 }
0x1358   :  { %v2075_v24 = vpop.f32.mrf.mxu2  ;;  %v2088_v56 = vpop.f32.mrf.mxu3 }
0x1359   :  { %v3901_v36 = vadd.f32 %v2088_v56, %v4056_v11  ;;  %v2076_v11 = vadd.f32 %v2075_v24, %v4058_v60 }
0x135b   :  { %2800 = vtanh.f32 %v3901_v36  ;;  %v2137_v37 = vpop.f32.mrf.mxu0  ;;  %v2150_v20 = vpop.f32.mrf.mxu1  ;;  %v2092_v19 = vmul.f32 0.5, %v2076_v11  ;;  %v2093_v48 = vmul.f32 0.5, %v3901_v36 }
0x135c   :  { %v2151_v55 = vadd.f32 %v2150_v20, %v4040_v41  ;;  %v2138_v57 = vadd.f32 %v2137_v37, %v4057_v45 }
0x135e   :  { %2802 = vtanh.f32 %v2151_v55  ;;  %v2154_v39 = vmul.f32 0.5, %v2138_v57  ;;  %v2155_v17 = vmul.f32 0.5, %v2151_v55 }
0x135f   :  { %2804 = vtanh.f32 %v2092_v19 }
0x1360   :  { %v2077_v59 = vpop.f32.mrf.mxu2  ;;  %v2090_v61 = vpop.f32.mrf.mxu3  ;;  %2806 = vtanh.f32 %v2154_v39 }
0x1361   :  { %v2801_v6 = vpop.eup %2800 }
0x1362   :  { %2103 = vrot.lane.b32.xlu2 %v2801_v6, %s3017_s15 }
0x1363   :  { %v2139_v2 = vpop.f32.mrf.mxu0  ;;  %v2152_v43 = vpop.f32.mrf.mxu1 }
0x1364   :  { %v2803_v54 = vpop.eup %2802 }
0x1365   :  { %2165 = vrot.lane.b32.xlu0 %v2803_v54, %s3017_s15  ;;  %v2805_v62 = vpop.eup %2804 }
0x1366   :  { %v2096_v51 = vmul.f32 0.5, %v2805_v62  ;;  %v2807_v27 = vpop.eup %2806 }
0x1367   :  { %v2158_v12 = vmul.f32 0.5, %v2807_v27 }
0x1368   :  { %v2098_v42 = vadd.f32 0.5, %v2096_v51 }
0x1369   :  { %v2160_v23 = vadd.f32 0.5, %v2158_v12 }
0x136a   :  { %v2101_v60 = vmul.f32 %v2098_v42, %v3884_v52 }
0x136b   :  { %v2163_v4 = vmul.f32 %v2160_v23, %v3879_v40  ;;  %v4059_v40 = vld [vmem:[#allocation25_spill] sm:$0xff] }
0x136c   :  { %v921_v18 = vsel %vm920_vm3, %v4059_v40, -inf }
0x13bc   :  { %v2104_v0 = vpop.permute.xlu2 %2103 }
0x13bd   :  { %v2106_v46 = vmul.f32 %v2104_v0, %v2098_v42 }
0x13bf   :  { %2108 = vrot.lane.b32.xlu0 %v2106_v46, %s3017_s15 }
0x13d7   :  { %v2166_v38 = vpop.permute.xlu0 %2165 }
0x13d8   :  { %v2168_v58 = vmul.f32 %v2166_v38, %v2160_v23  ;;  %v4061_v23 = vld [vmem:[#allocation21_spill] sm:$0xff] }
0x13d9   :  { %v1144_v38 = vsel %vm920_vm3, %v4061_v23, -inf }
0x13da   :  { %2170 = vrot.lane.b32.xlu1 %v2168_v58, %s3017_s15 }
0x1431   :  { %v2109_v7 = vpop.permute.xlu0 %2108 }
0x1432   :  { %v2111_v30 = vadd.f32 %v2109_v7, %v2101_v60 }
0x1434   :  { %2808 = vtanh.f32 %v2111_v30 }
0x143a   :  { %v2809_v44 = vpop.eup %2808 }
0x143b   :  { %2114 = vrot.lane.b32.xlu2 %v2809_v44, %s3017_s15 }
0x144c   :  { %v2171_v9 = vpop.permute.xlu1 %2170 }
0x144d   :  { %v2173_v50 = vadd.f32 %v2171_v9, %v2163_v4 }
0x144f   :  { %2810 = vtanh.f32 %v2173_v50 }
0x1450   :  { %2812 = vtanh.f32 %v2155_v17 }
0x1451   :  { %2814 = vtanh.f32 %v2093_v48 }
0x1455   :  { %v2811_v22 = vpop.eup %2810 }
0x1456   :  { %2176 = vrot.lane.b32.xlu1 %v2811_v22, %s3017_s15  ;;  %v2813_v28 = vpop.eup %2812 }
0x1457   :  { %v2159_v35 = vmul.f32 0.5, %v2813_v28  ;;  %v2815_v21 = vpop.eup %2814 }
0x1458   :  { %v2097_v29 = vmul.f32 0.5, %v2815_v21 }
0x1459   :  { %v2161_v47 = vadd.f32 0.5, %v2159_v35 }
0x145a   :  { %v2099_v5 = vadd.f32 0.5, %v2097_v29 }
0x1495   :  { %v2115_v63 = vpop.permute.xlu2 %2114 }
0x1496   :  { %v2117_v10 = vmul.f32 %v2115_v63, %v2099_v5 }
0x1498   :  { %v2206_v8 = vpack.c.bf16 %v2117_v10, %v2117_v10 }
0x14c8   :  { %v2177_v52 = vpop.permute.xlu1 %2176 }
0x14c9   :  { %v3915_v53 = vmul.f32 %v2177_v52, %v2161_v47 }
0x14cb   :  { %v2207_v34 = vpack.c.bf16 %v3915_v53, %v3915_v53 }
0x14cd   :  { %v2209_v1 = vunpack.c.l.b16 %v2207_v34 }
0x14cf   :  { %v2210_v3 = vpack.c.b16 %v2209_v1, %v2209_v1 }
0x14d1   :  { %2211 = vrot.lane.b32.xlu0 %v2210_v3, %s3017_s15 }
0x14fb   :  { %922 = vmax.xlane.f32.xlu0 %v921_v18 }
0x1503   :  { %1363 = vmax.xlane.f32.xlu0 %v1362_v49 }
0x150b   :  { %1579 = vmax.xlane.f32.xlu0 %v1578_v14 }
0x1513   :  { %2027 = vmax.xlane.f32.xlu0 %v2026_v25 }
0x1543   :  { %v2212_v33 = vpop.permute.xlu0 %2211 }
0x1544   :  { %v2215_v15 = vsel %vm380_vm2, %v2206_v8, %v2212_v33 }
0x1545   :  { %2225 = vmatmul.bf16.vlgmr.msrb.gmra.mxu2 %v2215_v15  ;;  %2238 = vmatmul.bf16.vlgmr.msra.gmra.mxu3 %v2215_v15 }
0x15c8   :  { %v2226_v16 = vpop.f32.mrf.mxu2  ;;  %v2239_v24 = vpop.f32.mrf.mxu3 }
0x15c9   :  { %v3931_v56 = vadd.f32 %v2239_v24, %v4040_v41  ;;  %v2227_v55 = vadd.f32 %v2226_v16, %v4057_v45  ;;  %v923_v41 = vpop.xlane.xlu0 %922 }
0x15ca   :  { %v924_v11 = vsub.f32 %v4059_v40, %v923_v41 }
0x15cb   :  { %2816 = vtanh.f32 %v3931_v56  ;;  %v2243_v59 = vmul.f32 0.5, %v2227_v55  ;;  %v2244_v10 = vmul.f32 0.5, %v3931_v56 }
0x15cc   :  { %v925_v19 = vmul.f32 1.442695, %v924_v11  ;;  %v1802_v11 = vsel %vm920_vm3, %v3832_v32, -inf }
0x15cd   :  { %2818 = vtanh.f32 %v2243_v59 }
0x15ce   :  { %2820 = vpow2.f32 %v925_v19 }
0x15d0   :  { %v2228_v36 = vpop.f32.mrf.mxu2  ;;  %v2241_v37 = vpop.f32.mrf.mxu3 }
0x15d1   :  { %v2817_v20 = vpop.eup %2816  ;;  %v1364_v57 = vpop.xlane.xlu0 %1363 }
0x15d2   :  { %2254 = vrot.lane.b32.xlu1 %v2817_v20, %s3017_s15  ;;  %v1365_v25 = vsub.f32 %v4060_v26, %v1364_v57 }
0x15d3   :  { %v2819_v61 = vpop.eup %2818 }
0x15d4   :  { %v2247_v6 = vmul.f32 0.5, %v2819_v61  ;;  %v2821_v62 = vpop.eup %2820  ;;  %v1366_v21 = vmul.f32 1.442695, %v1365_v25 }
0x15d5   :  { %v927_v51 = vsel %vm920_vm3, %v2821_v62, 0.0 }
0x15d6   :  { %v2249_v2 = vadd.f32 0.5, %v2247_v6 }
0x15d8   :  { %v2252_v42 = vmul.f32 %v2249_v2, %v2173_v50 }
0x15d9   :  { %v1580_v39 = vpop.xlane.xlu0 %1579 }
0x15da   :  { %v1581_v27 = vsub.f32 %v3729_v13, %v1580_v39  ;;  %v2180_v13 = vsel %vm920_vm3, %v3915_v53, -inf }
0x15dc   :  { %v1582_v12 = vmul.f32 1.442695, %v1581_v27 }
0x15e1   :  { %v2028_v58 = vpop.xlane.xlu0 %2027 }
0x15e2   :  { %v2029_v7 = vsub.f32 %v3891_v31, %v2028_v58 }
0x15e4   :  { %v2030_v44 = vmul.f32 1.442695, %v2029_v7 }
0x1644   :  { %v2255_v43 = vpop.permute.xlu1 %2254 }
0x1645   :  { %v2257_v54 = vmul.f32 %v2255_v43, %v2249_v2 }
0x1647   :  { %2259 = vrot.lane.b32.xlu2 %v2257_v54, %s3017_s15 }
0x1670   :  { %928 = vadd.xlane.f32.xlu2 %v927_v51 }
0x16a1   :  { %v2260_v45 = vpop.permute.xlu2 %2259 }
0x16a2   :  { %v2262_v0 = vadd.f32 %v2260_v45, %v2252_v42 }
0x16a4   :  { %2822 = vtanh.f32 %v2262_v0 }
0x16a5   :  { %2824 = vpow2.f32 %v1582_v12 }
0x16a6   :  { %2826 = vpow2.f32 %v2030_v44 }
0x16aa   :  { %v2823_v46 = vpop.eup %2822 }
0x16ab   :  { %2265 = vrot.lane.b32.xlu1 %v2823_v46, %s3017_s15  ;;  %v3943_v60 = vpop.eup %2824 }
0x16ac   :  { %v1584_v30 = vsel %vm920_vm3, %v3943_v60, 0.0  ;;  %v3950_v9 = vpop.eup %2826 }
0x16ad   :  { %v2032_v17 = vsel %vm920_vm3, %v3950_v9, 0.0 }
0x16d5   :  { %1145 = vmax.xlane.f32.xlu1 %v1144_v38 }
0x16dd   :  { %1585 = vadd.xlane.f32.xlu1 %v1584_v30 }
0x16e3   :  { %v929_v4 = vpop.xlane.xlu2 %928 }
0x16e4   :  { %2828 = vrcp.f32 %v929_v4  ;;  %v941_v28 = vand.u32 2147483648, %v929_v4  ;;  %v939_v47 = vand.u32 2147483647, %v929_v4  ;;  %vm935_vm5 = vweird.f32 %v929_v4 }
0x16e5   :  { %2181 = vmax.xlane.f32.xlu1 %v2180_v13 }
0x16e6   :  { %v942_v34 = vor.u32 1.1754944e-38, %v941_v28  ;;  %vm940_vm7 = vcmp.eq.f32.partialorder %v939_v47, 8.507059e+37 }
0x16ea   :  { %v2829_v50 = vpop.eup %2828 }
0x16eb   :  { %v931_v22 = vmul.f32 %v2829_v50, %v929_v4  ;;  %vm936_vm4 = vweird.f32 %v2829_v50 }
0x16ec   :  { %vm937_vm6 = vmor %vm935_vm5, %vm936_vm4 }
0x16ed   :  { %v932_v31 = vsub.f32 1.0, %v931_v22  ;;  %2033 = vadd.xlane.f32.xlu1 %v2032_v17 }
0x16ef   :  { %v933_v35 = vmul.f32 %v2829_v50, %v932_v31 }
0x16f1   :  { %v934_v52 = vadd.f32 %v2829_v50, %v933_v35 }
0x16f3   :  { %v938_v1 = vsel %vm937_vm6, %v2829_v50, %v934_v52 }
0x16f4   :  { %v943_v3 = vsel %vm940_vm7, %v942_v34, %v938_v1 }
0x16f5   :  { %v944_v40 = vmul.f32 %v2821_v62, %v943_v3 }
0x16f7   :  { %945 = vst.msk [vmem:[#allocation11] sm:$0x3] %vm920_vm3, %v944_v40 }
0x171d   :  { %v2266_v18 = vpop.permute.xlu1 %2265 }
0x1748   :  { %v1146_v49 = vpop.xlane.xlu1 %1145 }
0x1749   :  { %v1147_v14 = vsub.f32 %v4061_v23, %v1146_v49 }
0x174b   :  { %v1148_v48 = vmul.f32 1.442695, %v1147_v14 }
0x174d   :  { %2830 = vpow2.f32 %v1148_v48 }
0x1750   :  { %v1586_v29 = vpop.xlane.xlu1 %1585 }
0x1751   :  { %2832 = vrcp.f32 %v1586_v29  ;;  %v1598_v24 = vand.u32 2147483648, %v1586_v29  ;;  %v1596_v37 = vand.u32 2147483647, %v1586_v29  ;;  %vm1592_vm9 = vweird.f32 %v1586_v29 }
0x1752   :  { %2834 = vpow2.f32 %v1366_v21 }
0x1753   :  { %v3957_v63 = vpop.eup %2830  ;;  %2836 = vtanh.f32 %v2244_v10  ;;  %v1599_v56 = vor.u32 1.1754944e-38, %v1598_v24  ;;  %vm1597_vm11 = vcmp.eq.f32.partialorder %v1596_v37, 8.507059e+37 }
0x1754   :  { %v1150_v5 = vsel %vm920_vm3, %v3957_v63, 0.0 }
0x1755   :  { %1151 = vadd.xlane.f32.xlu2 %v1150_v5 }
0x1757   :  { %v2833_v8 = vpop.eup %2832 }
0x1758   :  { %v1588_v33 = vmul.f32 %v2833_v8, %v1586_v29  ;;  %v2182_v15 = vpop.xlane.xlu1 %2181  ;;  %v3962_v16 = vpop.eup %2834  ;;  %vm1593_vm8 = vweird.f32 %v2833_v8 }
0x1759   :  { %v1368_v20 = vsel %vm920_vm3, %v3962_v16, 0.0  ;;  %v2837_v59 = vpop.eup %2836  ;;  %vm1594_vm10 = vmor %vm1592_vm9, %vm1593_vm8  ;;  %v2183_v41 = vsub.f32 %v3915_v53, %v2182_v15 }
0x175a   :  { %v1589_v26 = vsub.f32 1.0, %v1588_v33  ;;  %v2248_v43 = vmul.f32 0.5, %v2837_v59 }
0x175b   :  { %v2184_v51 = vmul.f32 1.442695, %v2183_v41 }
0x175c   :  { %v1590_v36 = vmul.f32 %v2833_v8, %v1589_v26  ;;  %v2250_v19 = vadd.f32 0.5, %v2248_v43 }
0x175d   :  { %1369 = vadd.xlane.f32.xlu2 %v1368_v20 }
0x175e   :  { %v1591_v55 = vadd.f32 %v2833_v8, %v1590_v36  ;;  %v3971_v42 = vmul.f32 %v2266_v18, %v2250_v19 }
0x1760   :  { %v1595_v61 = vsel %vm1594_vm10, %v2833_v8, %v1591_v55  ;;  %v2034_v6 = vpop.xlane.xlu1 %2033  ;;  %v2269_v53 = vsel %vm920_vm3, %v3971_v42, -inf }
0x1761   :  { %v1600_v2 = vsel %vm1597_vm11, %v1599_v56, %v1595_v61  ;;  %2838 = vrcp.f32 %v2034_v6  ;;  %v2046_v46 = vand.u32 2147483648, %v2034_v6  ;;  %v2044_v39 = vand.u32 2147483647, %v2034_v6 }
0x1762   :  { %v1601_v54 = vmul.f32 %v3943_v60, %v1600_v2  ;;  %2840 = vpow2.f32 %v2184_v51  ;;  %vm2040_vm13 = vweird.f32 %v2034_v6 }
0x1763   :  { %v2047_v12 = vor.u32 1.1754944e-38, %v2046_v46  ;;  %vm2045_vm15 = vcmp.eq.f32.partialorder %v2044_v39, 8.507059e+37 }
0x1764   :  { %1603 = vst.msk [vmem:[#allocation11 + $0x6] sm:$0x3] %vm920_vm3, %v1601_v54 }
0x1765   :  { %1803 = vmax.xlane.f32.xlu2 %v1802_v11 }
0x1767   :  { %v2839_v62 = vpop.eup %2838 }
0x1768   :  { %v2036_v45 = vmul.f32 %v2839_v62, %v2034_v6  ;;  %vm2041_vm12 = vweird.f32 %v2839_v62  ;;  %v3975_v38 = vpop.eup %2840 }
0x1769   :  { %vm2042_vm14 = vmor %vm2040_vm13, %vm2041_vm12  ;;  %v2186_v7 = vsel %vm920_vm3, %v3975_v38, 0.0 }
0x176a   :  { %v2037_v0 = vsub.f32 1.0, %v2036_v45 }
0x176c   :  { %v2038_v57 = vmul.f32 %v2839_v62, %v2037_v0 }
0x176d   :  { %2270 = vmax.xlane.f32.xlu2 %v2269_v53 }
0x176e   :  { %v2039_v27 = vadd.f32 %v2839_v62, %v2038_v57 }
0x1770   :  { %v2043_v23 = vsel %vm2042_vm14, %v2839_v62, %v2039_v27 }
0x1771   :  { %v2048_v58 = vsel %vm2045_vm15, %v2047_v12, %v2043_v23 }
0x1772   :  { %v2049_v60 = vmul.f32 %v3950_v9, %v2048_v58 }
0x1774   :  { %2051 = vst.msk [vmem:[#allocation11 + $0xa] sm:$0x3] %vm920_vm3, %v2049_v60 }
0x1775   :  { %2187 = vadd.xlane.f32.xlu2 %v2186_v7 }
0x17c8   :  { %v1152_v30 = vpop.xlane.xlu2 %1151 }
0x17c9   :  { %2842 = vrcp.f32 %v1152_v30  ;;  %v1164_v22 = vand.u32 2147483648, %v1152_v30  ;;  %v1162_v31 = vand.u32 2147483647, %v1152_v30  ;;  %vm1158_vm1 = vweird.f32 %v1152_v30 }
0x17cb   :  { %v1165_v35 = vor.u32 1.1754944e-38, %v1164_v22  ;;  %vm1163_vm4 = vcmp.eq.f32.partialorder %v1162_v31, 8.507059e+37 }
0x17cf   :  { %v2843_v44 = vpop.eup %2842 }
0x17d0   :  { %v1154_v4 = vmul.f32 %v2843_v44, %v1152_v30  ;;  %v1370_v13 = vpop.xlane.xlu2 %1369  ;;  %vm1159_vm0 = vweird.f32 %v2843_v44 }
0x17d1   :  { %2844 = vrcp.f32 %v1370_v13  ;;  %vm1160_vm2 = vmor %vm1158_vm1, %vm1159_vm0  ;;  %v1382_v49 = vand.u32 2147483648, %v1370_v13  ;;  %v1380_v48 = vand.u32 2147483647, %v1370_v13  ;;  %vm1376_vm6 = vweird.f32 %v1370_v13 }
0x17d2   :  { %v1155_v50 = vsub.f32 1.0, %v1154_v4 }
0x17d3   :  { %v1383_v29 = vor.u32 1.1754944e-38, %v1382_v49  ;;  %vm1381_vm8 = vcmp.eq.f32.partialorder %v1380_v48, 8.507059e+37 }
0x17d4   :  { %v1156_v17 = vmul.f32 %v2843_v44, %v1155_v50 }
0x17d6   :  { %v1157_v28 = vadd.f32 %v2843_v44, %v1156_v17 }
0x17d7   :  { %v2845_v9 = vpop.eup %2844 }
0x17d8   :  { %v1161_v47 = vsel %vm1160_vm2, %v2843_v44, %v1157_v28  ;;  %v1372_v52 = vmul.f32 %v2845_v9, %v1370_v13  ;;  %v1804_v34 = vpop.xlane.xlu2 %1803  ;;  %vm1377_vm5 = vweird.f32 %v2845_v9 }
0x17d9   :  { %v1166_v1 = vsel %vm1163_vm4, %v1165_v35, %v1161_v47  ;;  %v1805_v3 = vsub.f32 %v3832_v32, %v1804_v34  ;;  %vm1378_vm7 = vmor %vm1376_vm6, %vm1377_vm5 }
0x17da   :  { %v1167_v40 = vmul.f32 %v3957_v63, %v1166_v1  ;;  %v1373_v18 = vsub.f32 1.0, %v1372_v52 }
0x17db   :  { %v1806_v14 = vmul.f32 1.442695, %v1805_v3 }
0x17dc   :  { %1169 = vst.msk [vmem:[#allocation11 + $0x2] sm:$0x3] %vm920_vm3, %v1167_v40  ;;  %v1374_v25 = vmul.f32 %v2845_v9, %v1373_v18 }
0x17dd   :  { %2846 = vpow2.f32 %v1806_v14 }
0x17de   :  { %v1375_v21 = vadd.f32 %v2845_v9, %v1374_v25 }
0x17e0   :  { %v1379_v5 = vsel %vm1378_vm7, %v2845_v9, %v1375_v21  ;;  %v2271_v10 = vpop.xlane.xlu2 %2270 }
0x17e1   :  { %v1384_v8 = vsel %vm1381_vm8, %v1383_v29, %v1379_v5  ;;  %v2272_v32 = vsub.f32 %v3971_v42, %v2271_v10 }
0x17e2   :  { %v1385_v63 = vmul.f32 %v3962_v16, %v1384_v8 }
0x17e3   :  { %v2847_v33 = vpop.eup %2846  ;;  %v2273_v15 = vmul.f32 1.442695, %v2272_v32 }
0x17e4   :  { %1387 = vst.msk [vmem:[#allocation11 + $0x4] sm:$0x3] %vm920_vm3, %v1385_v63  ;;  %v1808_v26 = vsel %vm920_vm3, %v2847_v33, 0.0 }
0x17e5   :  { %2848 = vpow2.f32 %v2273_v15  ;;  %1809 = vadd.xlane.f32.xlu0 %v1808_v26 }
0x17e8   :  { %v2188_v24 = vpop.xlane.xlu2 %2187 }
0x17e9   :  { %2850 = vrcp.f32 %v2188_v24  ;;  %v2200_v56 = vand.u32 2147483648, %v2188_v24  ;;  %v2198_v16 = vand.u32 2147483647, %v2188_v24  ;;  %vm2194_vm10 = vweird.f32 %v2188_v24 }
0x17eb   :  { %v2849_v36 = vpop.eup %2848  ;;  %v2201_v2 = vor.u32 1.1754944e-38, %v2200_v56  ;;  %vm2199_vm12 = vcmp.eq.f32.partialorder %v2198_v16, 8.507059e+37 }
0x17ec   :  { %v2275_v37 = vsel %vm920_vm3, %v2849_v36, 0.0 }
0x17ed   :  { %2276 = vadd.xlane.f32.xlu0 %v2275_v37 }
0x17ef   :  { %v2851_v20 = vpop.eup %2850 }
0x17f0   :  { %v2190_v55 = vmul.f32 %v2851_v20, %v2188_v24  ;;  %vm2195_vm9 = vweird.f32 %v2851_v20 }
0x17f1   :  { %vm2196_vm11 = vmor %vm2194_vm10, %vm2195_vm9 }
0x17f2   :  { %v2191_v59 = vsub.f32 1.0, %v2190_v55 }
0x17f4   :  { %v2192_v61 = vmul.f32 %v2851_v20, %v2191_v59 }
0x17f6   :  { %v2193_v6 = vadd.f32 %v2851_v20, %v2192_v61 }
0x17f8   :  { %v2197_v43 = vsel %vm2196_vm11, %v2851_v20, %v2193_v6 }
0x17f9   :  { %v2202_v54 = vsel %vm2199_vm12, %v2201_v2, %v2197_v43 }
0x17fa   :  { %v2203_v41 = vmul.f32 %v3975_v38, %v2202_v54 }
0x17fc   :  { %2205 = vst.msk [vmem:[#allocation11 + $0xc] sm:$0x3] %vm920_vm3, %v2203_v41 }
0x1858   :  { %v1810_v11 = vpop.xlane.xlu0 %1809 }
0x1859   :  { %2852 = vrcp.f32 %v1810_v11  ;;  %v1822_v45 = vand.u32 2147483648, %v1810_v11  ;;  %v1820_v46 = vand.u32 2147483647, %v1810_v11  ;;  %vm1816_vm14 = vweird.f32 %v1810_v11 }
0x185b   :  { %v1823_v53 = vor.u32 1.1754944e-38, %v1822_v45  ;;  %vm1821_vm0 = vcmp.eq.f32.partialorder %v1820_v46, 8.507059e+37 }
0x185f   :  { %v2853_v19 = vpop.eup %2852 }
0x1860   :  { %v1812_v62 = vmul.f32 %v2853_v19, %v1810_v11  ;;  %v2277_v51 = vpop.xlane.xlu0 %2276  ;;  %vm1817_vm13 = vweird.f32 %v2853_v19 }
0x1861   :  { %2854 = vrcp.f32 %v2277_v51  ;;  %vm1818_vm15 = vmor %vm1816_vm14, %vm1817_vm13  ;;  %v2289_v60 = vand.u32 2147483648, %v2277_v51  ;;  %v2287_v30 = vand.u32 2147483647, %v2277_v51  ;;  %vm2283_vm2 = vweird.f32 %v2277_v51 }
0x1862   :  { %v1813_v42 = vsub.f32 1.0, %v1812_v62 }
0x1863   :  { %v2290_v4 = vor.u32 1.1754944e-38, %v2289_v60  ;;  %vm2288_vm5 = vcmp.eq.f32.partialorder %v2287_v30, 8.507059e+37 }
0x1864   :  { %v1814_v0 = vmul.f32 %v2853_v19, %v1813_v42 }
0x1866   :  { %v1815_v57 = vadd.f32 %v2853_v19, %v1814_v0 }
0x1867   :  { %v2855_v39 = vpop.eup %2854 }
0x1868   :  { %v1819_v27 = vsel %vm1818_vm15, %v2853_v19, %v1815_v57  ;;  %v2279_v12 = vmul.f32 %v2855_v39, %v2277_v51  ;;  %vm2284_vm1 = vweird.f32 %v2855_v39 }
0x1869   :  { %v1824_v23 = vsel %vm1821_vm0, %v1823_v53, %v1819_v27  ;;  %vm2285_vm4 = vmor %vm2283_vm2, %vm2284_vm1 }
0x186a   :  { %v1825_v38 = vmul.f32 %v2847_v33, %v1824_v23  ;;  %v2280_v58 = vsub.f32 1.0, %v2279_v12 }
0x186c   :  { %1827 = vst.msk [vmem:[#allocation11 + $0x8] sm:$0x3] %vm920_vm3, %v1825_v38  ;;  %v2281_v7 = vmul.f32 %v2855_v39, %v2280_v58 }
0x186e   :  { %v2282_v44 = vadd.f32 %v2855_v39, %v2281_v7 }
0x1870   :  { %v2286_v13 = vsel %vm2285_vm4, %v2855_v39, %v2282_v44 }
0x1871   :  { %v2291_v50 = vsel %vm2288_vm5, %v2290_v4, %v2286_v13 }
0x1872   :  { %v2292_v22 = vmul.f32 %v2849_v36, %v2291_v50 }
0x1874   :  { %2294 = vst.msk [vmem:[#allocation11 + $0xe] sm:$0x3] %vm920_vm3, %v2292_v22 }
0x1875   :  { %2307 = dma.vmem_to_hbm [thread:$0]  %s2300_s18, 256, %s2302_s21, [#allocation4], %s3019_s22, %s3019_s22, %s3020_s23  }
0x1876   :  { %3006 = dma.done.wait [#allocation4], 256  }
0x1877   :  { %3007 = vsyncadd [#allocation4], 4294967040 }
0x1878   :  { %2312 = vsyncpa [#allocation3], 1 }
0x1879   :  { %2313 = vsyncpa [#allocation6], 1 }
0x187a   :  { %2314 = vsyncpa [#allocation9], 1 }
0x187b   :  { %2315 = vsyncpa [#allocation4], 1 }

</bundles_post_ra>
